<compile_context>
chip_gen: v5e
topology: v5e:2x2
jax: 0.10.0
libtpu: 0.0.40
codegen_flags: <defaults>
</compile_context>

<pallas_src>
import jax
import jax.numpy as jnp
import numpy as np
from jax.experimental import pallas as pl
from jax.experimental.pallas import tpu as pltpu

# Model hyperparameters (module defaults).
EMBEDDING_DIM = 20
OUTPUT_DIM = 47
OUT_CHANNELS = 66
FILTER_SIZES = (2, 3, 4)
NUM_FILTERS = len(FILTER_SIZES)
KMIN = min(FILTER_SIZES)
KMAX = max(FILTER_SIZES)
OUT_PAD = 128            # lane-dense padded output width (>= OUTPUT_DIM)

# Example shapes.
BATCH = 256
SEQ = 8
B_TILE = 128             # grid = (2,) -> both TCs on v7x, low step overhead


def textcnn_kernel(x_ref, wc_ref, bc_ref, mask_ref, lw_ref, lb_ref, o_ref):
    """One batch tile: fused conv -> bias+ReLU -> mask -> max-pool -> linear."""
    x = x_ref[...]                               # (S_pad, Bt, E) float32
    s_pad, bt, _ = x.shape
    l_win = s_pad - KMAX + 1                     # = S - KMIN + 1 window positions

    # 4-tap sliding windows, (L, Bt)-major so reshapes split on Bt (mult of 8):
    #   win[l, b, j*E + e] = x_pad[l + j, b, e]
    win = jnp.concatenate([x[j:j + l_win] for j in range(KMAX)], axis=-1)
    win2d = win.reshape(l_win * bt, KMAX * EMBEDDING_DIM)       # (L*Bt, 80)

    # One fused MXU matmul for all three filter widths: (L*Bt, 80) @ (80, 198).
    y = jnp.dot(win2d, wc_ref[...], preferred_element_type=jnp.float32)
    y = jnp.maximum(y + bc_ref[...], 0.0)                       # bias + ReLU
    y = y.reshape(l_win, bt, NUM_FILTERS * OUT_CHANNELS)        # (L, Bt, 198)

    # Zero out invalid trailing positions per filter (post-ReLU, so 0 is safe),
    # then global max-pool over the leading L axis (cheap elementwise max).
    y = y * mask_ref[...]                                       # (L,1,198) bcast
    feat = jnp.max(y, axis=0)                                   # (Bt, 198)

    # Fused final Linear against the padded (198, 128) weight -> lane-dense store.
    out = jnp.dot(feat, lw_ref[...], preferred_element_type=jnp.float32)
    o_ref[...] = (out + lb_ref[...]).astype(o_ref.dtype)


def textcnn_forward(x_bse, kp, *, b_tile=B_TILE):
    """x_bse: (B, S, E) float32.  kp: kernel-layout params (prepare_kernel_params)."""
    B, S, E = x_bse.shape
    assert B % b_tile == 0, "batch must be a multiple of the batch tile"
    assert S >= KMAX, "sequence must be at least the largest filter size"
    l_win = S - KMIN + 1
    s_pad = S + (KMAX - KMIN)

    # (S, B, E) layout, zero-padded along S so every 4-tap window is in-bounds.
    x_sbe = jnp.transpose(x_bse, (1, 0, 2))
    x_pad = jnp.pad(x_sbe, ((0, KMAX - KMIN), (0, 0), (0, 0)))

    # Per-filter validity mask over window positions (built host-side, tiny).
    mask = np.zeros((l_win, 1, NUM_FILTERS * OUT_CHANNELS), np.float32)
    for i, k in enumerate(FILTER_SIZES):
        mask[:S - k + 1, 0, i * OUT_CHANNELS:(i + 1) * OUT_CHANNELS] = 1.0
    mask = jnp.asarray(mask)

    grid = (B // b_tile,)
    in_specs = [
        # x: streamed over the batch grid axis, (S_pad, b_tile, E) blocks.
        pl.BlockSpec((s_pad, b_tile, E), lambda i: (0, i, 0)),
        # Weights / biases / mask: constant index maps -> VMEM-resident.
        pl.BlockSpec(kp["wc"].shape, lambda i: (0, 0)),
        pl.BlockSpec(kp["bc"].shape, lambda i: (0, 0)),
        pl.BlockSpec(mask.shape, lambda i: (0, 0, 0)),
        pl.BlockSpec(kp["lw"].shape, lambda i: (0, 0)),
        pl.BlockSpec(kp["lb"].shape, lambda i: (0, 0)),
    ]
    out_specs = pl.BlockSpec((b_tile, OUT_PAD), lambda i: (i, 0))

    out_padded = pl.pallas_call(
        textcnn_kernel,
        out_shape=jax.ShapeDtypeStruct((B, OUT_PAD), jnp.float32),
        grid=grid,
        in_specs=in_specs,
        out_specs=out_specs,
        compiler_params=pltpu.CompilerParams(
            dimension_semantics=("parallel",),
            # Demo tiles need ~3 MiB; keep headroom vs v7x's 64 MiB physical
            # while lifting v5e's 16 MiB scoped default for larger b_tile.
            vmem_limit_bytes=48 * 1024 * 1024),
    )(x_pad, kp["wc"], kp["bc"], mask, kp["lw"], kp["lb"])

    return out_padded[:, :OUTPUT_DIM]


def init_params(key):
    """Deterministic synthetic parameters, PyTorch-style layout."""
    keys = jax.random.split(key, 8)
    params = {}
    for i, k in enumerate(FILTER_SIZES):
        fan_in = 1 * k * EMBEDDING_DIM
        bound = 1.0 / np.sqrt(fan_in)
        params[f"w{k}"] = jax.random.uniform(
            keys[2 * i], (OUT_CHANNELS, k, EMBEDDING_DIM), jnp.float32, -bound, bound)
        params[f"b{k}"] = jax.random.uniform(
            keys[2 * i + 1], (OUT_CHANNELS,), jnp.float32, -bound, bound)
    fan_in = OUT_CHANNELS * NUM_FILTERS
    bound = 1.0 / np.sqrt(fan_in)
    params["lw"] = jax.random.uniform(keys[6], (OUTPUT_DIM, fan_in),
                                      jnp.float32, -bound, bound)
    params["lb"] = jax.random.uniform(keys[7], (OUTPUT_DIM,),
                                      jnp.float32, -bound, bound)
    return params


def prepare_kernel_params(p):
    """Host-side layout prep: fused conv weight/bias and padded linear weight."""
    C, E = OUT_CHANNELS, EMBEDDING_DIM

    # Combined conv weight (KMAX*E, 3*C): rows >= k*E are zero per filter block.
    wc = np.zeros((KMAX * E, NUM_FILTERS * C), np.float32)
    bc = np.zeros((1, NUM_FILTERS * C), np.float32)
    for i, k in enumerate(FILTER_SIZES):
        w = np.asarray(p[f"w{k}"])                       # (C, k, E)
        wc[:k * E, i * C:(i + 1) * C] = w.reshape(C, k * E).T
        bc[0, i * C:(i + 1) * C] = np.asarray(p[f"b{k}"])

    # Fused Linear weight (3*C, OUT_PAD): lw.T zero-padded in the output dim
    # so the kernel's output store is lane-dense (128 wide).
    lw_pad = np.zeros((NUM_FILTERS * C, OUT_PAD), np.float32)
    lw_pad[:, :OUTPUT_DIM] = np.asarray(p["lw"]).T
    lb_pad = np.zeros((1, OUT_PAD), np.float32)
    lb_pad[0, :OUTPUT_DIM] = np.asarray(p["lb"])

    return {"wc": jnp.asarray(wc), "bc": jnp.asarray(bc),
            "lw": jnp.asarray(lw_pad), "lb": jnp.asarray(lb_pad)}


def reference_forward(x_bse, p):
    """Pure-JAX reference of the PyTorch forward, for correctness check."""
    feats = []
    B, S, _ = x_bse.shape
    for k in FILTER_SIZES:
        w = p[f"w{k}"]                  # (C, k, E)
        b = p[f"b{k}"]                  # (C,)
        L = S - k + 1
        acc = jnp.zeros((B, L, OUT_CHANNELS), jnp.float32)
        for j in range(k):
            acc = acc + jnp.einsum('ble,ce->blc', x_bse[:, j:j + L, :], w[:, j, :])
        acc = jnp.maximum(acc + b[None, None, :], 0.0)
        feats.append(jnp.max(acc, axis=1))
    concat = jnp.concatenate(feats, axis=1)
    return concat @ p["lw"].T + p["lb"][None, :]


if __name__ == "__main__":
    key = jax.random.PRNGKey(0)
    k_x, k_p = jax.random.split(key)

    # PyTorch-style input (B, 1, S, E); kernel works on the squeezed (B, S, E).
    x_nchw = jax.random.normal(k_x, (BATCH, 1, SEQ, EMBEDDING_DIM), jnp.float32)
    x_bse = x_nchw[:, 0, :, :]

    torch_params = init_params(k_p)
    kparams = prepare_kernel_params(torch_params)

    out = textcnn_forward(x_bse, kparams, b_tile=B_TILE)
    out = jax.block_until_ready(out)

    ref = reference_forward(x_bse, torch_params)
    assert out.shape == (BATCH, OUTPUT_DIM)
    np.testing.assert_allclose(np.asarray(out), np.asarray(ref),
                               rtol=1e-4, atol=1e-4)
    print("KERNEL_OK")
</pallas_src>

<mosaic_0001>
module attributes {stable_mosaic.version = 11 : i64} {
  func.func @textcnn_kernel(%arg0: i32, %arg1: memref<10x128x20xf32, #tpu.memory_space<vmem>>, %arg2: memref<80x198xf32, #tpu.memory_space<vmem>>, %arg3: memref<1x198xf32, #tpu.memory_space<vmem>>, %arg4: memref<7x1x198xf32, #tpu.memory_space<vmem>>, %arg5: memref<198x128xf32, #tpu.memory_space<vmem>>, %arg6: memref<1x128xf32, #tpu.memory_space<vmem>>, %arg7: memref<128x128xf32, #tpu.memory_space<vmem>>) attributes {dimension_semantics = [#tpu.dimension_semantics<parallel>], iteration_bounds = array<i64: 2>, scalar_prefetch = 0 : i64, scratch_operands = 0 : i64, tpu.core_type = #tpu.core_type<tc>, window_params = [{transform_indices = @transform_0, window_bounds = array<i64: 10, 128, 20>}, {pipeline_mode = #tpu.pipeline_mode<synchronous>, transform_indices = @transform_1, window_bounds = array<i64: 80, 198>}, {pipeline_mode = #tpu.pipeline_mode<synchronous>, transform_indices = @transform_2, window_bounds = array<i64: 1, 198>}, {pipeline_mode = #tpu.pipeline_mode<synchronous>, transform_indices = @transform_3, window_bounds = array<i64: 7, 1, 198>}, {pipeline_mode = #tpu.pipeline_mode<synchronous>, transform_indices = @transform_4, window_bounds = array<i64: 198, 128>}, {pipeline_mode = #tpu.pipeline_mode<synchronous>, transform_indices = @transform_5, window_bounds = array<i64: 1, 128>}, {transform_indices = @transform_6, window_bounds = array<i64: 128, 128>}]} {
    %c0 = arith.constant 0 : index
    %c0_0 = arith.constant 0 : index
    %c0_1 = arith.constant 0 : index
    %0 = vector.load %arg1[%c0, %c0_0, %c0_1] : memref<10x128x20xf32, #tpu.memory_space<vmem>>, vector<10x128x20xf32>
    %1 = vector.extract_strided_slice %0 {offsets = [0, 0, 0], sizes = [7, 128, 20], strides = [1, 1, 1]} : vector<10x128x20xf32> to vector<7x128x20xf32>
    %2 = vector.extract_strided_slice %0 {offsets = [1, 0, 0], sizes = [7, 128, 20], strides = [1, 1, 1]} : vector<10x128x20xf32> to vector<7x128x20xf32>
    %3 = vector.extract_strided_slice %0 {offsets = [2, 0, 0], sizes = [7, 128, 20], strides = [1, 1, 1]} : vector<10x128x20xf32> to vector<7x128x20xf32>
    %4 = vector.extract_strided_slice %0 {offsets = [3, 0, 0], sizes = [7, 128, 20], strides = [1, 1, 1]} : vector<10x128x20xf32> to vector<7x128x20xf32>
    %5 = tpu.concatenate %1, %2, %3, %4 in 2 : vector<7x128x20xf32>, vector<7x128x20xf32>, vector<7x128x20xf32>, vector<7x128x20xf32> -> vector<7x128x80xf32>
    %6 = vector.shape_cast %5 : vector<7x128x80xf32> to vector<896x80xf32>
    %c0_2 = arith.constant 0 : index
    %c0_3 = arith.constant 0 : index
    %7 = vector.load %arg2[%c0_2, %c0_3] : memref<80x198xf32, #tpu.memory_space<vmem>>, vector<80x198xf32>
    %cst = arith.constant dense<0.000000e+00> : vector<896x198xf32>
    %8 = tpu.matmul %6, %7, %cst {dimension_numbers = #tpu.dot_dimension_numbers<[1], [0], [0], [1], [0, 0, 1, 1], [], []>} : vector<896x80xf32>, vector<80x198xf32>, vector<896x198xf32> -> vector<896x198xf32>
    %c0_4 = arith.constant 0 : index
    %c0_5 = arith.constant 0 : index
    %9 = vector.load %arg3[%c0_4, %c0_5] : memref<1x198xf32, #tpu.memory_space<vmem>>, vector<1x198xf32>
    %10 = vector.broadcast %9 : vector<1x198xf32> to vector<896x198xf32>
    %11 = arith.addf %8, %10 : vector<896x198xf32>
    %cst_6 = arith.constant 0.000000e+00 : f32
    %12 = vector.broadcast %cst_6 : f32 to vector<896x198xf32>
    %13 = arith.maximumf %11, %12 : vector<896x198xf32>
    %14 = vector.shape_cast %13 : vector<896x198xf32> to vector<7x128x198xf32>
    %c0_7 = arith.constant 0 : index
    %c0_8 = arith.constant 0 : index
    %c0_9 = arith.constant 0 : index
    %15 = vector.load %arg4[%c0_7, %c0_8, %c0_9] : memref<7x1x198xf32, #tpu.memory_space<vmem>>, vector<7x1x198xf32>
    %16 = vector.broadcast %15 : vector<7x1x198xf32> to vector<7x128x198xf32>
    %17 = arith.mulf %14, %16 : vector<7x128x198xf32>
    %cst_10 = arith.constant dense<0xFF800000> : vector<128x198xf32>
    %18 = vector.multi_reduction <maximumf>, %17, %cst_10 [0] : vector<7x128x198xf32> to vector<128x198xf32>
    %c0_11 = arith.constant 0 : index
    %c0_12 = arith.constant 0 : index
    %19 = vector.load %arg5[%c0_11, %c0_12] : memref<198x128xf32, #tpu.memory_space<vmem>>, vector<198x128xf32>
    %cst_13 = arith.constant dense<0.000000e+00> : vector<128x128xf32>
    %20 = tpu.matmul %18, %19, %cst_13 {dimension_numbers = #tpu.dot_dimension_numbers<[1], [0], [0], [1], [0, 0, 1, 1], [], []>} : vector<128x198xf32>, vector<198x128xf32>, vector<128x128xf32> -> vector<128x128xf32>
    %c0_14 = arith.constant 0 : index
    %c0_15 = arith.constant 0 : index
    %21 = vector.load %arg6[%c0_14, %c0_15] : memref<1x128xf32, #tpu.memory_space<vmem>>, vector<1x128xf32>
    %22 = vector.broadcast %21 : vector<1x128xf32> to vector<128x128xf32>
    %23 = arith.addf %20, %22 : vector<128x128xf32>
    %c0_16 = arith.constant 0 : index
    %c0_17 = arith.constant 0 : index
    %24 = vector.load %arg7[%c0_16, %c0_17] : memref<128x128xf32, #tpu.memory_space<vmem>>, vector<128x128xf32>
    tpu.vector_store %arg7[%c0_16, %c0_17], %23 {strides = array<i32>} : memref<128x128xf32, #tpu.memory_space<vmem>>, vector<128x128xf32>,
    return
  }
  func.func @transform_0(%arg0: i32) -> (i32, i32, i32) {
    %c0_i32 = arith.constant 0 : i32
    %c0_i32_0 = arith.constant 0 : i32
    %c0_i32_1 = arith.constant 0 : i32
    return %c0_i32, %arg0, %c0_i32_0 : i32, i32, i32
  }
  func.func @transform_1(%arg0: i32) -> (i32, i32) {
    %c0_i32 = arith.constant 0 : i32
    %c0_i32_0 = arith.constant 0 : i32
    %c0_i32_1 = arith.constant 0 : i32
    return %c0_i32, %c0_i32_0 : i32, i32
  }
  func.func @transform_2(%arg0: i32) -> (i32, i32) {
    %c0_i32 = arith.constant 0 : i32
    %c0_i32_0 = arith.constant 0 : i32
    %c0_i32_1 = arith.constant 0 : i32
    return %c0_i32, %c0_i32_0 : i32, i32
  }
  func.func @transform_3(%arg0: i32) -> (i32, i32, i32) {
    %c0_i32 = arith.constant 0 : i32
    %c0_i32_0 = arith.constant 0 : i32
    %c0_i32_1 = arith.constant 0 : i32
    %c0_i32_2 = arith.constant 0 : i32
    return %c0_i32, %c0_i32_0, %c0_i32_1 : i32, i32, i32
  }
  func.func @transform_4(%arg0: i32) -> (i32, i32) {
    %c0_i32 = arith.constant 0 : i32
    %c0_i32_0 = arith.constant 0 : i32
    %c0_i32_1 = arith.constant 0 : i32
    return %c0_i32, %c0_i32_0 : i32, i32
  }
  func.func @transform_5(%arg0: i32) -> (i32, i32) {
    %c0_i32 = arith.constant 0 : i32
    %c0_i32_0 = arith.constant 0 : i32
    %c0_i32_1 = arith.constant 0 : i32
    return %c0_i32, %c0_i32_0 : i32, i32
  }
  func.func @transform_6(%arg0: i32) -> (i32, i32) {
    %c0_i32 = arith.constant 0 : i32
    %c0_i32_0 = arith.constant 0 : i32
    return %arg0, %c0_i32 : i32, i32
  }
}

</mosaic_0001>

<bundles_post_ra>
// kernel: tpu_custom_call.1
= control target key start
LH: loop header
LB: loop body
LE: loop exit
PB: predicated region body
PF: predicated region fallthrough
CT: control target
= control target key end

     0   :  { %11 = vsyncpa [#allocation4], 0  ;;  %s9453_s0 = inlined_call_operand.vmem [shape: f32[10,256,20], index: 0, kind: input, shape index: {}]   ;;  %s9454_s1 = inlined_call_operand.vmem [shape: f32[80,198], index: 1, kind: input, shape index: {}]   ;;  %s9455_s2 = inlined_call_operand.vmem [shape: f32[1,198], index: 2, kind: input, shape index: {}]   ;;  %s9456_s3 = inlined_call_operand.vmem [shape: f32[7,1,198], index: 3, kind: input, shape index: {}]   ;;  %s9457_s4 = inlined_call_operand.vmem [shape: f32[198,128], index: 4, kind: input, shape index: {}]   ;;  %s9458_s5 = inlined_call_operand.vmem [shape: f32[1,128], index: 5, kind: input, shape index: {}]   ;;  %s9459_s6 = inlined_call_operand.hbm [shape: f32[256,128], index: 6, kind: output, shape index: {}]  }
   0x1   :  { %13 = vsyncpa [#allocation4 + $0x1], 0  ;;  %s5285_s21 = smov 0   ;;  %s5287_s22 = smov 0  }
   0x2   :  { %s5289_s23 = smov 0   ;;  %s5291_s24 = smov 0  }
   0x3 LB: > { %s4749_s25 = sadd.s32 4294967295, %s5243_s24   ;;  %s4750_s26 = sadd.s32 4294967294, %s5243_s24   ;;  %s5243_s24 = sphi %s5291_s24, %s10010_s24   ;;  %s5239_s23 = sphi %s5289_s23, %s10009_s23   ;;  %s5235_s22 = sphi %s5287_s22, %s10008_s22   ;;  %s5231_s21 = sphi %s5285_s21, %s10007_s21  }
   0x4   : > { %s5308_s27 = sadd.s32 1, %s5243_s24   ;;  %s26_s28 = sadd.s32 1, %s5239_s23 }
   0x5   : > { %s23_s29 = ssub.s32 %s5243_s24, %s5308_s27  ;;  %p33_p0 = scmp.ne.s32.totalorder %s5239_s23, %s5235_s22 }
   0x6   : > { %p24_p1 = scmp.eq.s32.totalorder %s23_s29, 0  ;;  %p34_p2 = scmp.eq.s32.totalorder %s5243_s24, 0 }
   0x7   : > { %p168_p3 = scmp.eq.s32.totalorder %s4749_s25, 1  ;;  %p173_p4 = scmp.ne.s32.totalorder %s5235_s22, %s5231_s21 }
   0x8   : > { %s5321_s30 = scalar_select %p24_p1, %s5239_s23, %s26_s28  }
   0x9   : > { %p35_p5 = por %p34_p2, %p33_p0  ;;  %p5323_p6 = por %p168_p3, %p33_p0 }
   0xa   : > { %p174_p7 = scmp.eq.s32.totalorder %s4750_s26, 1  ;;  %p4752_p9 = scmp.ge.s32.totalorder %s5243_s24, 2 }
   0xc   : > { %p5327_p8 = por %p174_p7, %p173_p4  ;;  %205 = sbr.rel (%p4752_p9) target bundleno = 181 (0xb5), region = 36 }
  0x11   : > { %208 = sbr.rel (!%p35_p5) target bundleno = 181 (0xb5), region = 40  ;;  %s210_s9 = sand.u32 (%p35_p5), 1, %s5239_s23  }
  0x12   : > { %s5003_s10 = sshll.u32 (%p35_p5), %s5243_s24, 7  ;;  %s5025_s11 = smul.u32 (%p35_p5), 1280, %s210_s9 }
  0x13   : > { %s5339_s14 = scalar_lea.vmem (%p35_p5), %s9453_s0, %s5003_s10 }
  0x14   : > { %v562_v0 = vld [vmem:[%s5339_s14] sm:$0xff] (%p35_p5)  ;;  %v564_v1 = vld [vmem:[%s5339_s14 + $0x8] sm:$0xff] (%p35_p5)  ;;  %v566_v2 = vld [vmem:[%s5339_s14 + $0x10] sm:$0xff] (%p35_p5)  ;;  %s5344_s15 = scalar_lea.vmem (%p35_p5), [#allocation2], %s5025_s11 }
  0x15   : > { %563 = vst [vmem:[%s5344_s15] sm:$0xff] (%p35_p5), %v562_v0  ;;  %v568_v3 = vld [vmem:[%s5339_s14 + $0x18] sm:$0xff] (%p35_p5)  ;;  %v570_v4 = vld [vmem:[%s5339_s14 + $0x20] sm:$0xff] (%p35_p5)  ;;  %v572_v5 = vld [vmem:[%s5339_s14 + $0x28] sm:$0xff] (%p35_p5) }
  0x16   : > { %565 = vst [vmem:[%s5344_s15 + $0x8] sm:$0xff] %v564_v1  ;;  %v574_v6 = vld [vmem:[%s5339_s14 + $0x30] sm:$0xff]  ;;  %v576_v7 = vld [vmem:[%s5339_s14 + $0x38] sm:$0xff]  ;;  %v578_v8 = vld [vmem:[%s5339_s14 + $0x40] sm:$0xff] }
  0x17   : > { %567 = vst [vmem:[%s5344_s15 + $0x10] sm:$0xff] %v566_v2  ;;  %v580_v9 = vld [vmem:[%s5339_s14 + $0x48] sm:$0xff]  ;;  %v582_v10 = vld [vmem:[%s5339_s14 + $0x50] sm:$0xff]  ;;  %v584_v11 = vld [vmem:[%s5339_s14 + $0x58] sm:$0xff] }
  0x18   : > { %569 = vst [vmem:[%s5344_s15 + $0x18] sm:$0xff] %v568_v3  ;;  %v586_v12 = vld [vmem:[%s5339_s14 + $0x60] sm:$0xff]  ;;  %v588_v13 = vld [vmem:[%s5339_s14 + $0x68] sm:$0xff]  ;;  %v590_v14 = vld [vmem:[%s5339_s14 + $0x70] sm:$0xff] }
  0x19   : > { %571 = vst [vmem:[%s5344_s15 + $0x20] sm:$0xff] %v570_v4  ;;  %v592_v15 = vld [vmem:[%s5339_s14 + $0x78] sm:$0xff]  ;;  %v594_v16 = vld [vmem:[%s5339_s14 + $0x100] sm:$0xff]  ;;  %v596_v17 = vld [vmem:[%s5339_s14 + $0x108] sm:$0xff] }
  0x1a   : > { %573 = vst [vmem:[%s5344_s15 + $0x28] sm:$0xff] %v572_v5  ;;  %v598_v18 = vld [vmem:[%s5339_s14 + $0x110] sm:$0xff]  ;;  %v600_v19 = vld [vmem:[%s5339_s14 + $0x118] sm:$0xff]  ;;  %v602_v20 = vld [vmem:[%s5339_s14 + $0x120] sm:$0xff] }
  0x1b   : > { %575 = vst [vmem:[%s5344_s15 + $0x30] sm:$0xff] %v574_v6  ;;  %v604_v21 = vld [vmem:[%s5339_s14 + $0x128] sm:$0xff]  ;;  %v606_v22 = vld [vmem:[%s5339_s14 + $0x130] sm:$0xff]  ;;  %v608_v23 = vld [vmem:[%s5339_s14 + $0x138] sm:$0xff] }
  0x1c   : > { %577 = vst [vmem:[%s5344_s15 + $0x38] sm:$0xff] %v576_v7  ;;  %v610_v24 = vld [vmem:[%s5339_s14 + $0x140] sm:$0xff]  ;;  %v612_v25 = vld [vmem:[%s5339_s14 + $0x148] sm:$0xff]  ;;  %v614_v26 = vld [vmem:[%s5339_s14 + $0x150] sm:$0xff] }
  0x1d   : > { %579 = vst [vmem:[%s5344_s15 + $0x40] sm:$0xff] %v578_v8  ;;  %v616_v27 = vld [vmem:[%s5339_s14 + $0x158] sm:$0xff]  ;;  %v618_v28 = vld [vmem:[%s5339_s14 + $0x160] sm:$0xff]  ;;  %v620_v29 = vld [vmem:[%s5339_s14 + $0x168] sm:$0xff] }
  0x1e   : > { %581 = vst [vmem:[%s5344_s15 + $0x48] sm:$0xff] %v580_v9  ;;  %v622_v30 = vld [vmem:[%s5339_s14 + $0x170] sm:$0xff]  ;;  %v624_v31 = vld [vmem:[%s5339_s14 + $0x178] sm:$0xff]  ;;  %v626_v32 = vld [vmem:[%s5339_s14 + $0x200] sm:$0xff] }
  0x1f   : > { %583 = vst [vmem:[%s5344_s15 + $0x50] sm:$0xff] %v582_v10  ;;  %v628_v33 = vld [vmem:[%s5339_s14 + $0x208] sm:$0xff]  ;;  %v630_v34 = vld [vmem:[%s5339_s14 + $0x210] sm:$0xff]  ;;  %v632_v35 = vld [vmem:[%s5339_s14 + $0x218] sm:$0xff] }
  0x20   : > { %585 = vst [vmem:[%s5344_s15 + $0x58] sm:$0xff] %v584_v11  ;;  %v634_v36 = vld [vmem:[%s5339_s14 + $0x220] sm:$0xff]  ;;  %v636_v37 = vld [vmem:[%s5339_s14 + $0x228] sm:$0xff]  ;;  %v638_v38 = vld [vmem:[%s5339_s14 + $0x230] sm:$0xff] }
  0x21   : > { %587 = vst [vmem:[%s5344_s15 + $0x60] sm:$0xff] %v586_v12  ;;  %v640_v39 = vld [vmem:[%s5339_s14 + $0x238] sm:$0xff]  ;;  %v642_v40 = vld [vmem:[%s5339_s14 + $0x240] sm:$0xff]  ;;  %v644_v41 = vld [vmem:[%s5339_s14 + $0x248] sm:$0xff] }
  0x22   : > { %589 = vst [vmem:[%s5344_s15 + $0x68] sm:$0xff] %v588_v13  ;;  %v646_v42 = vld [vmem:[%s5339_s14 + $0x250] sm:$0xff]  ;;  %v648_v43 = vld [vmem:[%s5339_s14 + $0x258] sm:$0xff]  ;;  %v650_v44 = vld [vmem:[%s5339_s14 + $0x260] sm:$0xff] }
  0x23   : > { %591 = vst [vmem:[%s5344_s15 + $0x70] sm:$0xff] %v590_v14  ;;  %v652_v45 = vld [vmem:[%s5339_s14 + $0x268] sm:$0xff]  ;;  %v654_v46 = vld [vmem:[%s5339_s14 + $0x270] sm:$0xff]  ;;  %v656_v47 = vld [vmem:[%s5339_s14 + $0x278] sm:$0xff] }
  0x24   : > { %593 = vst [vmem:[%s5344_s15 + $0x78] sm:$0xff] %v592_v15  ;;  %v658_v48 = vld [vmem:[%s5339_s14 + $0x300] sm:$0xff]  ;;  %v660_v49 = vld [vmem:[%s5339_s14 + $0x308] sm:$0xff]  ;;  %v662_v50 = vld [vmem:[%s5339_s14 + $0x310] sm:$0xff] }
  0x25   : > { %595 = vst [vmem:[%s5344_s15 + $0x80] sm:$0xff] %v594_v16  ;;  %v664_v51 = vld [vmem:[%s5339_s14 + $0x318] sm:$0xff]  ;;  %v666_v52 = vld [vmem:[%s5339_s14 + $0x320] sm:$0xff]  ;;  %v668_v53 = vld [vmem:[%s5339_s14 + $0x328] sm:$0xff] }
  0x26   : > { %597 = vst [vmem:[%s5344_s15 + $0x88] sm:$0xff] %v596_v17  ;;  %v670_v54 = vld [vmem:[%s5339_s14 + $0x330] sm:$0xff]  ;;  %v672_v55 = vld [vmem:[%s5339_s14 + $0x338] sm:$0xff]  ;;  %v674_v56 = vld [vmem:[%s5339_s14 + $0x340] sm:$0xff] }
  0x27   : > { %599 = vst [vmem:[%s5344_s15 + $0x90] sm:$0xff] %v598_v18  ;;  %v676_v57 = vld [vmem:[%s5339_s14 + $0x348] sm:$0xff]  ;;  %v678_v58 = vld [vmem:[%s5339_s14 + $0x350] sm:$0xff]  ;;  %v680_v59 = vld [vmem:[%s5339_s14 + $0x358] sm:$0xff] }
  0x28   : > { %601 = vst [vmem:[%s5344_s15 + $0x98] sm:$0xff] %v600_v19  ;;  %v682_v60 = vld [vmem:[%s5339_s14 + $0x360] sm:$0xff]  ;;  %v684_v61 = vld [vmem:[%s5339_s14 + $0x368] sm:$0xff]  ;;  %v686_v62 = vld [vmem:[%s5339_s14 + $0x370] sm:$0xff] }
  0x29   : > { %603 = vst [vmem:[%s5344_s15 + $0xa0] sm:$0xff] %v602_v20  ;;  %v688_v63 = vld [vmem:[%s5339_s14 + $0x378] sm:$0xff]  ;;  %v690_v0 = vld [vmem:[%s5339_s14 + $0x400] sm:$0xff]  ;;  %v692_v1 = vld [vmem:[%s5339_s14 + $0x408] sm:$0xff] }
  0x2a   : > { %605 = vst [vmem:[%s5344_s15 + $0xa8] sm:$0xff] %v604_v21  ;;  %v694_v2 = vld [vmem:[%s5339_s14 + $0x410] sm:$0xff]  ;;  %v696_v3 = vld [vmem:[%s5339_s14 + $0x418] sm:$0xff]  ;;  %v698_v4 = vld [vmem:[%s5339_s14 + $0x420] sm:$0xff] }
  0x2b   : > { %607 = vst [vmem:[%s5344_s15 + $0xb0] sm:$0xff] %v606_v22  ;;  %v700_v5 = vld [vmem:[%s5339_s14 + $0x428] sm:$0xff]  ;;  %v702_v6 = vld [vmem:[%s5339_s14 + $0x430] sm:$0xff]  ;;  %v704_v7 = vld [vmem:[%s5339_s14 + $0x438] sm:$0xff] }
  0x2c   : > { %609 = vst [vmem:[%s5344_s15 + $0xb8] sm:$0xff] %v608_v23  ;;  %v706_v8 = vld [vmem:[%s5339_s14 + $0x440] sm:$0xff]  ;;  %v708_v9 = vld [vmem:[%s5339_s14 + $0x448] sm:$0xff]  ;;  %v710_v10 = vld [vmem:[%s5339_s14 + $0x450] sm:$0xff] }
  0x2d   : > { %611 = vst [vmem:[%s5344_s15 + $0xc0] sm:$0xff] %v610_v24  ;;  %v712_v11 = vld [vmem:[%s5339_s14 + $0x458] sm:$0xff]  ;;  %v714_v12 = vld [vmem:[%s5339_s14 + $0x460] sm:$0xff]  ;;  %v716_v13 = vld [vmem:[%s5339_s14 + $0x468] sm:$0xff] }
  0x2e   : > { %613 = vst [vmem:[%s5344_s15 + $0xc8] sm:$0xff] %v612_v25  ;;  %v718_v14 = vld [vmem:[%s5339_s14 + $0x470] sm:$0xff]  ;;  %v720_v15 = vld [vmem:[%s5339_s14 + $0x478] sm:$0xff]  ;;  %v722_v16 = vld [vmem:[%s5339_s14 + $0x500] sm:$0xff] }
  0x2f   : > { %615 = vst [vmem:[%s5344_s15 + $0xd0] sm:$0xff] %v614_v26  ;;  %v724_v17 = vld [vmem:[%s5339_s14 + $0x508] sm:$0xff]  ;;  %v726_v18 = vld [vmem:[%s5339_s14 + $0x510] sm:$0xff]  ;;  %v728_v19 = vld [vmem:[%s5339_s14 + $0x518] sm:$0xff] }
  0x30   : > { %617 = vst [vmem:[%s5344_s15 + $0xd8] sm:$0xff] %v616_v27  ;;  %v730_v20 = vld [vmem:[%s5339_s14 + $0x520] sm:$0xff]  ;;  %v732_v21 = vld [vmem:[%s5339_s14 + $0x528] sm:$0xff]  ;;  %v734_v22 = vld [vmem:[%s5339_s14 + $0x530] sm:$0xff] }
  0x31   : > { %619 = vst [vmem:[%s5344_s15 + $0xe0] sm:$0xff] %v618_v28  ;;  %v736_v23 = vld [vmem:[%s5339_s14 + $0x538] sm:$0xff]  ;;  %v738_v24 = vld [vmem:[%s5339_s14 + $0x540] sm:$0xff]  ;;  %v740_v25 = vld [vmem:[%s5339_s14 + $0x548] sm:$0xff] }
  0x32   : > { %621 = vst [vmem:[%s5344_s15 + $0xe8] sm:$0xff] %v620_v29  ;;  %v742_v26 = vld [vmem:[%s5339_s14 + $0x550] sm:$0xff]  ;;  %v744_v27 = vld [vmem:[%s5339_s14 + $0x558] sm:$0xff]  ;;  %v746_v28 = vld [vmem:[%s5339_s14 + $0x560] sm:$0xff] }
  0x33   : > { %623 = vst [vmem:[%s5344_s15 + $0xf0] sm:$0xff] %v622_v30  ;;  %v748_v29 = vld [vmem:[%s5339_s14 + $0x568] sm:$0xff]  ;;  %v750_v30 = vld [vmem:[%s5339_s14 + $0x570] sm:$0xff] }
  0x34   : > { %625 = vst [vmem:[%s5344_s15 + $0xf8] sm:$0xff] %v624_v31  ;;  %v752_v31 = vld [vmem:[%s5339_s14 + $0x578] sm:$0xff] }
  0x35   : > { %627 = vst [vmem:[%s5344_s15 + $0x100] sm:$0xff] %v626_v32  ;;  %v754_v32 = vld [vmem:[%s5339_s14 + $0x600] sm:$0xff] }
  0x36   : > { %629 = vst [vmem:[%s5344_s15 + $0x108] sm:$0xff] %v628_v33  ;;  %v756_v33 = vld [vmem:[%s5339_s14 + $0x608] sm:$0xff] }
  0x37   : > { %631 = vst [vmem:[%s5344_s15 + $0x110] sm:$0xff] %v630_v34  ;;  %v758_v34 = vld [vmem:[%s5339_s14 + $0x610] sm:$0xff] }
  0x38   : > { %633 = vst [vmem:[%s5344_s15 + $0x118] sm:$0xff] %v632_v35  ;;  %v760_v35 = vld [vmem:[%s5339_s14 + $0x618] sm:$0xff] }
  0x39   : > { %635 = vst [vmem:[%s5344_s15 + $0x120] sm:$0xff] %v634_v36  ;;  %v762_v36 = vld [vmem:[%s5339_s14 + $0x620] sm:$0xff] }
  0x3a   : > { %637 = vst [vmem:[%s5344_s15 + $0x128] sm:$0xff] %v636_v37  ;;  %v764_v37 = vld [vmem:[%s5339_s14 + $0x628] sm:$0xff] }
  0x3b   : > { %639 = vst [vmem:[%s5344_s15 + $0x130] sm:$0xff] %v638_v38  ;;  %v766_v38 = vld [vmem:[%s5339_s14 + $0x630] sm:$0xff] }
  0x3c   : > { %641 = vst [vmem:[%s5344_s15 + $0x138] sm:$0xff] %v640_v39  ;;  %v768_v39 = vld [vmem:[%s5339_s14 + $0x638] sm:$0xff] }
  0x3d   : > { %643 = vst [vmem:[%s5344_s15 + $0x140] sm:$0xff] %v642_v40  ;;  %v770_v40 = vld [vmem:[%s5339_s14 + $0x640] sm:$0xff] }
  0x3e   : > { %645 = vst [vmem:[%s5344_s15 + $0x148] sm:$0xff] %v644_v41  ;;  %v772_v41 = vld [vmem:[%s5339_s14 + $0x648] sm:$0xff] }
  0x3f   : > { %647 = vst [vmem:[%s5344_s15 + $0x150] sm:$0xff] %v646_v42  ;;  %v774_v42 = vld [vmem:[%s5339_s14 + $0x650] sm:$0xff] }
  0x40   : > { %649 = vst [vmem:[%s5344_s15 + $0x158] sm:$0xff] %v648_v43  ;;  %v776_v43 = vld [vmem:[%s5339_s14 + $0x658] sm:$0xff] }
  0x41   : > { %651 = vst [vmem:[%s5344_s15 + $0x160] sm:$0xff] %v650_v44  ;;  %v778_v44 = vld [vmem:[%s5339_s14 + $0x660] sm:$0xff] }
  0x42   : > { %653 = vst [vmem:[%s5344_s15 + $0x168] sm:$0xff] %v652_v45  ;;  %v780_v45 = vld [vmem:[%s5339_s14 + $0x668] sm:$0xff] }
  0x43   : > { %655 = vst [vmem:[%s5344_s15 + $0x170] sm:$0xff] %v654_v46  ;;  %v782_v46 = vld [vmem:[%s5339_s14 + $0x670] sm:$0xff] }
  0x44   : > { %657 = vst [vmem:[%s5344_s15 + $0x178] sm:$0xff] %v656_v47  ;;  %v784_v47 = vld [vmem:[%s5339_s14 + $0x678] sm:$0xff] }
  0x45   : > { %659 = vst [vmem:[%s5344_s15 + $0x180] sm:$0xff] %v658_v48  ;;  %v786_v48 = vld [vmem:[%s5339_s14 + $0x700] sm:$0xff] }
  0x46   : > { %661 = vst [vmem:[%s5344_s15 + $0x188] sm:$0xff] %v660_v49  ;;  %v788_v49 = vld [vmem:[%s5339_s14 + $0x708] sm:$0xff] }
  0x47   : > { %663 = vst [vmem:[%s5344_s15 + $0x190] sm:$0xff] %v662_v50  ;;  %v790_v50 = vld [vmem:[%s5339_s14 + $0x710] sm:$0xff] }
  0x48   : > { %665 = vst [vmem:[%s5344_s15 + $0x198] sm:$0xff] %v664_v51  ;;  %v792_v51 = vld [vmem:[%s5339_s14 + $0x718] sm:$0xff] }
  0x49   : > { %667 = vst [vmem:[%s5344_s15 + $0x1a0] sm:$0xff] %v666_v52  ;;  %v794_v52 = vld [vmem:[%s5339_s14 + $0x720] sm:$0xff] }
  0x4a   : > { %669 = vst [vmem:[%s5344_s15 + $0x1a8] sm:$0xff] %v668_v53  ;;  %v796_v53 = vld [vmem:[%s5339_s14 + $0x728] sm:$0xff] }
  0x4b   : > { %671 = vst [vmem:[%s5344_s15 + $0x1b0] sm:$0xff] %v670_v54  ;;  %v798_v54 = vld [vmem:[%s5339_s14 + $0x730] sm:$0xff] }
  0x4c   : > { %673 = vst [vmem:[%s5344_s15 + $0x1b8] sm:$0xff] %v672_v55  ;;  %v800_v55 = vld [vmem:[%s5339_s14 + $0x738] sm:$0xff] }
  0x4d   : > { %675 = vst [vmem:[%s5344_s15 + $0x1c0] sm:$0xff] %v674_v56  ;;  %v802_v56 = vld [vmem:[%s5339_s14 + $0x740] sm:$0xff] }
  0x4e   : > { %677 = vst [vmem:[%s5344_s15 + $0x1c8] sm:$0xff] %v676_v57  ;;  %v804_v57 = vld [vmem:[%s5339_s14 + $0x748] sm:$0xff] }
  0x4f   : > { %679 = vst [vmem:[%s5344_s15 + $0x1d0] sm:$0xff] %v678_v58  ;;  %v806_v58 = vld [vmem:[%s5339_s14 + $0x750] sm:$0xff] }
  0x50   : > { %681 = vst [vmem:[%s5344_s15 + $0x1d8] sm:$0xff] %v680_v59  ;;  %v808_v59 = vld [vmem:[%s5339_s14 + $0x758] sm:$0xff] }
  0x51   : > { %683 = vst [vmem:[%s5344_s15 + $0x1e0] sm:$0xff] %v682_v60  ;;  %v810_v60 = vld [vmem:[%s5339_s14 + $0x760] sm:$0xff] }
  0x52   : > { %685 = vst [vmem:[%s5344_s15 + $0x1e8] sm:$0xff] %v684_v61  ;;  %v812_v61 = vld [vmem:[%s5339_s14 + $0x768] sm:$0xff] }
  0x53   : > { %687 = vst [vmem:[%s5344_s15 + $0x1f0] sm:$0xff] %v686_v62  ;;  %v814_v62 = vld [vmem:[%s5339_s14 + $0x770] sm:$0xff] }
  0x54   : > { %689 = vst [vmem:[%s5344_s15 + $0x1f8] sm:$0xff] %v688_v63  ;;  %v816_v63 = vld [vmem:[%s5339_s14 + $0x778] sm:$0xff] }
  0x55   : > { %691 = vst [vmem:[%s5344_s15 + $0x200] sm:$0xff] %v690_v0  ;;  %v818_v0 = vld [vmem:[%s5339_s14 + $0x800] sm:$0xff] }
  0x56   : > { %693 = vst [vmem:[%s5344_s15 + $0x208] sm:$0xff] %v692_v1  ;;  %v820_v1 = vld [vmem:[%s5339_s14 + $0x808] sm:$0xff] }
  0x57   : > { %695 = vst [vmem:[%s5344_s15 + $0x210] sm:$0xff] %v694_v2  ;;  %v822_v2 = vld [vmem:[%s5339_s14 + $0x810] sm:$0xff] }
  0x58   : > { %697 = vst [vmem:[%s5344_s15 + $0x218] sm:$0xff] %v696_v3  ;;  %v824_v3 = vld [vmem:[%s5339_s14 + $0x818] sm:$0xff] }
  0x59   : > { %699 = vst [vmem:[%s5344_s15 + $0x220] sm:$0xff] %v698_v4  ;;  %v826_v4 = vld [vmem:[%s5339_s14 + $0x820] sm:$0xff] }
  0x5a   : > { %701 = vst [vmem:[%s5344_s15 + $0x228] sm:$0xff] %v700_v5  ;;  %v828_v5 = vld [vmem:[%s5339_s14 + $0x828] sm:$0xff] }
  0x5b   : > { %703 = vst [vmem:[%s5344_s15 + $0x230] sm:$0xff] %v702_v6  ;;  %v830_v6 = vld [vmem:[%s5339_s14 + $0x830] sm:$0xff] }
  0x5c   : > { %705 = vst [vmem:[%s5344_s15 + $0x238] sm:$0xff] %v704_v7  ;;  %v832_v7 = vld [vmem:[%s5339_s14 + $0x838] sm:$0xff] }
  0x5d   : > { %707 = vst [vmem:[%s5344_s15 + $0x240] sm:$0xff] %v706_v8  ;;  %v834_v8 = vld [vmem:[%s5339_s14 + $0x840] sm:$0xff] }
  0x5e   : > { %709 = vst [vmem:[%s5344_s15 + $0x248] sm:$0xff] %v708_v9  ;;  %v836_v9 = vld [vmem:[%s5339_s14 + $0x848] sm:$0xff] }
  0x5f   : > { %711 = vst [vmem:[%s5344_s15 + $0x250] sm:$0xff] %v710_v10  ;;  %v838_v10 = vld [vmem:[%s5339_s14 + $0x850] sm:$0xff] }
  0x60   : > { %713 = vst [vmem:[%s5344_s15 + $0x258] sm:$0xff] %v712_v11  ;;  %v840_v11 = vld [vmem:[%s5339_s14 + $0x858] sm:$0xff] }
  0x61   : > { %715 = vst [vmem:[%s5344_s15 + $0x260] sm:$0xff] %v714_v12  ;;  %v842_v12 = vld [vmem:[%s5339_s14 + $0x860] sm:$0xff] }
  0x62   : > { %717 = vst [vmem:[%s5344_s15 + $0x268] sm:$0xff] %v716_v13  ;;  %v844_v13 = vld [vmem:[%s5339_s14 + $0x868] sm:$0xff] }
  0x63   : > { %719 = vst [vmem:[%s5344_s15 + $0x270] sm:$0xff] %v718_v14  ;;  %v846_v14 = vld [vmem:[%s5339_s14 + $0x870] sm:$0xff] }
  0x64   : > { %721 = vst [vmem:[%s5344_s15 + $0x278] sm:$0xff] %v720_v15  ;;  %v848_v15 = vld [vmem:[%s5339_s14 + $0x878] sm:$0xff] }
  0x65   : > { %723 = vst [vmem:[%s5344_s15 + $0x280] sm:$0xff] %v722_v16  ;;  %v850_v16 = vld [vmem:[%s5339_s14 + $0x900] sm:$0xff] }
  0x66   : > { %725 = vst [vmem:[%s5344_s15 + $0x288] sm:$0xff] %v724_v17  ;;  %v852_v17 = vld [vmem:[%s5339_s14 + $0x908] sm:$0xff] }
  0x67   : > { %727 = vst [vmem:[%s5344_s15 + $0x290] sm:$0xff] %v726_v18  ;;  %v854_v18 = vld [vmem:[%s5339_s14 + $0x910] sm:$0xff] }
  0x68   : > { %729 = vst [vmem:[%s5344_s15 + $0x298] sm:$0xff] %v728_v19  ;;  %v856_v19 = vld [vmem:[%s5339_s14 + $0x918] sm:$0xff] }
  0x69   : > { %731 = vst [vmem:[%s5344_s15 + $0x2a0] sm:$0xff] %v730_v20  ;;  %v858_v20 = vld [vmem:[%s5339_s14 + $0x920] sm:$0xff] }
  0x6a   : > { %733 = vst [vmem:[%s5344_s15 + $0x2a8] sm:$0xff] %v732_v21  ;;  %v860_v21 = vld [vmem:[%s5339_s14 + $0x928] sm:$0xff] }
  0x6b   : > { %735 = vst [vmem:[%s5344_s15 + $0x2b0] sm:$0xff] %v734_v22  ;;  %v862_v22 = vld [vmem:[%s5339_s14 + $0x930] sm:$0xff] }
  0x6c   : > { %737 = vst [vmem:[%s5344_s15 + $0x2b8] sm:$0xff] %v736_v23  ;;  %v864_v23 = vld [vmem:[%s5339_s14 + $0x938] sm:$0xff] }
  0x6d   : > { %739 = vst [vmem:[%s5344_s15 + $0x2c0] sm:$0xff] %v738_v24  ;;  %v866_v24 = vld [vmem:[%s5339_s14 + $0x940] sm:$0xff] }
  0x6e   : > { %741 = vst [vmem:[%s5344_s15 + $0x2c8] sm:$0xff] %v740_v25  ;;  %v868_v25 = vld [vmem:[%s5339_s14 + $0x948] sm:$0xff] }
  0x6f   : > { %743 = vst [vmem:[%s5344_s15 + $0x2d0] sm:$0xff] %v742_v26  ;;  %v870_v26 = vld [vmem:[%s5339_s14 + $0x950] sm:$0xff] }
  0x70   : > { %745 = vst [vmem:[%s5344_s15 + $0x2d8] sm:$0xff] %v744_v27  ;;  %v872_v27 = vld [vmem:[%s5339_s14 + $0x958] sm:$0xff] }
  0x71   : > { %747 = vst [vmem:[%s5344_s15 + $0x2e0] sm:$0xff] %v746_v28  ;;  %v874_v28 = vld [vmem:[%s5339_s14 + $0x960] sm:$0xff] }
  0x72   : > { %749 = vst [vmem:[%s5344_s15 + $0x2e8] sm:$0xff] %v748_v29  ;;  %v876_v29 = vld [vmem:[%s5339_s14 + $0x968] sm:$0xff] }
  0x73   : > { %751 = vst [vmem:[%s5344_s15 + $0x2f0] sm:$0xff] %v750_v30  ;;  %v878_v30 = vld [vmem:[%s5339_s14 + $0x970] sm:$0xff] }
  0x74   : > { %753 = vst [vmem:[%s5344_s15 + $0x2f8] sm:$0xff] %v752_v31  ;;  %v880_v31 = vld [vmem:[%s5339_s14 + $0x978] sm:$0xff] }
  0x75   : > { %755 = vst [vmem:[%s5344_s15 + $0x300] sm:$0xff] %v754_v32 }
  0x76   : > { %757 = vst [vmem:[%s5344_s15 + $0x308] sm:$0xff] %v756_v33 }
  0x77   : > { %759 = vst [vmem:[%s5344_s15 + $0x310] sm:$0xff] %v758_v34 }
  0x78   : > { %761 = vst [vmem:[%s5344_s15 + $0x318] sm:$0xff] %v760_v35 }
  0x79   : > { %763 = vst [vmem:[%s5344_s15 + $0x320] sm:$0xff] %v762_v36 }
  0x7a   : > { %765 = vst [vmem:[%s5344_s15 + $0x328] sm:$0xff] %v764_v37 }
  0x7b   : > { %767 = vst [vmem:[%s5344_s15 + $0x330] sm:$0xff] %v766_v38 }
  0x7c   : > { %769 = vst [vmem:[%s5344_s15 + $0x338] sm:$0xff] %v768_v39 }
  0x7d   : > { %771 = vst [vmem:[%s5344_s15 + $0x340] sm:$0xff] %v770_v40 }
  0x7e   : > { %773 = vst [vmem:[%s5344_s15 + $0x348] sm:$0xff] %v772_v41 }
  0x7f   : > { %775 = vst [vmem:[%s5344_s15 + $0x350] sm:$0xff] %v774_v42 }
  0x80   : > { %777 = vst [vmem:[%s5344_s15 + $0x358] sm:$0xff] %v776_v43 }
  0x81   : > { %779 = vst [vmem:[%s5344_s15 + $0x360] sm:$0xff] %v778_v44 }
  0x82   : > { %781 = vst [vmem:[%s5344_s15 + $0x368] sm:$0xff] %v780_v45 }
  0x83   : > { %783 = vst [vmem:[%s5344_s15 + $0x370] sm:$0xff] %v782_v46 }
  0x84   : > { %785 = vst [vmem:[%s5344_s15 + $0x378] sm:$0xff] %v784_v47 }
  0x85   : > { %787 = vst [vmem:[%s5344_s15 + $0x380] sm:$0xff] %v786_v48 }
  0x86   : > { %789 = vst [vmem:[%s5344_s15 + $0x388] sm:$0xff] %v788_v49 }
  0x87   : > { %791 = vst [vmem:[%s5344_s15 + $0x390] sm:$0xff] %v790_v50 }
  0x88   : > { %793 = vst [vmem:[%s5344_s15 + $0x398] sm:$0xff] %v792_v51 }
  0x89   : > { %795 = vst [vmem:[%s5344_s15 + $0x3a0] sm:$0xff] %v794_v52 }
  0x8a   : > { %797 = vst [vmem:[%s5344_s15 + $0x3a8] sm:$0xff] %v796_v53 }
  0x8b   : > { %799 = vst [vmem:[%s5344_s15 + $0x3b0] sm:$0xff] %v798_v54 }
  0x8c   : > { %801 = vst [vmem:[%s5344_s15 + $0x3b8] sm:$0xff] %v800_v55 }
  0x8d   : > { %803 = vst [vmem:[%s5344_s15 + $0x3c0] sm:$0xff] %v802_v56 }
  0x8e   : > { %805 = vst [vmem:[%s5344_s15 + $0x3c8] sm:$0xff] %v804_v57 }
  0x8f   : > { %807 = vst [vmem:[%s5344_s15 + $0x3d0] sm:$0xff] %v806_v58 }
  0x90   : > { %809 = vst [vmem:[%s5344_s15 + $0x3d8] sm:$0xff] %v808_v59 }
  0x91   : > { %811 = vst [vmem:[%s5344_s15 + $0x3e0] sm:$0xff] %v810_v60 }
  0x92   : > { %813 = vst [vmem:[%s5344_s15 + $0x3e8] sm:$0xff] %v812_v61 }
  0x93   : > { %815 = vst [vmem:[%s5344_s15 + $0x3f0] sm:$0xff] %v814_v62 }
  0x94   : > { %817 = vst [vmem:[%s5344_s15 + $0x3f8] sm:$0xff] %v816_v63 }
  0x95   : > { %819 = vst [vmem:[%s5344_s15 + $0x400] sm:$0xff] %v818_v0 }
  0x96   : > { %821 = vst [vmem:[%s5344_s15 + $0x408] sm:$0xff] %v820_v1 }
  0x97   : > { %823 = vst [vmem:[%s5344_s15 + $0x410] sm:$0xff] %v822_v2 }
  0x98   : > { %825 = vst [vmem:[%s5344_s15 + $0x418] sm:$0xff] %v824_v3 }
  0x99   : > { %827 = vst [vmem:[%s5344_s15 + $0x420] sm:$0xff] %v826_v4 }
  0x9a   : > { %829 = vst [vmem:[%s5344_s15 + $0x428] sm:$0xff] %v828_v5 }
  0x9b   : > { %831 = vst [vmem:[%s5344_s15 + $0x430] sm:$0xff] %v830_v6 }
  0x9c   : > { %833 = vst [vmem:[%s5344_s15 + $0x438] sm:$0xff] %v832_v7 }
  0x9d   : > { %835 = vst [vmem:[%s5344_s15 + $0x440] sm:$0xff] %v834_v8 }
  0x9e   : > { %837 = vst [vmem:[%s5344_s15 + $0x448] sm:$0xff] %v836_v9 }
  0x9f   : > { %839 = vst [vmem:[%s5344_s15 + $0x450] sm:$0xff] %v838_v10 }
  0xa0   : > { %841 = vst [vmem:[%s5344_s15 + $0x458] sm:$0xff] %v840_v11 }
  0xa1   : > { %843 = vst [vmem:[%s5344_s15 + $0x460] sm:$0xff] %v842_v12 }
  0xa2   : > { %845 = vst [vmem:[%s5344_s15 + $0x468] sm:$0xff] %v844_v13 }
  0xa3   : > { %847 = vst [vmem:[%s5344_s15 + $0x470] sm:$0xff] %v846_v14 }
  0xa4   : > { %849 = vst [vmem:[%s5344_s15 + $0x478] sm:$0xff] %v848_v15 }
  0xa5   : > { %851 = vst [vmem:[%s5344_s15 + $0x480] sm:$0xff] %v850_v16 }
  0xa6   : > { %853 = vst [vmem:[%s5344_s15 + $0x488] sm:$0xff] %v852_v17 }
  0xa7   : > { %855 = vst [vmem:[%s5344_s15 + $0x490] sm:$0xff] %v854_v18 }
  0xa8   : > { %857 = vst [vmem:[%s5344_s15 + $0x498] sm:$0xff] %v856_v19 }
  0xa9   : > { %859 = vst [vmem:[%s5344_s15 + $0x4a0] sm:$0xff] %v858_v20 }
  0xaa   : > { %861 = vst [vmem:[%s5344_s15 + $0x4a8] sm:$0xff] %v860_v21 }
  0xab   : > { %863 = vst [vmem:[%s5344_s15 + $0x4b0] sm:$0xff] %v862_v22 }
  0xac   : > { %865 = vst [vmem:[%s5344_s15 + $0x4b8] sm:$0xff] %v864_v23 }
  0xad   : > { %867 = vst [vmem:[%s5344_s15 + $0x4c0] sm:$0xff] %v866_v24 }
  0xae   : > { %869 = vst [vmem:[%s5344_s15 + $0x4c8] sm:$0xff] %v868_v25 }
  0xaf   : > { %871 = vst [vmem:[%s5344_s15 + $0x4d0] sm:$0xff] %v870_v26 }
  0xb0   : > { %873 = vst [vmem:[%s5344_s15 + $0x4d8] sm:$0xff] %v872_v27 }
  0xb1   : > { %875 = vst [vmem:[%s5344_s15 + $0x4e0] sm:$0xff] %v874_v28 }
  0xb2   : > { %877 = vst [vmem:[%s5344_s15 + $0x4e8] sm:$0xff] %v876_v29 }
  0xb3   : > { %879 = vst [vmem:[%s5344_s15 + $0x4f0] sm:$0xff] %v878_v30 }
  0xb4   : > { %881 = vst [vmem:[%s5344_s15 + $0x4f8] sm:$0xff] %v880_v31 }
  0xb5 PF: > { %p4755_p10 = scmp.ge.s32.totalorder %s5243_s24, 1  ;;  %p886_p11 = scmp.lt.s32.totalorder %s5243_s24, 3 }
  0xb7   : > { %p887_p12 = pnand %p4755_p10, %p886_p11 }
  0xb9   : > { %890 = sbr.rel (%p887_p12) target bundleno = 1488 (0x5d0), region = 78 }
  0xbe   : > { %s5666_s16 = sand.u32 1, %s5235_s22   ;;  %s5245_s19 = smov 20   ;;  %v2593_v11 = vld [vmem:[%s9454_s1 + $0x90] sm:$0xff]  ;;  %v2594_v12 = vld [vmem:[%s9454_s1 + $0x98] sm:$0xff]  ;;  %v2591_v16 = vld [vmem:[%s9454_s1 + $0x80] sm:$0xff]  ;;  %vm2236_vm0 = vcmask 162816  }
  0xbf   : > { %s5026_s17 = smul.u32 1280, %s5666_s16  ;;  %s5246_s20 = smov 40   ;;  %2944 = vmatpush.msra.mxu0 %v2593_v11  ;;  %3297 = vmatpush.msra.mxu1 %v2594_v12  ;;  %v2592_v17 = vld [vmem:[%s9454_s1 + $0x88] sm:$0xff]  ;;  %v2589_v18 = vld [vmem:[%s9454_s1 + $0x70] sm:$0xff]  ;;  %v2590_v19 = vld [vmem:[%s9454_s1 + $0x78] sm:$0xff]  ;;  %vm2349_vm1 = vcmask 326656  }
  0xc0   : > { %s5247_s26 = smov 60   ;;  %5015 = vmatpush.msra.mxu2 %v2594_v12  ;;  %5005 = vmatpush.msra.mxu3 %v2593_v11  ;;  %v2587_v22 = vld [vmem:[%s9454_s1 + $0x60] sm:$0xff]  ;;  %v2588_v23 = vld [vmem:[%s9454_s1 + $0x68] sm:$0xff]  ;;  %v2585_v24 = vld [vmem:[%s9454_s1 + $0x50] sm:$0xff]  ;;  %vm2462_vm2 = vcmask 490496   ;;  %vm2601_vm3 = vcmask 654336  }
  0xc1   : > { %s5669_s18 = scalar_lea.vmem [#allocation2], %s5026_s17  ;;  %2945 = vmatpush.msra.mxu0 %v2591_v16  ;;  %3298 = vmatpush.msra.mxu1 %v2592_v17  ;;  %v2586_v25 = vld [vmem:[%s9454_s1 + $0x58] sm:$0xff]  ;;  %v2583_v29 = vld [vmem:[%s9454_s1 + $0x40] sm:$0xff]  ;;  %v2584_v30 = vld [vmem:[%s9454_s1 + $0x48] sm:$0xff]  ;;  %vm4516_vm4 = vcmask 1045504   ;;  %vm4140_vm5 = vcmask 572416  }
  0xc2   : > { %v5672_v32 = vld [vmem:[%s5669_s18 + $0xa0] sm:$0xff]  ;;  %v5675_v33 = vld [vmem:[%s5669_s18 + $0x90] sm:$0xff]  ;;  %v5687_v35 = vld [vmem:[%s5669_s18 + $0xa8] sm:$0xff]  ;;  %5016 = vmatpush.msra.mxu2 %v2592_v17  ;;  %5006 = vmatpush.msra.mxu3 %v2591_v16  ;;  %s4756_s29 = sshll.u32 %s5666_s16, 7  ;;  %s5201_s17 = scalar_lea.hbm %s9459_s6, 256 }
  0xc3   : > { %v5678_v34 = vld [vmem:[%s5669_s18 + $0x80] sm:$0xff]  ;;  %1204 = vrot.lane.b32.xlu2 %v5672_v32, %s5245_s19  ;;  %1200 = vrot.lane.b32.xlu1 %v5675_v33, %s5245_s19  ;;  %v5690_v36 = vld [vmem:[%s5669_s18 + $0x98] sm:$0xff] }
  0xc4   : > { %1196 = vrot.lane.b32.xlu0 %v5678_v34, %s5245_s19  ;;  %v5693_v37 = vld [vmem:[%s5669_s18 + $0x88] sm:$0xff]  ;;  %v5702_v38 = vld [vmem:[%s5669_s18 + $0xc0] sm:$0xff]  ;;  %v5705_v39 = vld [vmem:[%s5669_s18 + $0xb8] sm:$0xff]  ;;  %2946 = vmatpush.msra.mxu0 %v2589_v18 }
  0xc5   : > { %v5708_v40 = vld [vmem:[%s5669_s18 + $0xb0] sm:$0xff]  ;;  %v951_v41 = vld [vmem:[%s5669_s18 + $0xd8] sm:$0xff]  ;;  %v949_v43 = vld [vmem:[%s5669_s18 + $0xc8] sm:$0xff]  ;;  %3299 = vmatpush.msra.mxu1 %v2590_v19  ;;  %5017 = vmatpush.msra.mxu2 %v2590_v19 }
  0xc6   : > { %v950_v42 = vld [vmem:[%s5669_s18 + $0xd0] sm:$0xff]  ;;  %v953_v45 = vld [vmem:[%s5669_s18 + $0xe8] sm:$0xff]  ;;  %v952_v46 = vld [vmem:[%s5669_s18 + $0xe0] sm:$0xff]  ;;  %5007 = vmatpush.msra.mxu3 %v2589_v18  ;;  %2947 = vmatpush.msra.mxu0 %v2587_v22 }
  0xc7   : > { %v954_v44 = vld [vmem:[%s5669_s18 + $0xf0] sm:$0xff]  ;;  %v957_v47 = vld [vmem:[%s5669_s18 + $0x108] sm:$0xff]  ;;  %v956_v48 = vld [vmem:[%s5669_s18 + $0x100] sm:$0xff]  ;;  %3300 = vmatpush.msra.mxu1 %v2588_v23  ;;  %5018 = vmatpush.msra.mxu2 %v2588_v23 }
  0xc8   : > { %v955_v49 = vld [vmem:[%s5669_s18 + $0xf8] sm:$0xff]  ;;  %v958_v51 = vld [vmem:[%s5669_s18 + $0x110] sm:$0xff]  ;;  %v960_v52 = vld [vmem:[%s5669_s18 + $0x120] sm:$0xff]  ;;  %2948 = vmatpush.msra.mxu0 %v2585_v24  ;;  %5008 = vmatpush.msra.mxu3 %v2587_v22 }
  0xc9   : > { %v959_v50 = vld [vmem:[%s5669_s18 + $0x118] sm:$0xff]  ;;  %v5741_v53 = vld [vmem:[%s5669_s18 + $0x180] sm:$0xff]  ;;  %v961_v54 = vld [vmem:[%s5669_s18 + $0x128] sm:$0xff]  ;;  %3301 = vmatpush.msra.mxu1 %v2586_v25  ;;  %5019 = vmatpush.msra.mxu2 %v2586_v25 }
  0xca   : > { %v5749_v55 = vld [vmem:[%s5669_s18 + $0x188] sm:$0xff]  ;;  %v5756_v56 = vld [vmem:[%s5669_s18 + $0x198] sm:$0xff]  ;;  %v5759_v57 = vld [vmem:[%s5669_s18 + $0x190] sm:$0xff]  ;;  %2949 = vmatpush.msra.mxu0 %v2583_v29  ;;  %5009 = vmatpush.msra.mxu3 %v2585_v24 }
  0xcb   : > { %1206 = vrot.lane.b32.xlu2 %v5687_v35, %s5245_s19  ;;  %1202 = vrot.lane.b32.xlu1 %v5690_v36, %s5245_s19  ;;  %v5767_v58 = vld [vmem:[%s5669_s18 + $0x1a0] sm:$0xff]  ;;  %v962_v59 = vld [vmem:[%s5669_s18 + $0x130] sm:$0xff] }
  0xcc   : > { %1198 = vrot.lane.b32.xlu0 %v5693_v37, %s5245_s19  ;;  %v5775_v60 = vld [vmem:[%s5669_s18 + $0x1a8] sm:$0xff]  ;;  %v963_v61 = vld [vmem:[%s5669_s18 + $0x138] sm:$0xff]  ;;  %v964_v63 = vld [vmem:[%s5669_s18 + $0x140] sm:$0xff]  ;;  %3302 = vmatpush.msra.mxu1 %v2584_v30 }
  0xcd   : > { %v5786_v0 = vld [vmem:[%s5669_s18 + $0x1b0] sm:$0xff]  ;;  %v965_v2 = vld [vmem:[%s5669_s18 + $0x148] sm:$0xff]  ;;  %v5796_v3 = vld [vmem:[%s5669_s18 + $0x1b8] sm:$0xff]  ;;  %5020 = vmatpush.msra.mxu2 %v2584_v30  ;;  %5010 = vmatpush.msra.mxu3 %v2583_v29 }
  0xce   : > { %v5805_v5 = vld [vmem:[%s5669_s18 + $0x1c0] sm:$0xff]  ;;  %v966_v9 = vld [vmem:[%s5669_s18 + $0x150] sm:$0xff]  ;;  %v5819_v10 = vld [vmem:[%s5669_s18 + $0x1c8] sm:$0xff] }
  0xcf   : > { %v967_v20 = vld [vmem:[%s5669_s18 + $0x158] sm:$0xff]  ;;  %v5851_v21 = vld [vmem:[%s5669_s18 + $0x1d0] sm:$0xff]  ;;  %v5958_v25 = vld [vmem:[%s5669_s18 + $0x200] sm:$0xff] }
  0xd0   : > { %v2581_v31 = vld [vmem:[%s9454_s1 + $0x30] sm:$0xff]  ;;  %v5946_v19 = vld [vmem:[%s5669_s18 + $0x1f8] sm:$0xff]  ;;  %v924_v29 = vld [vmem:[%s5669_s18] sm:$0xff] }
  0xd1   : > { %2950 = vmatpush.msra.mxu0 %v2581_v31  ;;  %5011 = vmatpush.msra.mxu3 %v2581_v31  ;;  %v5934_v11 = vld [vmem:[%s5669_s18 + $0x1f0] sm:$0xff] }
  0xd2   : > { %v970_v12 = vld [vmem:[%s5669_s18 + $0x170] sm:$0xff] }
  0xd3   : > { %1212 = vrot.lane.b32.xlu2 %v5702_v38, %s5245_s19  ;;  %1210 = vrot.lane.b32.xlu1 %v5705_v39, %s5245_s19 }
  0xd4   : > { %1208 = vrot.lane.b32.xlu0 %v5708_v40, %s5245_s19 }
  0xdb   : > { %1218 = vrot.lane.b32.xlu2 %v951_v41, %s5245_s19  ;;  %1216 = vrot.lane.b32.xlu1 %v950_v42, %s5245_s19  ;;  %v5885_v41 = vld [vmem:[%s5669_s18 + $0x1e0] sm:$0xff] }
  0xdc   : > { %1214 = vrot.lane.b32.xlu0 %v949_v43, %s5245_s19  ;;  %v968_v42 = vld [vmem:[%s5669_s18 + $0x160] sm:$0xff]  ;;  %v5889_v43 = vld [vmem:[%s5669_s18 + $0x1d8] sm:$0xff] }
  0xe3   : > { %1224 = vrot.lane.b32.xlu2 %v954_v44, %s5245_s19  ;;  %1222 = vrot.lane.b32.xlu1 %v953_v45, %s5245_s19  ;;  %v2582_v44 = vld [vmem:[%s9454_s1 + $0x38] sm:$0xff]  ;;  %v2579_v45 = vld [vmem:[%s9454_s1 + $0x20] sm:$0xff] }
  0xe4   : > { %1220 = vrot.lane.b32.xlu0 %v952_v46, %s5245_s19  ;;  %v2580_v46 = vld [vmem:[%s9454_s1 + $0x28] sm:$0xff]  ;;  %3303 = vmatpush.msra.mxu1 %v2582_v44 }
  0xe5   : > { %2951 = vmatpush.msra.mxu0 %v2579_v45  ;;  %5021 = vmatpush.msra.mxu2 %v2582_v44 }
  0xe6   : > { %3304 = vmatpush.msra.mxu1 %v2580_v46  ;;  %5012 = vmatpush.msra.mxu3 %v2579_v45 }
  0xe7   : > { %5022 = vmatpush.msra.mxu2 %v2580_v46 }
  0xeb   : > { %1230 = vrot.lane.b32.xlu2 %v957_v47, %s5245_s19  ;;  %1228 = vrot.lane.b32.xlu1 %v956_v48, %s5245_s19 }
  0xec   : > { %1226 = vrot.lane.b32.xlu0 %v955_v49, %s5245_s19 }
  0xf3   : > { %1548 = vrot.lane.b32.xlu2 %v956_v48, %s5246_s20  ;;  %1234 = vrot.lane.b32.xlu1 %v959_v50, %s5245_s19 }
  0xf4   : > { %1232 = vrot.lane.b32.xlu0 %v958_v51, %s5245_s19 }
  0xfb   : > { %1550 = vrot.lane.b32.xlu2 %v957_v47, %s5246_s20  ;;  %1236 = vrot.lane.b32.xlu1 %v960_v52, %s5245_s19  ;;  %v2577_v47 = vld [vmem:[%s9454_s1 + $0x10] sm:$0xff] }
  0xfc   : > { %1900 = vrot.lane.b32.xlu0 %v5741_v53, %s5247_s26  ;;  %2952 = vmatpush.msra.mxu0 %v2577_v47 }
  0xfd   : > { %5013 = vmatpush.msra.mxu3 %v2577_v47  ;;  %v5975_v47 = vld [vmem:[%s5669_s18 + $0x208] sm:$0xff] }
 0x103   : > { %1552 = vrot.lane.b32.xlu2 %v958_v51, %s5246_s20  ;;  %1238 = vrot.lane.b32.xlu1 %v961_v54, %s5245_s19 }
 0x104   : > { %1902 = vrot.lane.b32.xlu0 %v5749_v55, %s5247_s26 }
 0x10b   : > { %1906 = vrot.lane.b32.xlu2 %v5756_v56, %s5247_s26  ;;  %1554 = vrot.lane.b32.xlu1 %v959_v50, %s5246_s20  ;;  %v2578_v50 = vld [vmem:[%s9454_s1 + $0x18] sm:$0xff] }
 0x10c   : > { %1904 = vrot.lane.b32.xlu0 %v5759_v57, %s5247_s26  ;;  %3305 = vmatpush.msra.mxu1 %v2578_v50 }
 0x10d   : > { %5023 = vmatpush.msra.mxu2 %v2578_v50  ;;  %v925_v50 = vld [vmem:[%s5669_s18 + $0x8] sm:$0xff] }
 0x113   : > { %1908 = vrot.lane.b32.xlu2 %v5767_v58, %s5247_s26  ;;  %1556 = vrot.lane.b32.xlu1 %v960_v52, %s5246_s20  ;;  %v2575_v52 = vld [vmem:[%s9454_s1] sm:$0xff] }
 0x114   : > { %1240 = vrot.lane.b32.xlu0 %v962_v59, %s5245_s19  ;;  %2953 = vmatpush.msra.mxu0 %v2575_v52 }
 0x115   : > { %5014 = vmatpush.msra.mxu3 %v2575_v52 }
 0x11b   : > { %1910 = vrot.lane.b32.xlu2 %v5775_v60, %s5247_s26  ;;  %1558 = vrot.lane.b32.xlu1 %v961_v54, %s5246_s20  ;;  %v2576_v54 = vld [vmem:[%s9454_s1 + $0x8] sm:$0xff] }
 0x11c   : > { %1242 = vrot.lane.b32.xlu0 %v963_v61, %s5245_s19  ;;  %3306 = vmatpush.msra.mxu1 %v2576_v54 }
 0x11d   : > { %v5782_v62 = vpop.permute.xlu2 %1204  ;;  %5024 = vmatpush.msra.mxu2 %v2576_v54 }
 0x123   : > { %1244 = vrot.lane.b32.xlu2 %v964_v63, %s5245_s19  ;;  %1912 = vrot.lane.b32.xlu1 %v5786_v0, %s5247_s26 }
 0x124   : > { %1560 = vrot.lane.b32.xlu0 %v962_v59, %s5246_s20  ;;  %v5922_v59 = vld [vmem:[%s5669_s18 + $0x1e8] sm:$0xff] }
 0x125   : > { %v5792_v1 = vpop.permute.xlu2 %1206 }
 0x12b   : > { %1246 = vrot.lane.b32.xlu2 %v965_v2, %s5245_s19  ;;  %1914 = vrot.lane.b32.xlu1 %v5796_v3, %s5247_s26 }
 0x12c   : > { %1562 = vrot.lane.b32.xlu0 %v963_v61, %s5246_s20  ;;  %v969_v61 = vld [vmem:[%s5669_s18 + $0x168] sm:$0xff] }
 0x12d   : > { %v5802_v4 = vpop.permute.xlu2 %1212 }
 0x133   : > { %1566 = vrot.lane.b32.xlu2 %v965_v2, %s5246_s20  ;;  %1916 = vrot.lane.b32.xlu1 %v5805_v5, %s5247_s26 }
 0x134   : > { %1564 = vrot.lane.b32.xlu0 %v964_v63, %s5246_s20 }
 0x135   : > { %v5811_v6 = vpop.permute.xlu2 %1218  ;;  %v5813_v7 = vpop.permute.xlu1 %1200 }
 0x136   : > { %v5815_v8 = vpop.permute.xlu0 %1196 }
 0x137   : > { %v2237_v30 = vsel %vm2236_vm0, %v924_v29, %v5815_v8  ;;  %v926_v29 = vld [vmem:[%s5669_s18 + $0x10] sm:$0xff] }
 0x13b   : > { %1568 = vrot.lane.b32.xlu2 %v966_v9, %s5246_s20  ;;  %1248 = vrot.lane.b32.xlu1 %v966_v9, %s5245_s19 }
 0x13c   : > { %1918 = vrot.lane.b32.xlu0 %v5819_v10, %s5247_s26 }
 0x13d   : > { %v5831_v13 = vpop.permute.xlu2 %1224  ;;  %v5833_v14 = vpop.permute.xlu1 %1202 }
 0x13e   : > { %v5835_v15 = vpop.permute.xlu0 %1198 }
 0x13f   : > { %v2238_v8 = vsel %vm2236_vm0, %v925_v50, %v5835_v15  ;;  %v2239_v15 = vsel %vm2236_vm0, %v926_v29, %v5813_v7  ;;  %v927_v50 = vld [vmem:[%s5669_s18 + $0x18] sm:$0xff]  ;;  %v6035_v29 = vld [vmem:[%s5669_s18 + $0x220] sm:$0xff] }
 0x140   : > { %v2240_v7 = vsel %vm2236_vm0, %v927_v50, %v5833_v14  ;;  %v928_v14 = vld [vmem:[%s5669_s18 + $0x20] sm:$0xff]  ;;  %v6055_v50 = vld [vmem:[%s5669_s18 + $0x230] sm:$0xff] }
 0x143   : > { %1570 = vrot.lane.b32.xlu2 %v967_v20, %s5246_s20  ;;  %1250 = vrot.lane.b32.xlu1 %v967_v20, %s5245_s19  ;;  %v971_v20 = vld [vmem:[%s5669_s18 + $0x178] sm:$0xff] }
 0x144   : > { %1920 = vrot.lane.b32.xlu0 %v5851_v21, %s5247_s26 }
 0x145   : > { %v5869_v26 = vpop.permute.xlu2 %1230  ;;  %v5871_v27 = vpop.permute.xlu1 %1210 }
 0x146   : > { %v5873_v28 = vpop.permute.xlu0 %1208 }
 0x14b   : > { %1924 = vrot.lane.b32.xlu2 %v5885_v41, %s5247_s26  ;;  %1572 = vrot.lane.b32.xlu1 %v968_v42, %s5246_s20 }
 0x14c   : > { %1922 = vrot.lane.b32.xlu0 %v5889_v43, %s5247_s26 }
 0x14d   : > { %v1549_v48 = vpop.permute.xlu2 %1548  ;;  %v5908_v49 = vpop.permute.xlu1 %1216 }
 0x14e   : > { %v5913_v51 = vpop.permute.xlu0 %1214  ;;  %v2350_v44 = vsel %vm2349_vm1, %v2237_v30, %v1549_v48 }
 0x153   : > { %1926 = vrot.lane.b32.xlu2 %v5922_v59, %s5247_s26  ;;  %1574 = vrot.lane.b32.xlu1 %v969_v61, %s5246_s20 }
 0x154   : > { %1252 = vrot.lane.b32.xlu0 %v968_v42, %s5245_s19 }
 0x155   : > { %v1551_v63 = vpop.permute.xlu2 %1550  ;;  %v5929_v2 = vpop.permute.xlu1 %1222 }
 0x156   : > { %v5931_v9 = vpop.permute.xlu0 %1220  ;;  %v2351_v54 = vsel %vm2349_vm1, %v2238_v8, %v1551_v63 }
 0x15b   : > { %1928 = vrot.lane.b32.xlu2 %v5934_v11, %s5247_s26  ;;  %1576 = vrot.lane.b32.xlu1 %v970_v12, %s5246_s20 }
 0x15c   : > { %1254 = vrot.lane.b32.xlu0 %v969_v61, %s5245_s19 }
 0x15d   : > { %v1553_v16 = vpop.permute.xlu2 %1552  ;;  %v5941_v17 = vpop.permute.xlu1 %1228 }
 0x15e   : > { %v5943_v18 = vpop.permute.xlu0 %1226 }
 0x163   : > { %1256 = vrot.lane.b32.xlu2 %v970_v12, %s5245_s19  ;;  %1930 = vrot.lane.b32.xlu1 %v5946_v19, %s5247_s26 }
 0x164   : > { %1578 = vrot.lane.b32.xlu0 %v971_v20, %s5246_s20 }
 0x165   : > { %v1907_v22 = vpop.permute.xlu2 %1906  ;;  %v5953_v23 = vpop.permute.xlu1 %1234 }
 0x166   : > { %v5955_v24 = vpop.permute.xlu0 %1232 }
 0x16b   : > { %1258 = vrot.lane.b32.xlu2 %v971_v20, %s5245_s19  ;;  %1932 = vrot.lane.b32.xlu1 %v5958_v25, %s5247_s26  ;;  %v5993_v20 = vld [vmem:[%s5669_s18 + $0x210] sm:$0xff] }
 0x16c   : > { %1580 = vrot.lane.b32.xlu0 %v5741_v53, %s5246_s20 }
 0x16d   : > { %v1909_v31 = vpop.permute.xlu2 %1908  ;;  %v5968_v42 = vpop.permute.xlu1 %1236 }
 0x16e   : > { %v1901_v45 = vpop.permute.xlu0 %1900 }
 0x16f   : > { %v2463_v46 = vsel %vm2462_vm2, %v2350_v44, %v1901_v45  ;;  %v2352_v44 = vsel %vm2349_vm1, %v2239_v15, %v1553_v16  ;;  %v2241_v15 = vsel %vm2236_vm0, %v928_v14, %v5782_v62  ;;  %v929_v62 = vld [vmem:[%s5669_s18 + $0x28] sm:$0xff] }
 0x170   : > { %4757 = vmatmul.msk.f32.vlgmr.msra.gmra.mxu0 %vm2601_vm3, %v2463_v46  ;;  %4869 = vmatmul.msk.f32.vlgmr.msra.gmra.mxu1 %vm2601_vm3, %v2463_v46 }
 0x173   : > { %1584 = vrot.lane.b32.xlu2 %v5759_v57, %s5246_s20  ;;  %1934 = vrot.lane.b32.xlu1 %v5975_v47, %s5247_s26 }
 0x174   : > { %1582 = vrot.lane.b32.xlu0 %v5749_v55, %s5246_s20 }
 0x175   : > { %v1911_v48 = vpop.permute.xlu2 %1910  ;;  %v5986_v52 = vpop.permute.xlu1 %1238 }
 0x176   : > { %v1903_v61 = vpop.permute.xlu0 %1902 }
 0x177   : > { %v2464_v12 = vsel %vm2462_vm2, %v2351_v54, %v1903_v61 }
 0x178   : > { %4758 = vmatmul.msk.f32.gmra.mxu0 %vm2601_vm3, %v2464_v12  ;;  %4870 = vmatmul.msk.f32.gmra.mxu1 %vm2601_vm3, %v2464_v12 }
 0x17b   : > { %1586 = vrot.lane.b32.xlu2 %v5756_v56, %s5246_s20  ;;  %1260 = vrot.lane.b32.xlu1 %v5741_v53, %s5245_s19  ;;  %v6012_v53 = vld [vmem:[%s5669_s18 + $0x218] sm:$0xff] }
 0x17c   : > { %1936 = vrot.lane.b32.xlu0 %v5993_v20, %s5247_s26 }
 0x17d   : > { %v6004_v63 = vpop.permute.xlu2 %1244  ;;  %v1555_v30 = vpop.permute.xlu1 %1554 }
 0x17e   : > { %v1905_v45 = vpop.permute.xlu0 %1904  ;;  %v2353_v16 = vsel %vm2349_vm1, %v2240_v7, %v1555_v30  ;;  %v2242_v7 = vsel %vm2236_vm0, %v929_v62, %v5792_v1  ;;  %v6073_v1 = vld [vmem:[%s5669_s18 + $0x238] sm:$0xff] }
 0x17f   : > { %v2465_v46 = vsel %vm2462_vm2, %v2352_v44, %v1905_v45  ;;  %v2466_v12 = vsel %vm2462_vm2, %v2353_v16, %v1907_v22 }
 0x180   : > { %4759 = vmatmul.msk.f32.gmra.mxu0 %vm2601_vm3, %v2465_v46  ;;  %4871 = vmatmul.msk.f32.gmra.mxu1 %vm2601_vm3, %v2465_v46 }
 0x183   : > { %1588 = vrot.lane.b32.xlu2 %v5767_v58, %s5246_s20  ;;  %1262 = vrot.lane.b32.xlu1 %v5749_v55, %s5245_s19  ;;  %v6032_v55 = vld [vmem:[%s5669_s18 + $0x228] sm:$0xff] }
 0x184   : > { %1938 = vrot.lane.b32.xlu0 %v6012_v53, %s5247_s26 }
 0x185   : > { %v6023_v8 = vpop.permute.xlu2 %1246  ;;  %v1557_v54 = vpop.permute.xlu1 %1556 }
 0x186   : > { %v6025_v61 = vpop.permute.xlu0 %1240  ;;  %v2354_v22 = vsel %vm2349_vm1, %v2241_v15, %v1557_v54  ;;  %v930_v15 = vld [vmem:[%s5669_s18 + $0x30] sm:$0xff] }
 0x187   : > { %v2467_v46 = vsel %vm2462_vm2, %v2354_v22, %v1909_v31  ;;  %v2243_v22 = vsel %vm2236_vm0, %v930_v15, %v5873_v28  ;;  %v6091_v28 = vld [vmem:[%s5669_s18 + $0x240] sm:$0xff] }
 0x188   : > { %4760 = vmatmul.msk.f32.gmra.mxu0 %vm2601_vm3, %v2466_v12  ;;  %4872 = vmatmul.msk.f32.gmra.mxu1 %vm2601_vm3, %v2466_v12 }
 0x18b   : > { %1942 = vrot.lane.b32.xlu2 %v6032_v55, %s5247_s26  ;;  %1590 = vrot.lane.b32.xlu1 %v5775_v60, %s5246_s20 }
 0x18c   : > { %1940 = vrot.lane.b32.xlu0 %v6035_v29, %s5247_s26 }
 0x18d   : > { %v6046_v30 = vpop.permute.xlu2 %1566  ;;  %v1559_v44 = vpop.permute.xlu1 %1558 }
 0x18e   : > { %v6048_v45 = vpop.permute.xlu0 %1242  ;;  %v2355_v16 = vsel %vm2349_vm1, %v2242_v7, %v1559_v44  ;;  %v931_v7 = vld [vmem:[%s5669_s18 + $0x38] sm:$0xff] }
 0x18f   : > { %v2468_v14 = vsel %vm2462_vm2, %v2355_v16, %v1911_v48  ;;  %v2244_v16 = vsel %vm2236_vm0, %v931_v7, %v5871_v27 }
 0x190   : > { %4761 = vmatmul.msk.f32.gmra.mxu0 %vm2601_vm3, %v2467_v46  ;;  %4873 = vmatmul.msk.f32.gmra.mxu1 %vm2601_vm3, %v2467_v46 }
 0x193   : > { %1944 = vrot.lane.b32.xlu2 %v6055_v50, %s5247_s26  ;;  %1592 = vrot.lane.b32.xlu1 %v5786_v0, %s5246_s20 }
 0x194   : > { %1264 = vrot.lane.b32.xlu0 %v5759_v57, %s5245_s19 }
 0x195   : > { %v6066_v31 = vpop.permute.xlu2 %1568  ;;  %v1913_v54 = vpop.permute.xlu1 %1912 }
 0x196   : > { %v1561_v12 = vpop.permute.xlu0 %1560 }
 0x197   : > { %v2356_v57 = vsel %vm2349_vm1, %v2243_v22, %v1561_v12  ;;  %v932_v22 = vld [vmem:[%s5669_s18 + $0x40] sm:$0xff] }
 0x198   : > { %4762 = vmatmul.msk.f32.gmra.mxu0 %vm2601_vm3, %v2468_v14  ;;  %4874 = vmatmul.msk.f32.gmra.mxu1 %vm2601_vm3, %v2468_v14  ;;  %v2469_v62 = vsel %vm2462_vm2, %v2356_v57, %v1913_v54  ;;  %v2245_v27 = vsel %vm2236_vm0, %v932_v22, %v5802_v4  ;;  %v933_v4 = vld [vmem:[%s5669_s18 + $0x48] sm:$0xff] }
 0x19b   : > { %1946 = vrot.lane.b32.xlu2 %v6073_v1, %s5247_s26  ;;  %1594 = vrot.lane.b32.xlu1 %v5796_v3, %s5246_s20 }
 0x19c   : > { %1266 = vrot.lane.b32.xlu0 %v5756_v56, %s5245_s19 }
 0x19d   : > { %v6084_v48 = vpop.permute.xlu2 %1570  ;;  %v1915_v44 = vpop.permute.xlu1 %1914 }
 0x19e   : > { %v1563_v46 = vpop.permute.xlu0 %1562 }
 0x19f   : > { %v2357_v56 = vsel %vm2349_vm1, %v2244_v16, %v1563_v46  ;;  %v2246_v16 = vsel %vm2236_vm0, %v933_v4, %v5913_v51 }
 0x1a0   : > { %4763 = vmatmul.msk.f32.gmra.mxu0 %vm2601_vm3, %v2469_v62  ;;  %4875 = vmatmul.msk.f32.gmra.mxu1 %vm2601_vm3, %v2469_v62  ;;  %v2470_v15 = vsel %vm2462_vm2, %v2357_v56, %v1915_v44 }
 0x1a3   : > { %1268 = vrot.lane.b32.xlu2 %v5767_v58, %s5245_s19  ;;  %1948 = vrot.lane.b32.xlu1 %v6091_v28, %s5247_s26  ;;  %v6109_v58 = vld [vmem:[%s5669_s18 + $0x248] sm:$0xff] }
 0x1a4   : > { %1596 = vrot.lane.b32.xlu0 %v5805_v5, %s5246_s20 }
 0x1a5   : > { %v6102_v54 = vpop.permute.xlu2 %1924  ;;  %v1917_v12 = vpop.permute.xlu1 %1916 }
 0x1a6   : > { %v1565_v14 = vpop.permute.xlu0 %1564 }
 0x1a7   : > { %v2358_v57 = vsel %vm2349_vm1, %v2245_v27, %v1565_v14  ;;  %v2359_v14 = vsel %vm2349_vm1, %v2246_v16, %v6046_v30 }
 0x1a8   : > { %4764 = vmatmul.msk.f32.gmra.mxu0 %vm2601_vm3, %v2470_v15  ;;  %4876 = vmatmul.msk.f32.gmra.mxu1 %vm2601_vm3, %v2470_v15  ;;  %v2471_v7 = vsel %vm2462_vm2, %v2358_v57, %v1917_v12 }
 0x1ab   : > { %1270 = vrot.lane.b32.xlu2 %v5775_v60, %s5245_s19  ;;  %1950 = vrot.lane.b32.xlu1 %v6109_v58, %s5247_s26  ;;  %v6128_v60 = vld [vmem:[%s5669_s18 + $0x250] sm:$0xff] }
 0x1ac   : > { %1598 = vrot.lane.b32.xlu0 %v5819_v10, %s5246_s20 }
 0x1ad   : > { %v6120_v44 = vpop.permute.xlu2 %1926  ;;  %v6122_v46 = vpop.permute.xlu1 %1248 }
 0x1ae   : > { %v1919_v62 = vpop.permute.xlu0 %1918 }
 0x1af   : > { %v2472_v22 = vsel %vm2462_vm2, %v2359_v14, %v1919_v62 }
 0x1b0   : > { %4765 = vmatmul.msk.f32.gmra.mxu0 %vm2601_vm3, %v2471_v7  ;;  %4877 = vmatmul.msk.f32.gmra.mxu1 %vm2601_vm3, %v2471_v7 }
 0x1b3   : > { %1602 = vrot.lane.b32.xlu2 %v5889_v43, %s5246_s20  ;;  %1952 = vrot.lane.b32.xlu1 %v6128_v60, %s5247_s26  ;;  %v934_v43 = vld [vmem:[%s5669_s18 + $0x50] sm:$0xff] }
 0x1b4   : > { %1600 = vrot.lane.b32.xlu0 %v5851_v21, %s5246_s20  ;;  %v6149_v21 = vld [vmem:[%s5669_s18 + $0x258] sm:$0xff]  ;;  %v2247_v51 = vsel %vm2236_vm0, %v934_v43, %v5908_v49 }
 0x1b5   : > { %v6139_v56 = vpop.permute.xlu2 %1928  ;;  %v6141_v12 = vpop.permute.xlu1 %1250  ;;  %v2360_v57 = vsel %vm2349_vm1, %v2247_v51, %v6066_v31 }
 0x1b6   : > { %v1921_v15 = vpop.permute.xlu0 %1920 }
 0x1b7   : > { %v2473_v7 = vsel %vm2462_vm2, %v2360_v57, %v1921_v15  ;;  %v936_v15 = vld [vmem:[%s5669_s18 + $0x60] sm:$0xff] }
 0x1b8   : > { %4766 = vmatmul.msk.f32.gmra.mxu0 %vm2601_vm3, %v2472_v22  ;;  %4878 = vmatmul.msk.f32.gmra.mxu1 %vm2601_vm3, %v2472_v22  ;;  %v2249_v22 = vsel %vm2236_vm0, %v936_v15, %v5931_v9 }
 0x1bb   : > { %1604 = vrot.lane.b32.xlu2 %v5885_v41, %s5246_s20  ;;  %1272 = vrot.lane.b32.xlu1 %v5786_v0, %s5245_s19  ;;  %v6168_v0 = vld [vmem:[%s5669_s18 + $0x260] sm:$0xff]  ;;  %v935_v41 = vld [vmem:[%s5669_s18 + $0x58] sm:$0xff] }
 0x1bc   : > { %1954 = vrot.lane.b32.xlu0 %v6149_v21, %s5247_s26  ;;  %v2248_v49 = vsel %vm2236_vm0, %v935_v41, %v5811_v6  ;;  %v6193_v6 = vld [vmem:[%s5669_s18 + $0x268] sm:$0xff] }
 0x1bd   : > { %v6160_v30 = vpop.permute.xlu2 %1256  ;;  %v1573_v27 = vpop.permute.xlu1 %1572  ;;  %v2361_v16 = vsel %vm2349_vm1, %v2248_v49, %v6084_v48 }
 0x1be   : > { %v1923_v62 = vpop.permute.xlu0 %1922  ;;  %v2362_v48 = vsel %vm2349_vm1, %v2249_v22, %v1573_v27 }
 0x1bf   : > { %v2475_v9 = vsel %vm2462_vm2, %v2362_v48, %v6102_v54 }
 0x1c0   : > { %4767 = vmatmul.msk.f32.gmra.mxu0 %vm2601_vm3, %v2473_v7  ;;  %4879 = vmatmul.msk.f32.gmra.mxu1 %vm2601_vm3, %v2473_v7 }
 0x1c3   : > { %1606 = vrot.lane.b32.xlu2 %v5922_v59, %s5246_s20  ;;  %1274 = vrot.lane.b32.xlu1 %v5796_v3, %s5245_s19  ;;  %v2474_v59 = vsel %vm2462_vm2, %v2361_v16, %v1923_v62  ;;  %v6190_v3 = vld [vmem:[%s5669_s18 + $0x270] sm:$0xff]  ;;  %v937_v62 = vld [vmem:[%s5669_s18 + $0x68] sm:$0xff] }
 0x1c4   : > { %1956 = vrot.lane.b32.xlu0 %v6168_v0, %s5247_s26  ;;  %v2250_v27 = vsel %vm2236_vm0, %v937_v62, %v5929_v2  ;;  %v938_v2 = vld [vmem:[%s5669_s18 + $0x70] sm:$0xff] }
 0x1c5   : > { %v6179_v31 = vpop.permute.xlu2 %1258  ;;  %v1575_v4 = vpop.permute.xlu1 %1574 }
 0x1c6   : > { %v6183_v14 = vpop.permute.xlu0 %1252  ;;  %v2363_v54 = vsel %vm2349_vm1, %v2250_v27, %v1575_v4  ;;  %v6236_v4 = vld [vmem:[%s5669_s18 + $0x280] sm:$0xff] }
 0x1c7   : > { %v2476_v16 = vsel %vm2462_vm2, %v2363_v54, %v6120_v44 }
 0x1c8   : > { %4768 = vmatmul.msk.f32.gmra.mxu0 %vm2601_vm3, %v2474_v59  ;;  %4880 = vmatmul.msk.f32.gmra.mxu1 %vm2601_vm3, %v2474_v59 }
 0x1cb   : > { %1960 = vrot.lane.b32.xlu2 %v6190_v3, %s5247_s26  ;;  %1608 = vrot.lane.b32.xlu1 %v5934_v11, %s5246_s20  ;;  %v6214_v11 = vld [vmem:[%s5669_s18 + $0x278] sm:$0xff] }
 0x1cc   : > { %1958 = vrot.lane.b32.xlu0 %v6193_v6, %s5247_s26 }
 0x1cd   : > { %v6204_v43 = vpop.permute.xlu2 %1584  ;;  %v1577_v51 = vpop.permute.xlu1 %1576 }
 0x1ce   : > { %v6206_v57 = vpop.permute.xlu0 %1254 }
 0x1d0   : > { %4769 = vmatmul.msk.f32.gmra.mxu0 %vm2601_vm3, %v2475_v9  ;;  %4881 = vmatmul.msk.f32.gmra.mxu1 %vm2601_vm3, %v2475_v9  ;;  %v939_v9 = vld [vmem:[%s5669_s18 + $0x78] sm:$0xff] }
 0x1d1   : > { %v2252_v62 = vsel %vm2236_vm0, %v939_v9, %v5943_v18  ;;  %v6275_v18 = vld [vmem:[%s5669_s18 + $0x388] sm:$0xff] }
 0x1d3   : > { %1962 = vrot.lane.b32.xlu2 %v6214_v11, %s5247_s26  ;;  %1610 = vrot.lane.b32.xlu1 %v5946_v19, %s5246_s20  ;;  %v6233_v19 = vld [vmem:[%s5669_s18 + $0x300] sm:$0xff] }
 0x1d4   : > { %1276 = vrot.lane.b32.xlu0 %v5805_v5, %s5245_s19  ;;  %v2251_v5 = vsel %vm2236_vm0, %v938_v2, %v5831_v13  ;;  %v6255_v13 = vld [vmem:[%s5669_s18 + $0x288] sm:$0xff] }
 0x1d5   : > { %v6225_v7 = vpop.permute.xlu2 %1586  ;;  %v1931_v41 = vpop.permute.xlu1 %1930  ;;  %v2364_v44 = vsel %vm2349_vm1, %v2251_v5, %v1577_v51  ;;  %v6258_v51 = vld [vmem:[%s5669_s18 + $0x380] sm:$0xff]  ;;  %v6278_v5 = vld [vmem:[%s5669_s18 + $0x308] sm:$0xff] }
 0x1d6   : > { %v1579_v49 = vpop.permute.xlu0 %1578  ;;  %v2477_v48 = vsel %vm2462_vm2, %v2364_v44, %v6139_v56 }
 0x1d7   : > { %v2365_v56 = vsel %vm2349_vm1, %v2252_v62, %v1579_v49  ;;  %v2253_v49 = vsel %vm2236_vm0, %v5678_v34, %v5941_v17  ;;  %v6298_v34 = vld [vmem:[%s5669_s18 + $0x310] sm:$0xff] }
 0x1d8   : > { %4770 = vmatmul.msk.f32.gmra.mxu0 %vm2601_vm3, %v2476_v16  ;;  %4882 = vmatmul.msk.f32.gmra.mxu1 %vm2601_vm3, %v2476_v16  ;;  %v2478_v2 = vsel %vm2462_vm2, %v2365_v56, %v1931_v41  ;;  %9524 = vst [vmem:[#allocation6_spill] sm:$0xff] %v6298_v34  ;;  %v6301_v17 = vld [vmem:[%s5669_s18 + $0x290] sm:$0xff] }
 0x1d9   : > { %9525 = vst [vmem:[#allocation7_spill] sm:$0xff] %v6301_v17 }
 0x1db   : > { %1612 = vrot.lane.b32.xlu2 %v5958_v25, %s5246_s20  ;;  %1676 = vrot.lane.b32.xlu1 %v6233_v19, %s5246_s20 }
 0x1dc   : > { %1324 = vrot.lane.b32.xlu0 %v6236_v4, %s5245_s19 }
 0x1dd   : > { %v6247_v59 = vpop.permute.xlu2 %1588  ;;  %v1933_v15 = vpop.permute.xlu1 %1932 }
 0x1de   : > { %v1581_v22 = vpop.permute.xlu0 %1580 }
 0x1df   : > { %v2366_v41 = vsel %vm2349_vm1, %v2253_v49, %v1581_v22  ;;  %v2254_v22 = vsel %vm2236_vm0, %v5693_v37, %v5869_v26  ;;  %v6321_v37 = vld [vmem:[%s5669_s18 + $0x390] sm:$0xff]  ;;  %v2255_v26 = vsel %vm2236_vm0, %v5675_v33, %v5955_v24  ;;  %v2256_v33 = vsel %vm2236_vm0, %v5690_v36, %v5953_v23 }
 0x1e0   : > { %4771 = vmatmul.msk.f32.gmra.mxu0 %vm2601_vm3, %v2477_v48  ;;  %4883 = vmatmul.msk.f32.gmra.mxu1 %vm2601_vm3, %v2477_v48  ;;  %v2479_v62 = vsel %vm2462_vm2, %v2366_v41, %v1933_v15  ;;  %v2369_v24 = vsel %vm2349_vm1, %v2256_v33, %v6225_v7  ;;  %v2257_v36 = vsel %vm2236_vm0, %v5672_v32, %v5968_v42 }
 0x1e1   : > { %v2370_v23 = vsel %vm2349_vm1, %v2257_v36, %v6247_v59  ;;  %v2258_v32 = vsel %vm2236_vm0, %v5687_v35, %v5986_v52  ;;  %v6414_v52 = vld [vmem:[%s5669_s18 + $0x328] sm:$0xff] }
 0x1e2   : > { %9529 = vst [vmem:[#allocation11_spill] sm:$0xff] %v6414_v52 }
 0x1e3   : > { %1326 = vrot.lane.b32.xlu2 %v6255_v13, %s5245_s19  ;;  %1964 = vrot.lane.b32.xlu1 %v6236_v4, %s5247_s26 }
 0x1e4   : > { %2028 = vrot.lane.b32.xlu0 %v6258_v51, %s5247_s26 }
 0x1e5   : > { %v6269_v27 = vpop.permute.xlu2 %1942  ;;  %v1935_v54 = vpop.permute.xlu1 %1934 }
 0x1e6   : > { %v1583_v16 = vpop.permute.xlu0 %1582 }
 0x1e7   : > { %v2367_v15 = vsel %vm2349_vm1, %v2254_v22, %v1583_v16 }
 0x1e8   : > { %4772 = vmatmul.msk.f32.gmra.mxu0 %vm2601_vm3, %v2478_v2  ;;  %4884 = vmatmul.msk.f32.gmra.mxu1 %vm2601_vm3, %v2478_v2  ;;  %v2480_v41 = vsel %vm2462_vm2, %v2367_v15, %v1935_v54  ;;  %v2368_v54 = vsel %vm2349_vm1, %v2255_v26, %v6204_v43 }
 0x1eb   : > { %1614 = vrot.lane.b32.xlu2 %v5975_v47, %s5246_s20  ;;  %2030 = vrot.lane.b32.xlu1 %v6275_v18, %s5247_s26 }
 0x1ec   : > { %1678 = vrot.lane.b32.xlu0 %v6278_v5, %s5246_s20 }
 0x1ed   : > { %v6290_v44 = vpop.permute.xlu2 %1944  ;;  %v6292_v48 = vpop.permute.xlu1 %1260 }
 0x1ee   : > { %v1937_v9 = vpop.permute.xlu0 %1936  ;;  %v6403_v59 = vpop.f32.mrf.mxu0 }
 0x1ef   : > { %v2481_v15 = vsel %vm2462_vm2, %v2368_v54, %v1937_v9  ;;  %9527 = vst [vmem:[#allocation9_spill] sm:$0xff] %v6403_v59 }
 0x1f0   : > { %4773 = vmatmul.msk.f32.gmra.mxu0 %vm2601_vm3, %v2479_v62  ;;  %4885 = vmatmul.msk.f32.gmra.mxu1 %vm2601_vm3, %v2479_v62 }
 0x1f3   : > { %1680 = vrot.lane.b32.xlu2 %v6298_v34, %s5246_s20  ;;  %1328 = vrot.lane.b32.xlu1 %v6301_v17, %s5245_s19  ;;  %v6346_v34 = vld [vmem:[%s5669_s18 + $0x298] sm:$0xff] }
 0x1f4   : > { %1966 = vrot.lane.b32.xlu0 %v6255_v13, %s5247_s26  ;;  %9526 = vst [vmem:[#allocation8_spill] sm:$0xff] %v6346_v34 }
 0x1f5   : > { %v6313_v56 = vpop.permute.xlu2 %1946  ;;  %v6315_v2 = vpop.permute.xlu1 %1262 }
 0x1f6   : > { %v1939_v49 = vpop.permute.xlu0 %1938  ;;  %v6431_v59 = vpop.f32.mrf.mxu0 }
 0x1f7   : > { %v2482_v54 = vsel %vm2462_vm2, %v2369_v24, %v1939_v49  ;;  %9531 = vst [vmem:[#allocation13_spill] sm:$0xff] %v6431_v59 }
 0x1f8   : > { %4774 = vmatmul.msk.f32.gmra.mxu0 %vm2601_vm3, %v2480_v41  ;;  %4886 = vmatmul.msk.f32.gmra.mxu1 %vm2601_vm3, %v2480_v41  ;;  %v6340_v41 = vld [vmem:[%s5669_s18 + $0x398] sm:$0xff] }
 0x1fb   : > { %1968 = vrot.lane.b32.xlu2 %v6301_v17, %s5247_s26  ;;  %1616 = vrot.lane.b32.xlu1 %v5993_v20, %s5246_s20  ;;  %v6343_v17 = vld [vmem:[%s5669_s18 + $0x318] sm:$0xff] }
 0x1fc   : > { %2032 = vrot.lane.b32.xlu0 %v6321_v37, %s5247_s26 }
 0x1fd   : > { %v6334_v16 = vpop.permute.xlu2 %1268  ;;  %v1591_v62 = vpop.permute.xlu1 %1590 }
 0x1fe   : > { %v1941_v22 = vpop.permute.xlu0 %1940  ;;  %v2371_v42 = vsel %vm2349_vm1, %v2258_v32, %v1591_v62  ;;  %v6417_v62 = vld [vmem:[%s5669_s18 + $0x2a8] sm:$0xff]  ;;  %v2259_v32 = vsel %vm2236_vm0, %v5708_v40, %v6025_v61 }
 0x1ff   : > { %v2483_v24 = vsel %vm2462_vm2, %v2370_v23, %v1941_v22  ;;  %v6407_v23 = vpop.f32.mrf.mxu1  ;;  %v2484_v35 = vsel %vm2462_vm2, %v2371_v42, %v6269_v27  ;;  %9530 = vst [vmem:[#allocation12_spill] sm:$0xff] %v6417_v62 }
 0x200   : > { %4775 = vmatmul.msk.f32.gmra.mxu0 %vm2601_vm3, %v2481_v15  ;;  %4887 = vmatmul.msk.f32.gmra.mxu1 %vm2601_vm3, %v2481_v15  ;;  %v6367_v15 = vld [vmem:[%s5669_s18 + $0x2a0] sm:$0xff]  ;;  %9528 = vst [vmem:[#allocation10_spill] sm:$0xff] %v6407_v23 }
 0x203   : > { %2034 = vrot.lane.b32.xlu2 %v6340_v41, %s5247_s26  ;;  %1682 = vrot.lane.b32.xlu1 %v6343_v17, %s5246_s20 }
 0x204   : > { %1330 = vrot.lane.b32.xlu0 %v6346_v34, %s5245_s19 }
 0x205   : > { %v6359_v43 = vpop.permute.xlu2 %1270  ;;  %v1593_v9 = vpop.permute.xlu1 %1592 }
 0x206   : > { %v6361_v26 = vpop.permute.xlu0 %1264  ;;  %v2372_v27 = vsel %vm2349_vm1, %v2259_v32, %v1593_v9  ;;  %v6440_v9 = vld [vmem:[%s5669_s18 + $0x3a8] sm:$0xff]  ;;  %v2260_v32 = vsel %vm2236_vm0, %v5705_v39, %v6048_v45  ;;  %v6459_v39 = vld [vmem:[%s5669_s18 + $0x3b0] sm:$0xff] }
 0x207   : > { %v2485_v40 = vsel %vm2462_vm2, %v2372_v27, %v6290_v44  ;;  %v6437_v61 = vpop.f32.mrf.mxu1  ;;  %9533 = vst [vmem:[#allocation15_spill] sm:$0xff] %v6459_v39  ;;  %v6462_v45 = vld [vmem:[%s5669_s18 + $0x330] sm:$0xff] }
 0x208   : > { %4776 = vmatmul.msk.f32.gmra.mxu0 %vm2601_vm3, %v2482_v54  ;;  %4888 = vmatmul.msk.f32.gmra.mxu1 %vm2601_vm3, %v2482_v54  ;;  %v6388_v54 = vld [vmem:[%s5669_s18 + $0x3a0] sm:$0xff]  ;;  %9532 = vst [vmem:[#allocation14_spill] sm:$0xff] %v6437_v61 }
 0x209   : > { %9534 = vst [vmem:[#allocation16_spill] sm:$0xff] %v6462_v45 }
 0x20b   : > { %1332 = vrot.lane.b32.xlu2 %v6367_v15, %s5245_s19  ;;  %1970 = vrot.lane.b32.xlu1 %v6346_v34, %s5247_s26  ;;  %v6391_v34 = vld [vmem:[%s5669_s18 + $0x320] sm:$0xff] }
 0x20c   : > { %1618 = vrot.lane.b32.xlu0 %v6012_v53, %s5246_s20 }
 0x20d   : > { %v6380_v7 = vpop.permute.xlu2 %1602  ;;  %v1595_v49 = vpop.permute.xlu1 %1594 }
 0x20e   : > { %v6382_v33 = vpop.permute.xlu0 %1266  ;;  %v2373_v44 = vsel %vm2349_vm1, %v2260_v32, %v1595_v49  ;;  %v6464_v49 = vpop.f32.mrf.mxu0  ;;  %v6467_v32 = vld [vmem:[%s5669_s18 + $0x2b0] sm:$0xff] }
 0x20f   : > { %v2486_v61 = vsel %vm2462_vm2, %v2373_v44, %v6313_v56  ;;  %9535 = vst [vmem:[#allocation17_spill] sm:$0xff] %v6464_v49 }
 0x210   : > { %4777 = vmatmul.msk.f32.gmra.mxu0 %vm2601_vm3, %v2483_v24  ;;  %4889 = vmatmul.msk.f32.gmra.mxu1 %vm2601_vm3, %v2483_v24  ;;  %9536 = vst [vmem:[#allocation18_spill] sm:$0xff] %v6467_v32 }
 0x213   : > { %1620 = vrot.lane.b32.xlu2 %v6035_v29, %s5246_s20  ;;  %2036 = vrot.lane.b32.xlu1 %v6388_v54, %s5247_s26 }
 0x214   : > { %1684 = vrot.lane.b32.xlu0 %v6391_v34, %s5246_s20 }
 0x215   : > { %v6405_v22 = vpop.permute.xlu2 %1604  ;;  %v1949_v36 = vpop.permute.xlu1 %1948 }
 0x216   : > { %v1597_v24 = vpop.permute.xlu0 %1596 }
 0x218   : > { %4778 = vmatmul.msk.f32.gmra.mxu0 %vm2601_vm3, %v2484_v35  ;;  %4890 = vmatmul.msk.f32.gmra.mxu1 %vm2601_vm3, %v2484_v35 }
 0x21b   : > { %1686 = vrot.lane.b32.xlu2 %v6414_v52, %s5246_s20  ;;  %1334 = vrot.lane.b32.xlu1 %v6417_v62, %s5245_s19  ;;  %v6472_v52 = vpop.f32.mrf.mxu1 }
 0x21c   : > { %1972 = vrot.lane.b32.xlu0 %v6367_v15, %s5247_s26  ;;  %9537 = vst [vmem:[#allocation19_spill] sm:$0xff] %v6472_v52  ;;  %v5072_v52 = vld [vmem:[%s5669_s18 + $0xc8] sm:$0xff] }
 0x21d   : > { %v6429_v42 = vpop.permute.xlu2 %1606  ;;  %v1951_v35 = vpop.permute.xlu1 %1950 }
 0x21e   : > { %v1599_v23 = vpop.permute.xlu0 %1598 }
 0x220   : > { %4779 = vmatmul.msk.f32.gmra.mxu0 %vm2601_vm3, %v2485_v40  ;;  %4891 = vmatmul.msk.f32.gmra.mxu1 %vm2601_vm3, %v2485_v40 }
 0x223   : > { %1974 = vrot.lane.b32.xlu2 %v6417_v62, %s5247_s26  ;;  %1622 = vrot.lane.b32.xlu1 %v6032_v55, %s5246_s20  ;;  %v2261_v62 = vsel %vm2236_vm0, %v5702_v38, %v6004_v63  ;;  %v6489_v63 = vld [vmem:[%s5669_s18 + $0x2b8] sm:$0xff] }
 0x224   : > { %2038 = vrot.lane.b32.xlu0 %v6440_v9, %s5247_s26  ;;  %v2374_v56 = vsel %vm2349_vm1, %v2261_v62, %v1597_v24  ;;  %9538 = vst [vmem:[#allocation20_spill] sm:$0xff] %v6489_v63  ;;  %v2262_v24 = vsel %vm2236_vm0, %v5072_v52, %v6023_v8  ;;  %v6494_v62 = vpop.f32.mrf.mxu0 }
 0x225   : > { %v6452_v27 = vpop.permute.xlu2 %1960  ;;  %v1953_v40 = vpop.permute.xlu1 %1952  ;;  %v2487_v38 = vsel %vm2462_vm2, %v2374_v56, %v1949_v36  ;;  %9539 = vst [vmem:[#allocation21_spill] sm:$0xff] %v6494_v62  ;;  %v2375_v36 = vsel %vm2349_vm1, %v2262_v24, %v1599_v23  ;;  %v6513_v62 = vld [vmem:[%s5669_s18 + $0x3b8] sm:$0xff]  ;;  %v5073_v24 = vld [vmem:[%s5669_s18 + $0xd0] sm:$0xff] }
 0x226   : > { %v1601_v59 = vpop.permute.xlu0 %1600  ;;  %v6503_v56 = vpop.f32.mrf.mxu1  ;;  %v2488_v52 = vsel %vm2462_vm2, %v2375_v36, %v1951_v35  ;;  %9541 = vst [vmem:[#allocation23_spill] sm:$0xff] %v6513_v62  ;;  %v6516_v23 = vld [vmem:[%s5669_s18 + $0x338] sm:$0xff] }
 0x227   : > { %9540 = vst [vmem:[#allocation22_spill] sm:$0xff] %v6503_v56  ;;  %v2263_v56 = vsel %vm2236_vm0, %v5073_v24, %v6122_v46 }
 0x228   : > { %4780 = vmatmul.msk.f32.gmra.mxu0 %vm2601_vm3, %v2486_v61  ;;  %4892 = vmatmul.msk.f32.gmra.mxu1 %vm2601_vm3, %v2486_v61  ;;  %9542 = vst [vmem:[#allocation24_spill] sm:$0xff] %v6516_v23  ;;  %v2376_v35 = vsel %vm2349_vm1, %v2263_v56, %v1601_v59  ;;  %v6541_v59 = vld [vmem:[%s5669_s18 + $0x340] sm:$0xff] }
 0x229   : > { %v2489_v24 = vsel %vm2462_vm2, %v2376_v35, %v1953_v40  ;;  %9546 = vst [vmem:[#allocation28_spill] sm:$0xff] %v6541_v59  ;;  %v5074_v40 = vld [vmem:[%s5669_s18 + $0xd8] sm:$0xff] }
 0x22a   : > { %v2264_v56 = vsel %vm2236_vm0, %v5074_v40, %v6141_v12  ;;  %v6568_v12 = vld [vmem:[%s5669_s18 + $0x3c0] sm:$0xff] }
 0x22b   : > { %2040 = vrot.lane.b32.xlu2 %v6459_v39, %s5247_s26  ;;  %1688 = vrot.lane.b32.xlu1 %v6462_v45, %s5246_s20  ;;  %v2377_v35 = vsel %vm2349_vm1, %v2264_v56, %v6380_v7  ;;  %9549 = vst [vmem:[#allocation31_spill] sm:$0xff] %v6568_v12  ;;  %v5075_v7 = vld [vmem:[%s5669_s18 + $0xe0] sm:$0xff] }
 0x22c   : > { %1336 = vrot.lane.b32.xlu0 %v6467_v32, %s5245_s19  ;;  %v6528_v36 = vpop.f32.mrf.mxu0 }
 0x22d   : > { %v6481_v61 = vpop.permute.xlu2 %1962  ;;  %v6483_v44 = vpop.permute.xlu1 %1272  ;;  %9543 = vst [vmem:[#allocation25_spill] sm:$0xff] %v6528_v36 }
 0x22e   : > { %v1955_v49 = vpop.permute.xlu0 %1954  ;;  %v6532_v39 = vpop.f32.mrf.mxu1 }
 0x22f   : > { %9544 = vst [vmem:[#allocation26_spill] sm:$0xff] %v6532_v39 }
 0x230   : > { %4781 = vmatmul.msk.f32.gmra.mxu0 %vm2601_vm3, %v2487_v38  ;;  %4893 = vmatmul.msk.f32.gmra.mxu1 %vm2601_vm3, %v2487_v38 }
 0x233   : > { %1338 = vrot.lane.b32.xlu2 %v6489_v63, %s5245_s19  ;;  %1976 = vrot.lane.b32.xlu1 %v6467_v32, %s5247_s26 }
 0x234   : > { %1624 = vrot.lane.b32.xlu0 %v6055_v50, %s5246_s20  ;;  %v6558_v39 = vpop.f32.mrf.mxu0 }
 0x235   : > { %v6505_v38 = vpop.permute.xlu2 %1612  ;;  %v6507_v45 = vpop.permute.xlu1 %1274  ;;  %9547 = vst [vmem:[#allocation29_spill] sm:$0xff] %v6558_v39 }
 0x236   : > { %v1957_v8 = vpop.permute.xlu0 %1956 }
 0x238   : > { %4782 = vmatmul.msk.f32.gmra.mxu0 %vm2601_vm3, %v2488_v52  ;;  %4894 = vmatmul.msk.f32.gmra.mxu1 %vm2601_vm3, %v2488_v52 }
 0x23b   : > { %1626 = vrot.lane.b32.xlu2 %v6073_v1, %s5246_s20  ;;  %2042 = vrot.lane.b32.xlu1 %v6513_v62, %s5247_s26  ;;  %v6538_v62 = vld [vmem:[%s5669_s18 + $0x2c0] sm:$0xff] }
 0x23c   : > { %1690 = vrot.lane.b32.xlu0 %v6516_v23, %s5246_s20  ;;  %9545 = vst [vmem:[#allocation27_spill] sm:$0xff] %v6538_v62  ;;  %v2490_v23 = vsel %vm2462_vm2, %v2377_v35, %v1955_v49  ;;  %v2265_v49 = vsel %vm2236_vm0, %v5075_v7, %v6183_v14 }
 0x23d   : > { %v6530_v52 = vpop.permute.xlu2 %1326  ;;  %v1609_v32 = vpop.permute.xlu1 %1608 }
 0x23e   : > { %v1959_v46 = vpop.permute.xlu0 %1958 }
 0x240   : > { %4783 = vmatmul.msk.f32.gmra.mxu0 %vm2601_vm3, %v2489_v24  ;;  %4895 = vmatmul.msk.f32.gmra.mxu1 %vm2601_vm3, %v2489_v24 }
 0x243   : > { %1340 = vrot.lane.b32.xlu1 %v6538_v62, %s5245_s19  ;;  %1692 = vrot.lane.b32.xlu2 %v6541_v59, %s5246_s20 }
 0x244   : > { %1978 = vrot.lane.b32.xlu0 %v6489_v63, %s5247_s26  ;;  %v6565_v63 = vpop.f32.mrf.mxu1 }
 0x245   : > { %v6554_v24 = vpop.permute.xlu2 %1614  ;;  %v6556_v36 = vpop.permute.xlu1 %1610  ;;  %9548 = vst [vmem:[#allocation30_spill] sm:$0xff] %v6565_v63  ;;  %v6587_v63 = vld [vmem:[%s5669_s18 + $0x348] sm:$0xff] }
 0x246   : > { %v6561_v59 = vpop.permute.xlu0 %1276 }
 0x248   : > { %4784 = vmatmul.msk.f32.gmra.mxu0 %vm2601_vm3, %v2490_v23  ;;  %4896 = vmatmul.msk.f32.gmra.mxu1 %vm2601_vm3, %v2490_v23  ;;  %v2378_v23 = vsel %vm2349_vm1, %v2265_v49, %v6405_v22 }
 0x249   : > { %v2491_v35 = vsel %vm2462_vm2, %v2378_v23, %v1957_v8  ;;  %v5076_v8 = vld [vmem:[%s5669_s18 + $0xe8] sm:$0xff] }
 0x24a   : > { %v2266_v7 = vsel %vm2236_vm0, %v5076_v8, %v6206_v57  ;;  %v6621_v57 = vld [vmem:[%s5669_s18 + $0x3c8] sm:$0xff] }
 0x24b   : > { %1628 = vrot.lane.b32.xlu1 %v6091_v28, %s5246_s20  ;;  %1980 = vrot.lane.b32.xlu2 %v6538_v62, %s5247_s26  ;;  %v6589_v62 = vpop.f32.mrf.mxu0  ;;  %v2379_v49 = vsel %vm2349_vm1, %v2266_v7, %v6429_v42  ;;  %v5077_v42 = vld [vmem:[%s5669_s18 + $0xf0] sm:$0xff] }
 0x24c   : > { %2044 = vrot.lane.b32.xlu0 %v6568_v12, %s5247_s26  ;;  %9550 = vst [vmem:[#allocation32_spill] sm:$0xff] %v6589_v62  ;;  %v6592_v12 = vld [vmem:[%s5669_s18 + $0x2c8] sm:$0xff]  ;;  %v6594_v14 = vpop.f32.mrf.mxu1  ;;  %v6648_v7 = vld [vmem:[%s5669_s18 + $0x350] sm:$0xff] }
 0x24d   : > { %v6581_v40 = vpop.permute.xlu2 %1680  ;;  %v1677_v56 = vpop.permute.xlu1 %1676  ;;  %9551 = vst [vmem:[#allocation33_spill] sm:$0xff] %v6594_v14  ;;  %v2492_v14 = vsel %vm2462_vm2, %v2379_v49, %v1959_v46 }
 0x24e   : > { %v1325_v39 = vpop.permute.xlu0 %1324 }
 0x24f   : > { %v2301_v22 = vsel %vm2236_vm0, %v5958_v25, %v1325_v39  ;;  %v2267_v39 = vsel %vm2236_vm0, %v5077_v42, %v6160_v30 }
 0x250   : > { %4785 = vmatmul.msk.f32.gmra.mxu0 %vm2601_vm3, %v2491_v35  ;;  %4897 = vmatmul.msk.f32.gmra.mxu1 %vm2601_vm3, %v2491_v35  ;;  %v2414_v62 = vsel %vm2349_vm1, %v2301_v22, %v1677_v56  ;;  %v2302_v22 = vsel %vm2236_vm0, %v5975_v47, %v6530_v52  ;;  %v5078_v47 = vld [vmem:[%s5669_s18 + $0xf8] sm:$0xff]  ;;  %v5079_v52 = vld [vmem:[%s5669_s18 + $0x1d0] sm:$0xff] }
 0x253   : > { %1694 = vrot.lane.b32.xlu1 %v6587_v63, %s5246_s20  ;;  %1278 = vrot.lane.b32.xlu2 %v5819_v10, %s5245_s19  ;;  %v6626_v46 = vpop.f32.mrf.mxu0 }
 0x254   : > { %1342 = vrot.lane.b32.xlu0 %v6592_v12, %s5245_s19  ;;  %v6635_v56 = vpop.f32.mrf.mxu1 }
 0x255   : > { %v6609_v23 = vpop.permute.xlu2 %1968  ;;  %v1965_v35 = vpop.permute.xlu1 %1964 }
 0x256   : > { %v2029_v10 = vpop.permute.xlu0 %2028 }
 0x257   : > { %v6616_v25 = vsel %vm2462_vm2, %v2414_v62, %v2029_v10  ;;  %v2380_v62 = vsel %vm2349_vm1, %v2267_v39, %v1609_v32  ;;  %v6652_v10 = vld [vmem:[%s5669_s18 + $0x2d0] sm:$0xff] }
 0x258   : > { %4786 = vmatmul.msk.f32.gmra.mxu0 %vm2601_vm3, %v2492_v14  ;;  %4898 = vmatmul.msk.f32.gmra.mxu1 %vm2601_vm3, %v2492_v14  ;;  %v2493_v8 = vsel %vm2462_vm2, %v2380_v62, %v6452_v27  ;;  %v2268_v27 = vsel %vm2236_vm0, %v5078_v47, %v6179_v31 }
 0x259   : > { %4933 = vmatmul.msk.f32.vlgmr.msra.gmra.mxu2 %vm2601_vm3, %v6616_v25  ;;  %v2381_v42 = vsel %vm2349_vm1, %v2268_v27, %v6556_v36 }
 0x25b   : > { %1630 = vrot.lane.b32.xlu1 %v6109_v58, %s5246_s20  ;;  %1982 = vrot.lane.b32.xlu2 %v6592_v12, %s5247_s26  ;;  %v6667_v39 = vpop.f32.mrf.mxu0 }
 0x25c   : > { %2046 = vrot.lane.b32.xlu0 %v6621_v57, %s5247_s26 }
 0x25d   : > { %v6637_v14 = vpop.permute.xlu2 %2034  ;;  %v2031_v30 = vpop.permute.xlu1 %2030 }
 0x25e   : > { %v1679_v58 = vpop.permute.xlu0 %1678 }
 0x25f   : > { %v2415_v32 = vsel %vm2349_vm1, %v2302_v22, %v1679_v58  ;;  %v6671_v22 = vpop.f32.mrf.mxu1  ;;  %v2494_v58 = vsel %vm2462_vm2, %v2381_v42, %v6481_v61  ;;  %v5080_v61 = vld [vmem:[%s5669_s18 + $0x100] sm:$0xff] }
 0x260   : > { %4787 = vmatmul.msk.f32.gmra.mxu0 %vm2601_vm3, %v2493_v8  ;;  %4899 = vmatmul.msk.f32.gmra.mxu1 %vm2601_vm3, %v2493_v8  ;;  %v2528_v49 = vsel %vm2462_vm2, %v2415_v32, %v2031_v30  ;;  %v6678_v8 = vld [vmem:[%s5669_s18 + $0x3d0] sm:$0xff]  ;;  %v2269_v32 = vsel %vm2236_vm0, %v5080_v61, %v6292_v48  ;;  %v6702_v48 = vld [vmem:[%s5669_s18 + $0x358] sm:$0xff] }
 0x261   : > { %4822 = vmatmul.msk.f32.vlgmr.msra.gmra.mxu3 %vm2601_vm3, %v2528_v49  ;;  %4934 = vmatmul.msk.f32.gmra.mxu2 %vm2601_vm3, %v2528_v49  ;;  %v2382_v49 = vsel %vm2349_vm1, %v2269_v32, %v6505_v38 }
 0x262   : > { %v2495_v27 = vsel %vm2462_vm2, %v2382_v49, %v1965_v35  ;;  %v6711_v35 = vld [vmem:[%s5669_s18 + $0x2d8] sm:$0xff] }
 0x263   : > { %1696 = vrot.lane.b32.xlu1 %v6648_v7, %s5246_s20  ;;  %1280 = vrot.lane.b32.xlu2 %v5079_v52, %s5245_s19  ;;  %v6704_v38 = vpop.f32.mrf.mxu0 }
 0x264   : > { %1344 = vrot.lane.b32.xlu0 %v6652_v10, %s5245_s19 }
 0x265   : > { %v6669_v62 = vpop.permute.xlu2 %1332  ;;  %v1329_v30 = vpop.permute.xlu1 %1328 }
 0x266   : > { %v1967_v31 = vpop.permute.xlu0 %1966  ;;  %v2303_v36 = vsel %vm2236_vm0, %v5993_v20, %v1329_v30 }
 0x267   : > { %v2416_v20 = vsel %vm2349_vm1, %v2303_v36, %v6581_v40  ;;  %v6706_v30 = vpop.f32.mrf.mxu1  ;;  %v5081_v40 = vld [vmem:[%s5669_s18 + $0x1d8] sm:$0xff] }
 0x268   : > { %4788 = vmatmul.msk.f32.gmra.mxu0 %vm2601_vm3, %v2494_v58  ;;  %4900 = vmatmul.msk.f32.gmra.mxu1 %vm2601_vm3, %v2494_v58  ;;  %v5082_v58 = vld [vmem:[%s5669_s18 + $0x108] sm:$0xff] }
 0x269   : > { %v2270_v36 = vsel %vm2236_vm0, %v5082_v58, %v6315_v2 }
 0x26a   : > { %v2383_v61 = vsel %vm2349_vm1, %v2270_v36, %v6554_v24  ;;  %v5083_v24 = vld [vmem:[%s5669_s18 + $0x110] sm:$0xff] }
 0x26b   : > { %1632 = vrot.lane.b32.xlu1 %v6128_v60, %s5246_s20  ;;  %1984 = vrot.lane.b32.xlu2 %v6652_v10, %s5247_s26  ;;  %v6740_v58 = vpop.f32.mrf.mxu0 }
 0x26c   : > { %2048 = vrot.lane.b32.xlu0 %v6678_v8, %s5247_s26 }
 0x26d   : > { %v6693_v47 = vpop.permute.xlu2 %1620  ;;  %v1617_v60 = vpop.permute.xlu1 %1616 }
 0x26e   : > { %v2033_v52 = vpop.permute.xlu0 %2032 }
 0x26f   : > { %v2529_v42 = vsel %vm2462_vm2, %v2416_v20, %v2033_v52 }
 0x270   : > { %4789 = vmatmul.msk.f32.gmra.mxu0 %vm2601_vm3, %v2495_v27  ;;  %4901 = vmatmul.msk.f32.gmra.mxu1 %vm2601_vm3, %v2495_v27  ;;  %v2496_v27 = vsel %vm2462_vm2, %v2383_v61, %v1967_v31  ;;  %v2271_v31 = vsel %vm2236_vm0, %v5083_v24, %v6361_v26 }
 0x271   : > { %4823 = vmatmul.msk.f32.gmra.mxu3 %vm2601_vm3, %v2529_v42  ;;  %4935 = vmatmul.msk.f32.gmra.mxu2 %vm2601_vm3, %v2529_v42  ;;  %v2384_v36 = vsel %vm2349_vm1, %v2271_v31, %v1617_v60  ;;  %v6758_v60 = vld [vmem:[%s5669_s18 + $0x360] sm:$0xff] }
 0x273   : > { %1698 = vrot.lane.b32.xlu1 %v6702_v48, %s5246_s20  ;;  %1282 = vrot.lane.b32.xlu2 %v5081_v40, %s5245_s19  ;;  %v6733_v40 = vld [vmem:[%s5669_s18 + $0x3d8] sm:$0xff] }
 0x274   : > { %1346 = vrot.lane.b32.xlu0 %v6711_v35, %s5245_s19 }
 0x275   : > { %v6724_v32 = vpop.permute.xlu2 %1686  ;;  %v1683_v49 = vpop.permute.xlu1 %1682 }
 0x276   : > { %v1331_v52 = vpop.permute.xlu0 %1330 }
 0x277   : > { %v2304_v20 = vsel %vm2236_vm0, %v6012_v53, %v1331_v52  ;;  %v6742_v53 = vpop.f32.mrf.mxu1 }
 0x278   : > { %4790 = vmatmul.msk.f32.gmra.mxu0 %vm2601_vm3, %v2496_v27  ;;  %4902 = vmatmul.msk.f32.gmra.mxu1 %vm2601_vm3, %v2496_v27  ;;  %v2417_v42 = vsel %vm2349_vm1, %v2304_v20, %v1683_v49  ;;  %v2497_v49 = vsel %vm2462_vm2, %v2384_v36, %v6609_v23  ;;  %v5084_v27 = vld [vmem:[%s5669_s18 + $0x118] sm:$0xff]  ;;  %v6771_v23 = vpop.f32.mrf.mxu0 }
 0x279   : > { %v2530_v2 = vsel %vm2462_vm2, %v2417_v42, %v6637_v14  ;;  %v2272_v52 = vsel %vm2236_vm0, %v5084_v27, %v6382_v33  ;;  %9552 = vst [vmem:[#allocation34_spill] sm:$0xff] %v6771_v23  ;;  %v2305_v33 = vsel %vm2236_vm0, %v6035_v29, %v6669_v62  ;;  %v5086_v29 = vld [vmem:[%s5669_s18 + $0x120] sm:$0xff] }
 0x27a   : > { %4824 = vmatmul.msk.f32.gmra.mxu3 %vm2601_vm3, %v2530_v2  ;;  %4936 = vmatmul.msk.f32.gmra.mxu2 %vm2601_vm3, %v2530_v2  ;;  %v5085_v2 = vld [vmem:[%s5669_s18 + $0x1e0] sm:$0xff]  ;;  %v2273_v62 = vsel %vm2236_vm0, %v5086_v29, %v6334_v16  ;;  %v6814_v16 = vld [vmem:[%s5669_s18 + $0x2e8] sm:$0xff] }
 0x27b   : > { %1634 = vrot.lane.b32.xlu1 %v6149_v21, %s5246_s20  ;;  %1986 = vrot.lane.b32.xlu2 %v6711_v35, %s5247_s26  ;;  %v6761_v21 = vld [vmem:[%s5669_s18 + $0x2e0] sm:$0xff] }
 0x27c   : > { %2050 = vrot.lane.b32.xlu0 %v6733_v40, %s5247_s26 }
 0x27d   : > { %v1975_v26 = vpop.permute.xlu2 %1974  ;;  %v1971_v14 = vpop.permute.xlu1 %1970 }
 0x27e   : > { %v1619_v61 = vpop.permute.xlu0 %1618 }
 0x27f   : > { %v2385_v20 = vsel %vm2349_vm1, %v2272_v52, %v1619_v61  ;;  %v6773_v42 = vpop.f32.mrf.mxu1  ;;  %v6786_v52 = vld [vmem:[%s5669_s18 + $0x3e0] sm:$0xff] }
 0x280   : > { %4791 = vmatmul.msk.f32.gmra.mxu0 %vm2601_vm3, %v2497_v49  ;;  %4903 = vmatmul.msk.f32.gmra.mxu1 %vm2601_vm3, %v2497_v49  ;;  %9553 = vst [vmem:[#allocation35_spill] sm:$0xff] %v6773_v42  ;;  %v2498_v61 = vsel %vm2462_vm2, %v2385_v20, %v1971_v14 }
 0x283   : > { %1700 = vrot.lane.b32.xlu1 %v6758_v60, %s5246_s20  ;;  %1284 = vrot.lane.b32.xlu2 %v5085_v2, %s5245_s19  ;;  %v2386_v2 = vsel %vm2349_vm1, %v2273_v62, %v6693_v47  ;;  %v5087_v47 = vld [vmem:[%s5669_s18 + $0x1e8] sm:$0xff] }
 0x284   : > { %1348 = vrot.lane.b32.xlu0 %v6761_v21, %s5245_s19 }
 0x285   : > { %v2041_v24 = vpop.permute.xlu2 %2040  ;;  %v2037_v31 = vpop.permute.xlu1 %2036 }
 0x286   : > { %v1685_v36 = vpop.permute.xlu0 %1684 }
 0x287   : > { %v2418_v49 = vsel %vm2349_vm1, %v2305_v33, %v1685_v36  ;;  %v6805_v33 = vpop.f32.mrf.mxu1 }
 0x288   : > { %4792 = vmatmul.msk.f32.gmra.mxu0 %vm2601_vm3, %v2498_v61  ;;  %4904 = vmatmul.msk.f32.gmra.mxu1 %vm2601_vm3, %v2498_v61  ;;  %v2531_v27 = vsel %vm2462_vm2, %v2418_v49, %v2037_v31  ;;  %9555 = vst [vmem:[#allocation37_spill] sm:$0xff] %v6805_v33  ;;  %v6811_v61 = vld [vmem:[%s5669_s18 + $0x368] sm:$0xff] }
 0x289   : > { %4825 = vmatmul.msk.f32.gmra.mxu3 %vm2601_vm3, %v2531_v27  ;;  %4937 = vmatmul.msk.f32.gmra.mxu2 %vm2601_vm3, %v2531_v27  ;;  %v5088_v27 = vld [vmem:[%s5669_s18 + $0x128] sm:$0xff] }
 0x28a   : > { %v2274_v29 = vsel %vm2236_vm0, %v5088_v27, %v6359_v43  ;;  %v6837_v43 = vld [vmem:[%s5669_s18 + $0x3e8] sm:$0xff] }
 0x28b   : > { %1636 = vrot.lane.b32.xlu1 %v6168_v0, %s5246_s20  ;;  %1988 = vrot.lane.b32.xlu2 %v6761_v21, %s5247_s26  ;;  %v6803_v0 = vpop.f32.mrf.mxu0 }
 0x28c   : > { %2052 = vrot.lane.b32.xlu0 %v6786_v52, %s5247_s26  ;;  %9554 = vst [vmem:[#allocation36_spill] sm:$0xff] %v6803_v0 }
 0x28d   : > { %v6799_v14 = vpop.permute.xlu2 %1338  ;;  %v1335_v20 = vpop.permute.xlu1 %1334 }
 0x28e   : > { %v1973_v31 = vpop.permute.xlu0 %1972  ;;  %v2306_v49 = vsel %vm2236_vm0, %v6032_v55, %v1335_v20 }
 0x28f   : > { %v2499_v36 = vsel %vm2462_vm2, %v2386_v2, %v1973_v31  ;;  %v2419_v20 = vsel %vm2349_vm1, %v2306_v49, %v6724_v32  ;;  %v6841_v27 = vpop.f32.mrf.mxu1 }
 0x290   : > { %4793 = vmatmul.msk.f32.gmra.mxu0 %vm2601_vm3, %v2499_v36  ;;  %4905 = vmatmul.msk.f32.gmra.mxu1 %vm2601_vm3, %v2499_v36  ;;  %9557 = vst [vmem:[#allocation39_spill] sm:$0xff] %v6841_v27 }
 0x293   : > { %1702 = vrot.lane.b32.xlu1 %v6811_v61, %s5246_s20  ;;  %1286 = vrot.lane.b32.xlu2 %v5087_v47, %s5245_s19  ;;  %v6839_v47 = vpop.f32.mrf.mxu0 }
 0x294   : > { %1350 = vrot.lane.b32.xlu0 %v6814_v16, %s5245_s19  ;;  %9556 = vst [vmem:[#allocation38_spill] sm:$0xff] %v6839_v47 }
 0x295   : > { %v6827_v62 = vpop.permute.xlu2 %1626  ;;  %v1623_v2 = vpop.permute.xlu1 %1622 }
 0x296   : > { %v2387_v31 = vsel %vm2349_vm1, %v2274_v29, %v1623_v2  ;;  %v2039_v55 = vpop.permute.xlu0 %2038  ;;  %v6857_v2 = vld [vmem:[%s5669_s18 + $0x370] sm:$0xff] }
 0x297   : > { %v2532_v36 = vsel %vm2462_vm2, %v2419_v20, %v2039_v55  ;;  %v2500_v33 = vsel %vm2462_vm2, %v2387_v31, %v1975_v26  ;;  %v6881_v47 = vpop.f32.mrf.mxu1 }
 0x298   : > { %4826 = vmatmul.msk.f32.gmra.mxu3 %vm2601_vm3, %v2532_v36  ;;  %4938 = vmatmul.msk.f32.gmra.mxu2 %vm2601_vm3, %v2532_v36  ;;  %v5090_v36 = vld [vmem:[%s5669_s18 + $0x130] sm:$0xff]  ;;  %9559 = vst [vmem:[#allocation41_spill] sm:$0xff] %v6881_v47 }
 0x299   : > { %4794 = vmatmul.msk.f32.gmra.mxu0 %vm2601_vm3, %v2500_v33  ;;  %4906 = vmatmul.msk.f32.gmra.mxu1 %vm2601_vm3, %v2500_v33 }
 0x29b   : > { %1638 = vrot.lane.b32.xlu1 %v6193_v6, %s5246_s20  ;;  %1990 = vrot.lane.b32.xlu2 %v6814_v16, %s5247_s26  ;;  %v6860_v6 = vld [vmem:[%s5669_s18 + $0x2f0] sm:$0xff] }
 0x29c   : > { %2054 = vrot.lane.b32.xlu0 %v6837_v43, %s5247_s26 }
 0x29d   : > { %v1689_v32 = vpop.permute.xlu1 %1688  ;;  %v6851_v26 = vpop.permute.xlu2 %1692 }
 0x29e   : > { %v1337_v49 = vpop.permute.xlu0 %1336 }
 0x29f   : > { %v2307_v29 = vsel %vm2236_vm0, %v6055_v50, %v1337_v49  ;;  %v5089_v50 = vld [vmem:[%s5669_s18 + $0x1f0] sm:$0xff] }
 0x2a0   : > { %v2420_v33 = vsel %vm2349_vm1, %v2307_v29, %v1689_v32  ;;  %v2275_v32 = vsel %vm2236_vm0, %v5090_v36, %v6483_v44 }
 0x2a1   : > { %v2533_v31 = vsel %vm2462_vm2, %v2420_v33, %v2041_v24  ;;  %v6877_v33 = vld [vmem:[%s5669_s18 + $0x3f0] sm:$0xff] }
 0x2a2   : > { %4827 = vmatmul.msk.f32.gmra.mxu3 %vm2601_vm3, %v2533_v31  ;;  %4939 = vmatmul.msk.f32.gmra.mxu2 %vm2601_vm3, %v2533_v31  ;;  %v6879_v31 = vpop.f32.mrf.mxu0 }
 0x2a3   : > { %1704 = vrot.lane.b32.xlu1 %v6857_v2, %s5246_s20  ;;  %1288 = vrot.lane.b32.xlu2 %v5089_v50, %s5245_s19  ;;  %9558 = vst [vmem:[#allocation40_spill] sm:$0xff] %v6879_v31  ;;  %v6917_v31 = vpop.f32.mrf.mxu1 }
 0x2a4   : > { %1352 = vrot.lane.b32.xlu0 %v6860_v6, %s5245_s19  ;;  %9561 = vst [vmem:[#allocation43_spill] sm:$0xff] %v6917_v31 }
 0x2a5   : > { %v1977_v55 = vpop.permute.xlu1 %1976  ;;  %v1981_v20 = vpop.permute.xlu2 %1980 }
 0x2a6   : > { %v1625_v24 = vpop.permute.xlu0 %1624 }
 0x2a7   : > { %v2388_v49 = vsel %vm2349_vm1, %v2275_v32, %v1625_v24 }
 0x2a8   : > { %v2501_v29 = vsel %vm2462_vm2, %v2388_v49, %v1977_v55  ;;  %v2308_v55 = vsel %vm2236_vm0, %v6073_v1, %v6799_v14  ;;  %v6897_v49 = vld [vmem:[%s5669_s18 + $0x378] sm:$0xff] }
 0x2a9   : > { %4795 = vmatmul.msk.f32.gmra.mxu0 %vm2601_vm3, %v2501_v29  ;;  %4907 = vmatmul.msk.f32.gmra.mxu1 %vm2601_vm3, %v2501_v29  ;;  %v5091_v1 = vld [vmem:[%s5669_s18 + $0x1f8] sm:$0xff] }
 0x2aa   : > { %v5092_v14 = vld [vmem:[%s5669_s18 + $0x138] sm:$0xff] }
 0x2ab   : > { %1640 = vrot.lane.b32.xlu1 %v6190_v3, %s5246_s20  ;;  %1992 = vrot.lane.b32.xlu2 %v6860_v6, %s5247_s26  ;;  %v6900_v3 = vld [vmem:[%s5669_s18 + $0x2f8] sm:$0xff]  ;;  %v2276_v29 = vsel %vm2236_vm0, %v5092_v14, %v6507_v45 }
 0x2ac   : > { %2056 = vrot.lane.b32.xlu0 %v6877_v33, %s5247_s26 }
 0x2ad   : > { %v2043_v44 = vpop.permute.xlu1 %2042  ;;  %v1279_v50 = vpop.permute.xlu2 %1278 }
 0x2ae   : > { %v1691_v36 = vpop.permute.xlu0 %1690 }
 0x2af   : > { %v2421_v32 = vsel %vm2349_vm1, %v2308_v55, %v1691_v36  ;;  %v2389_v36 = vsel %vm2349_vm1, %v2276_v29, %v6827_v62  ;;  %v5093_v62 = vld [vmem:[%s5669_s18 + $0x140] sm:$0xff] }
 0x2b0   : > { %v2534_v24 = vsel %vm2462_vm2, %v2421_v32, %v2043_v44  ;;  %v2277_v14 = vsel %vm2236_vm0, %v5093_v62, %v6561_v59  ;;  %v6945_v62 = vpop.f32.mrf.mxu1 }
 0x2b1   : > { %4828 = vmatmul.msk.f32.gmra.mxu3 %vm2601_vm3, %v2534_v24  ;;  %4940 = vmatmul.msk.f32.gmra.mxu2 %vm2601_vm3, %v2534_v24  ;;  %v6915_v24 = vpop.f32.mrf.mxu0  ;;  %9563 = vst [vmem:[#allocation45_spill] sm:$0xff] %v6945_v62 }
 0x2b2   : > { %9560 = vst [vmem:[#allocation42_spill] sm:$0xff] %v6915_v24 }
 0x2b3   : > { %1706 = vrot.lane.b32.xlu1 %v6897_v49, %s5246_s20  ;;  %1290 = vrot.lane.b32.xlu2 %v5091_v1, %s5245_s19  ;;  %v6923_v1 = vld [vmem:[%s5669_s18 + $0x3f8] sm:$0xff] }
 0x2b4   : > { %1354 = vrot.lane.b32.xlu0 %v6900_v3, %s5245_s19 }
 0x2b5   : > { %v1341_v44 = vpop.permute.xlu1 %1340  ;;  %v1983_v55 = vpop.permute.xlu2 %1982 }
 0x2b6   : > { %v1979_v32 = vpop.permute.xlu0 %1978  ;;  %v2309_v45 = vsel %vm2236_vm0, %v6091_v28, %v1341_v44 }
 0x2b7   : > { %v2502_v47 = vsel %vm2462_vm2, %v2389_v36, %v1979_v32  ;;  %v2422_v36 = vsel %vm2349_vm1, %v2309_v45, %v6851_v26  ;;  %v5094_v26 = vld [vmem:[%s5669_s18 + $0x200] sm:$0xff] }
 0x2b8   : > { %4796 = vmatmul.msk.f32.gmra.mxu0 %vm2601_vm3, %v2502_v47  ;;  %4908 = vmatmul.msk.f32.gmra.mxu1 %vm2601_vm3, %v2502_v47 }
 0x2b9   : > { %v6943_v59 = vpop.f32.mrf.mxu0 }
 0x2ba   : > { %9562 = vst [vmem:[#allocation44_spill] sm:$0xff] %v6943_v59 }
 0x2bb   : > { %1642 = vrot.lane.b32.xlu1 %v6214_v11, %s5246_s20  ;;  %1994 = vrot.lane.b32.xlu2 %v6900_v3, %s5247_s26 }
 0x2bc   : > { %2058 = vrot.lane.b32.xlu0 %v6923_v1, %s5247_s26 }
 0x2bd   : > { %v1629_v47 = vpop.permute.xlu1 %1628  ;;  %v1281_v29 = vpop.permute.xlu2 %1280 }
 0x2be   : > { %v2390_v28 = vsel %vm2349_vm1, %v2277_v14, %v1629_v47  ;;  %v2045_v44 = vpop.permute.xlu0 %2044  ;;  %v6956_v47 = vld [vmem:[%s5669_s18 + $0x400] sm:$0xff] }
 0x2bf   : > { %v2503_v11 = vsel %vm2462_vm2, %v2390_v28, %v1981_v20  ;;  %v2535_v32 = vsel %vm2462_vm2, %v2422_v36, %v2045_v44  ;;  %v6959_v36 = vld [vmem:[%s5669_s18 + $0x248] sm:$0xff] }
 0x2c0   : > { %4829 = vmatmul.msk.f32.gmra.mxu3 %vm2601_vm3, %v2535_v32  ;;  %4941 = vmatmul.msk.f32.gmra.mxu2 %vm2601_vm3, %v2535_v32 }
 0x2c1   : > { %4797 = vmatmul.msk.f32.gmra.mxu0 %vm2601_vm3, %v2503_v11  ;;  %4909 = vmatmul.msk.f32.gmra.mxu1 %vm2601_vm3, %v2503_v11 }
 0x2c3   : > { %1708 = vrot.lane.b32.xlu1 %v6258_v51, %s5246_s20  ;;  %1292 = vrot.lane.b32.xlu2 %v5094_v26, %s5245_s19  ;;  %v5096_v51 = vld [vmem:[%s5669_s18 + $0x148] sm:$0xff] }
 0x2c4   : > { %1356 = vrot.lane.b32.xlu0 %v6233_v19, %s5245_s19  ;;  %v2278_v44 = vsel %vm2236_vm0, %v5096_v51, %v1279_v50  ;;  %v6979_v50 = vpop.f32.mrf.mxu1  ;;  %v6993_v51 = vld [vmem:[%s5669_s18 + $0x250] sm:$0xff] }
 0x2c5   : > { %v1695_v20 = vpop.permute.xlu1 %1694  ;;  %v1985_v45 = vpop.permute.xlu2 %1984  ;;  %9565 = vst [vmem:[#allocation47_spill] sm:$0xff] %v6979_v50 }
 0x2c6   : > { %v1343_v14 = vpop.permute.xlu0 %1342 }
 0x2c7   : > { %v2310_v28 = vsel %vm2236_vm0, %v6959_v36, %v1343_v14 }
 0x2c8   : > { %v2423_v14 = vsel %vm2349_vm1, %v2310_v28, %v1695_v20  ;;  %v6990_v28 = vld [vmem:[%s5669_s18 + $0x408] sm:$0xff] }
 0x2cb   : > { %1644 = vrot.lane.b32.xlu1 %v6236_v4, %s5246_s20  ;;  %1996 = vrot.lane.b32.xlu2 %v6233_v19, %s5247_s26  ;;  %v6977_v19 = vpop.f32.mrf.mxu0 }
 0x2cc   : > { %2060 = vrot.lane.b32.xlu0 %v6956_v47, %s5247_s26  ;;  %9564 = vst [vmem:[#allocation46_spill] sm:$0xff] %v6977_v19 }
 0x2cd   : > { %v1631_v11 = vpop.permute.xlu1 %1630  ;;  %v1283_v32 = vpop.permute.xlu2 %1282 }
 0x2ce   : > { %v2391_v26 = vsel %vm2349_vm1, %v2278_v44, %v1631_v11  ;;  %v2047_v24 = vpop.permute.xlu0 %2046 }
 0x2cf   : > { %v2504_v4 = vsel %vm2462_vm2, %v2391_v26, %v1983_v55  ;;  %v2536_v62 = vsel %vm2462_vm2, %v2423_v14, %v2047_v24  ;;  %v5097_v55 = vld [vmem:[%s5669_s18 + $0x208] sm:$0xff] }
 0x2d0   : > { %4830 = vmatmul.msk.f32.gmra.mxu3 %vm2601_vm3, %v2536_v62  ;;  %4942 = vmatmul.msk.f32.gmra.mxu2 %vm2601_vm3, %v2536_v62 }
 0x2d1   : > { %4798 = vmatmul.msk.f32.gmra.mxu0 %vm2601_vm3, %v2504_v4  ;;  %4910 = vmatmul.msk.f32.gmra.mxu1 %vm2601_vm3, %v2504_v4 }
 0x2d3   : > { %1710 = vrot.lane.b32.xlu1 %v6275_v18, %s5246_s20  ;;  %1294 = vrot.lane.b32.xlu2 %v5097_v55, %s5245_s19  ;;  %v5099_v18 = vld [vmem:[%s5669_s18 + $0x150] sm:$0xff] }
 0x2d4   : > { %1358 = vrot.lane.b32.xlu0 %v6278_v5, %s5245_s19  ;;  %v2279_v11 = vsel %vm2236_vm0, %v5099_v18, %v1281_v29  ;;  %v7013_v29 = vpop.f32.mrf.mxu1 }
 0x2d5   : > { %v1697_v24 = vpop.permute.xlu1 %1696  ;;  %v1987_v20 = vpop.permute.xlu2 %1986  ;;  %9567 = vst [vmem:[#allocation49_spill] sm:$0xff] %v7013_v29 }
 0x2d6   : > { %v1345_v62 = vpop.permute.xlu0 %1344 }
 0x2d7   : > { %v2311_v44 = vsel %vm2236_vm0, %v6993_v51, %v1345_v62 }
 0x2d8   : > { %v2424_v55 = vsel %vm2349_vm1, %v2311_v44, %v1697_v24  ;;  %v5100_v24 = vld [vmem:[%s5669_s18 + $0x210] sm:$0xff] }
 0x2db   : > { %1646 = vrot.lane.b32.xlu1 %v6255_v13, %s5246_s20  ;;  %1998 = vrot.lane.b32.xlu2 %v6278_v5, %s5247_s26  ;;  %v7011_v5 = vpop.f32.mrf.mxu0 }
 0x2dc   : > { %2062 = vrot.lane.b32.xlu0 %v6990_v28, %s5247_s26  ;;  %9566 = vst [vmem:[#allocation48_spill] sm:$0xff] %v7011_v5 }
 0x2dd   : > { %v1633_v26 = vpop.permute.xlu1 %1632  ;;  %v1285_v62 = vpop.permute.xlu2 %1284 }
 0x2de   : > { %v2392_v14 = vsel %vm2349_vm1, %v2279_v11, %v1633_v26  ;;  %v2049_v4 = vpop.permute.xlu0 %2048  ;;  %v7024_v11 = vld [vmem:[%s5669_s18 + $0x410] sm:$0xff]  ;;  %v7027_v26 = vld [vmem:[%s5669_s18 + $0x258] sm:$0xff] }
 0x2df   : > { %v2505_v13 = vsel %vm2462_vm2, %v2392_v14, %v1985_v45  ;;  %v2537_v19 = vsel %vm2462_vm2, %v2424_v55, %v2049_v4  ;;  %v9568_v45 = vld [vmem:[#allocation6_spill] sm:$0xff]  ;;  %v9569_v4 = vld [vmem:[#allocation7_spill] sm:$0xff] }
 0x2e0   : > { %4831 = vmatmul.msk.f32.gmra.mxu3 %vm2601_vm3, %v2537_v19  ;;  %4943 = vmatmul.msk.f32.gmra.mxu2 %vm2601_vm3, %v2537_v19 }
 0x2e1   : > { %4799 = vmatmul.msk.f32.gmra.mxu0 %vm2601_vm3, %v2505_v13  ;;  %4911 = vmatmul.msk.f32.gmra.mxu1 %vm2601_vm3, %v2505_v13 }
 0x2e3   : > { %1712 = vrot.lane.b32.xlu1 %v6321_v37, %s5246_s20  ;;  %1296 = vrot.lane.b32.xlu2 %v5100_v24, %s5245_s19  ;;  %v5102_v37 = vld [vmem:[%s5669_s18 + $0x158] sm:$0xff] }
 0x2e4   : > { %1360 = vrot.lane.b32.xlu0 %v9568_v45, %s5245_s19  ;;  %v2280_v55 = vsel %vm2236_vm0, %v5102_v37, %v1283_v32  ;;  %v7047_v32 = vpop.f32.mrf.mxu1  ;;  %v9572_v37 = vld [vmem:[#allocation8_spill] sm:$0xff] }
 0x2e5   : > { %v1699_v44 = vpop.permute.xlu1 %1698  ;;  %v1989_v18 = vpop.permute.xlu2 %1988  ;;  %9571 = vst [vmem:[#allocation7_spill] sm:$0xff] %v7047_v32 }
 0x2e6   : > { %v1347_v19 = vpop.permute.xlu0 %1346 }
 0x2e7   : > { %v2312_v14 = vsel %vm2236_vm0, %v7027_v26, %v1347_v19 }
 0x2e8   : > { %v2425_v5 = vsel %vm2349_vm1, %v2312_v14, %v1699_v44  ;;  %v7058_v14 = vld [vmem:[%s5669_s18 + $0x418] sm:$0xff] }
 0x2eb   : > { %1648 = vrot.lane.b32.xlu1 %v9569_v4, %s5246_s20  ;;  %2000 = vrot.lane.b32.xlu2 %v9568_v45, %s5247_s26  ;;  %v7045_v45 = vpop.f32.mrf.mxu0 }
 0x2ec   : > { %2064 = vrot.lane.b32.xlu0 %v7024_v11, %s5247_s26  ;;  %9570 = vst [vmem:[#allocation6_spill] sm:$0xff] %v7045_v45 }
 0x2ed   : > { %v1635_v13 = vpop.permute.xlu1 %1634  ;;  %v1287_v4 = vpop.permute.xlu2 %1286 }
 0x2ee   : > { %v2051_v24 = vpop.permute.xlu0 %2050  ;;  %v2393_v29 = vsel %vm2349_vm1, %v2280_v55, %v1635_v13  ;;  %v5105_v55 = vld [vmem:[%s5669_s18 + $0x160] sm:$0xff] }
 0x2ef   : > { %v2538_v19 = vsel %vm2462_vm2, %v2425_v5, %v2051_v24  ;;  %v2506_v50 = vsel %vm2462_vm2, %v2393_v29, %v1987_v20  ;;  %v5103_v20 = vld [vmem:[%s5669_s18 + $0x218] sm:$0xff]  ;;  %v2281_v13 = vsel %vm2236_vm0, %v5105_v55, %v1285_v62  ;;  %v7081_v62 = vpop.f32.mrf.mxu1 }
 0x2f0   : > { %4832 = vmatmul.msk.f32.gmra.mxu3 %vm2601_vm3, %v2538_v19  ;;  %4944 = vmatmul.msk.f32.gmra.mxu2 %vm2601_vm3, %v2538_v19  ;;  %9574 = vst [vmem:[#allocation50_spill] sm:$0xff] %v7081_v62 }
 0x2f1   : > { %4800 = vmatmul.msk.f32.gmra.mxu0 %vm2601_vm3, %v2506_v50  ;;  %4912 = vmatmul.msk.f32.gmra.mxu1 %vm2601_vm3, %v2506_v50  ;;  %v7065_v50 = vld [vmem:[%s5669_s18 + $0x260] sm:$0xff] }
 0x2f3   : > { %1714 = vrot.lane.b32.xlu1 %v6340_v41, %s5246_s20  ;;  %1298 = vrot.lane.b32.xlu2 %v5103_v20, %s5245_s19 }
 0x2f4   : > { %1362 = vrot.lane.b32.xlu0 %v6343_v17, %s5245_s19 }
 0x2f5   : > { %v1701_v5 = vpop.permute.xlu1 %1700  ;;  %v1991_v44 = vpop.permute.xlu2 %1990 }
 0x2f6   : > { %v1349_v29 = vpop.permute.xlu0 %1348 }
 0x2f7   : > { %v2313_v41 = vsel %vm2236_vm0, %v7065_v50, %v1349_v29  ;;  %v7092_v29 = vld [vmem:[%s5669_s18 + $0x420] sm:$0xff] }
 0x2f8   : > { %v2426_v20 = vsel %vm2349_vm1, %v2313_v41, %v1701_v5 }
 0x2fb   : > { %1650 = vrot.lane.b32.xlu1 %v9572_v37, %s5246_s20  ;;  %2002 = vrot.lane.b32.xlu2 %v6343_v17, %s5247_s26  ;;  %v7079_v17 = vpop.f32.mrf.mxu0 }
 0x2fc   : > { %2066 = vrot.lane.b32.xlu0 %v7058_v14, %s5247_s26  ;;  %9573 = vst [vmem:[#allocation8_spill] sm:$0xff] %v7079_v17 }
 0x2fd   : > { %v1637_v24 = vpop.permute.xlu1 %1636  ;;  %v1289_v32 = vpop.permute.xlu2 %1288 }
 0x2fe   : > { %v2053_v19 = vpop.permute.xlu0 %2052  ;;  %v2394_v37 = vsel %vm2349_vm1, %v2281_v13, %v1637_v24  ;;  %v5108_v13 = vld [vmem:[%s5669_s18 + $0x168] sm:$0xff] }
 0x2ff   : > { %v2539_v45 = vsel %vm2462_vm2, %v2426_v20, %v2053_v19  ;;  %v2507_v59 = vsel %vm2462_vm2, %v2394_v37, %v1989_v18  ;;  %v5106_v18 = vld [vmem:[%s5669_s18 + $0x220] sm:$0xff]  ;;  %v2282_v24 = vsel %vm2236_vm0, %v5108_v13, %v1287_v4  ;;  %v9577_v4 = vld [vmem:[#allocation11_spill] sm:$0xff] }
 0x300   : > { %4833 = vmatmul.msk.f32.gmra.mxu3 %vm2601_vm3, %v2539_v45  ;;  %4945 = vmatmul.msk.f32.gmra.mxu2 %vm2601_vm3, %v2539_v45  ;;  %v7128_v13 = vld [vmem:[%s5669_s18 + $0x428] sm:$0xff] }
 0x301   : > { %4801 = vmatmul.msk.f32.gmra.mxu0 %vm2601_vm3, %v2507_v59  ;;  %4913 = vmatmul.msk.f32.gmra.mxu1 %vm2601_vm3, %v2507_v59 }
 0x303   : > { %1716 = vrot.lane.b32.xlu1 %v6388_v54, %s5246_s20  ;;  %1300 = vrot.lane.b32.xlu2 %v5106_v18, %s5245_s19  ;;  %v7098_v59 = vpop.f32.mrf.mxu0  ;;  %v7101_v54 = vld [vmem:[%s5669_s18 + $0x268] sm:$0xff] }
 0x304   : > { %1364 = vrot.lane.b32.xlu0 %v6391_v34, %s5245_s19  ;;  %9575 = vst [vmem:[#allocation51_spill] sm:$0xff] %v7098_v59 }
 0x305   : > { %v1703_v45 = vpop.permute.xlu1 %1702  ;;  %v1993_v41 = vpop.permute.xlu2 %1992 }
 0x306   : > { %v1351_v5 = vpop.permute.xlu0 %1350 }
 0x307   : > { %v2314_v55 = vsel %vm2236_vm0, %v7101_v54, %v1351_v5 }
 0x30b   : > { %1652 = vrot.lane.b32.xlu1 %v6367_v15, %s5246_s20  ;;  %2004 = vrot.lane.b32.xlu2 %v6391_v34, %s5247_s26  ;;  %v2427_v15 = vsel %vm2349_vm1, %v2314_v55, %v1703_v45  ;;  %v7115_v34 = vpop.f32.mrf.mxu1  ;;  %v5109_v45 = vld [vmem:[%s5669_s18 + $0x228] sm:$0xff] }
 0x30c   : > { %2068 = vrot.lane.b32.xlu0 %v7092_v29, %s5247_s26  ;;  %9576 = vst [vmem:[#allocation52_spill] sm:$0xff] %v7115_v34 }
 0x30d   : > { %v1639_v19 = vpop.permute.xlu1 %1638  ;;  %v1291_v59 = vpop.permute.xlu2 %1290 }
 0x30e   : > { %v2055_v20 = vpop.permute.xlu0 %2054  ;;  %v2395_v37 = vsel %vm2349_vm1, %v2282_v24, %v1639_v19  ;;  %v9579_v19 = vld [vmem:[#allocation12_spill] sm:$0xff] }
 0x30f   : > { %v2540_v18 = vsel %vm2462_vm2, %v2427_v15, %v2055_v20  ;;  %v2508_v17 = vsel %vm2462_vm2, %v2395_v37, %v1991_v44  ;;  %v7125_v44 = vpop.f32.mrf.mxu0  ;;  %v5111_v20 = vld [vmem:[%s5669_s18 + $0x170] sm:$0xff] }
 0x310   : > { %4834 = vmatmul.msk.f32.gmra.mxu3 %vm2601_vm3, %v2540_v18  ;;  %4946 = vmatmul.msk.f32.gmra.mxu2 %vm2601_vm3, %v2540_v18  ;;  %9578 = vst [vmem:[#allocation11_spill] sm:$0xff] %v7125_v44  ;;  %v2283_v15 = vsel %vm2236_vm0, %v5111_v20, %v1289_v32 }
 0x311   : > { %4802 = vmatmul.msk.f32.gmra.mxu0 %vm2601_vm3, %v2508_v17  ;;  %4914 = vmatmul.msk.f32.gmra.mxu1 %vm2601_vm3, %v2508_v17 }
 0x313   : > { %1718 = vrot.lane.b32.xlu1 %v6440_v9, %s5246_s20  ;;  %1302 = vrot.lane.b32.xlu2 %v5109_v45, %s5245_s19  ;;  %v7135_v9 = vld [vmem:[%s5669_s18 + $0x270] sm:$0xff]  ;;  %v7151_v32 = vpop.f32.mrf.mxu1 }
 0x314   : > { %1366 = vrot.lane.b32.xlu0 %v9577_v4, %s5245_s19  ;;  %9581 = vst [vmem:[#allocation53_spill] sm:$0xff] %v7151_v32 }
 0x315   : > { %v1705_v5 = vpop.permute.xlu1 %1704  ;;  %v1995_v24 = vpop.permute.xlu2 %1994 }
 0x316   : > { %v1353_v55 = vpop.permute.xlu0 %1352 }
 0x317   : > { %v2315_v17 = vsel %vm2236_vm0, %v7135_v9, %v1353_v55 }
 0x318   : > { %v2428_v45 = vsel %vm2349_vm1, %v2315_v17, %v1705_v5  ;;  %v9583_v5 = vld [vmem:[#allocation16_spill] sm:$0xff] }
 0x319   : > { %v5112_v17 = vld [vmem:[%s5669_s18 + $0x230] sm:$0xff] }
 0x31b   : > { %1654 = vrot.lane.b32.xlu1 %v9579_v19, %s5246_s20  ;;  %2006 = vrot.lane.b32.xlu2 %v9577_v4, %s5247_s26  ;;  %v7144_v19 = vpop.f32.mrf.mxu0  ;;  %v9582_v4 = vld [vmem:[#allocation15_spill] sm:$0xff] }
 0x31c   : > { %2070 = vrot.lane.b32.xlu0 %v7128_v13, %s5247_s26  ;;  %9580 = vst [vmem:[#allocation12_spill] sm:$0xff] %v7144_v19 }
 0x31d   : > { %v1641_v37 = vpop.permute.xlu1 %1640  ;;  %v1293_v62 = vpop.permute.xlu2 %1292 }
 0x31e   : > { %v2057_v18 = vpop.permute.xlu0 %2056  ;;  %v2396_v44 = vsel %vm2349_vm1, %v2283_v15, %v1641_v37  ;;  %v4454_v37 = vld [vmem:[%s9457_s4 + $0x78] sm:$0xff] }
 0x31f   : > { %v2541_v34 = vsel %vm2462_vm2, %v2428_v45, %v2057_v18  ;;  %v2509_v55 = vsel %vm2462_vm2, %v2396_v44, %v1993_v41  ;;  %v9585_v18 = vld [vmem:[#allocation18_spill] sm:$0xff]  ;;  %v7174_v45 = vld [vmem:[%s5669_s18 + $0x278] sm:$0xff]  ;;  %4520 = vmatpush.msrb.mxu2 %v4454_v37  ;;  %v9590_v37 = vld [vmem:[#allocation20_spill] sm:$0xff] }
 0x320   : > { %4835 = vmatmul.msk.f32.gmra.mxu3 %vm2601_vm3, %v2541_v34  ;;  %4947 = vmatmul.msk.f32.gmra.mxu2 %vm2601_vm3, %v2541_v34  ;;  %v7162_v34 = vld [vmem:[%s5669_s18 + $0x430] sm:$0xff] }
 0x321   : > { %4803 = vmatmul.msk.f32.gmra.mxu0 %vm2601_vm3, %v2509_v55  ;;  %4915 = vmatmul.msk.f32.gmra.mxu1 %vm2601_vm3, %v2509_v55 }
 0x323   : > { %1720 = vrot.lane.b32.xlu1 %v9582_v4, %s5246_s20  ;;  %1304 = vrot.lane.b32.xlu2 %v5112_v17, %s5245_s19  ;;  %v7164_v15 = vpop.f32.mrf.mxu0  ;;  %v5114_v4 = vld [vmem:[%s5669_s18 + $0x178] sm:$0xff] }
 0x324   : > { %1368 = vrot.lane.b32.xlu0 %v9583_v5, %s5245_s19  ;;  %9584 = vst [vmem:[#allocation15_spill] sm:$0xff] %v7164_v15  ;;  %v2284_v17 = vsel %vm2236_vm0, %v5114_v4, %v1291_v59  ;;  %v9587_v59 = vld [vmem:[#allocation23_spill] sm:$0xff]  ;;  %v5116_v4 = vld [vmem:[%s5669_s18 + $0x280] sm:$0xff] }
 0x325   : > { %v1707_v41 = vpop.permute.xlu1 %1706  ;;  %v1997_v20 = vpop.permute.xlu2 %1996 }
 0x326   : > { %v1355_v44 = vpop.permute.xlu0 %1354 }
 0x327   : > { %v2316_v55 = vsel %vm2236_vm0, %v7174_v45, %v1355_v44  ;;  %v7204_v44 = vld [vmem:[%s5669_s18 + $0x438] sm:$0xff] }
 0x32b   : > { %1656 = vrot.lane.b32.xlu1 %v9585_v18, %s5246_s20  ;;  %2008 = vrot.lane.b32.xlu2 %v9583_v5, %s5247_s26  ;;  %v2429_v18 = vsel %vm2349_vm1, %v2316_v55, %v1707_v41  ;;  %v7188_v5 = vpop.f32.mrf.mxu1  ;;  %v7196_v41 = vpop.f32.mrf.mxu0  ;;  %v4453_v55 = vld [vmem:[%s9457_s4 + $0x70] sm:$0xff] }
 0x32c   : > { %2072 = vrot.lane.b32.xlu0 %v7162_v34, %s5247_s26  ;;  %9586 = vst [vmem:[#allocation16_spill] sm:$0xff] %v7188_v5  ;;  %4521 = vmatpush.msrb.mxu2 %v4453_v55 }
 0x32d   : > { %v1643_v15 = vpop.permute.xlu1 %1642  ;;  %v1295_v27 = vpop.permute.xlu2 %1294  ;;  %9589 = vst [vmem:[#allocation18_spill] sm:$0xff] %v7196_v41 }
 0x32e   : > { %v2059_v19 = vpop.permute.xlu0 %2058  ;;  %v2397_v32 = vsel %vm2349_vm1, %v2284_v17, %v1643_v15 }
 0x32f   : > { %v2542_v31 = vsel %vm2462_vm2, %v2429_v18, %v2059_v19  ;;  %v2510_v0 = vsel %vm2462_vm2, %v2397_v32, %v1995_v24  ;;  %v9588_v19 = vld [vmem:[#allocation24_spill] sm:$0xff]  ;;  %v5115_v24 = vld [vmem:[%s5669_s18 + $0x238] sm:$0xff] }
 0x330   : > { %4836 = vmatmul.msk.f32.gmra.mxu3 %vm2601_vm3, %v2542_v31  ;;  %4948 = vmatmul.msk.f32.gmra.mxu2 %vm2601_vm3, %v2542_v31  ;;  %v4463_v31 = vld [vmem:[%s9457_s4 + $0xc0] sm:$0x3f] }
 0x331   : > { %4804 = vmatmul.msk.f32.gmra.mxu0 %vm2601_vm3, %v2510_v0  ;;  %4916 = vmatmul.msk.f32.gmra.mxu1 %vm2601_vm3, %v2510_v0 }
 0x332   : > { %4981 = vmatpush.msk.msrb.mxu3 %vm4516_vm4, %v4463_v31 }
 0x333   : > { %1722 = vrot.lane.b32.xlu1 %v9587_v59, %s5246_s20  ;;  %1306 = vrot.lane.b32.xlu2 %v5115_v24, %s5245_s19  ;;  %v7217_v18 = vpop.f32.mrf.mxu0  ;;  %v5117_v59 = vld [vmem:[%s5669_s18 + $0x180] sm:$0xff] }
 0x334   : > { %1370 = vrot.lane.b32.xlu0 %v9588_v19, %s5245_s19  ;;  %9591 = vst [vmem:[#allocation23_spill] sm:$0xff] %v7217_v18  ;;  %v2285_v24 = vsel %vm2236_vm0, %v5117_v59, %v1293_v62  ;;  %v9593_v62 = vld [vmem:[#allocation31_spill] sm:$0xff] }
 0x335   : > { %v1709_v32 = vpop.permute.xlu1 %1708  ;;  %v1999_v15 = vpop.permute.xlu2 %1998  ;;  %v9596_v59 = vld [vmem:[#allocation27_spill] sm:$0xff] }
 0x336   : > { %v1357_v0 = vpop.permute.xlu0 %1356 }
 0x337   : > { %v2317_v17 = vsel %vm2236_vm0, %v5116_v4, %v1357_v0 }
 0x338   : > { %v2430_v5 = vsel %vm2349_vm1, %v2317_v17, %v1709_v32  ;;  %v5118_v32 = vld [vmem:[%s5669_s18 + $0x240] sm:$0xff] }
 0x33b   : > { %1658 = vrot.lane.b32.xlu1 %v9590_v37, %s5246_s20  ;;  %2010 = vrot.lane.b32.xlu2 %v9588_v19, %s5247_s26  ;;  %v7227_v19 = vpop.f32.mrf.mxu1  ;;  %v7237_v55 = vpop.f32.mrf.mxu0 }
 0x33c   : > { %2074 = vrot.lane.b32.xlu0 %v7204_v44, %s5247_s26  ;;  %9592 = vst [vmem:[#allocation24_spill] sm:$0xff] %v7227_v19 }
 0x33d   : > { %v1645_v31 = vpop.permute.xlu1 %1644  ;;  %v1297_v0 = vpop.permute.xlu2 %1296  ;;  %9595 = vst [vmem:[#allocation20_spill] sm:$0xff] %v7237_v55 }
 0x33e   : > { %v2061_v37 = vpop.permute.xlu0 %2060  ;;  %v2398_v42 = vsel %vm2349_vm1, %v2285_v24, %v1645_v31  ;;  %v5119_v24 = vld [vmem:[%s5669_s18 + $0x288] sm:$0xff] }
 0x33f   : > { %v2543_v41 = vsel %vm2462_vm2, %v2430_v5, %v2061_v37  ;;  %v2511_v4 = vsel %vm2462_vm2, %v2398_v42, %v1997_v20  ;;  %v9594_v5 = vld [vmem:[#allocation28_spill] sm:$0xff]  ;;  %v5120_v37 = vld [vmem:[%s5669_s18 + $0x188] sm:$0xff] }
 0x340   : > { %4837 = vmatmul.msk.f32.gmra.mxu3 %vm2601_vm3, %v2543_v41  ;;  %4949 = vmatmul.msk.f32.gmra.mxu2 %vm2601_vm3, %v2543_v41  ;;  %v7240_v41 = vld [vmem:[%s5669_s18 + $0x440] sm:$0xff] }
 0x341   : > { %4805 = vmatmul.msk.f32.gmra.mxu0 %vm2601_vm3, %v2511_v4  ;;  %4917 = vmatmul.msk.f32.gmra.mxu1 %vm2601_vm3, %v2511_v4  ;;  %v2286_v4 = vsel %vm2236_vm0, %v5120_v37, %v1295_v27 }
 0x343   : > { %1724 = vrot.lane.b32.xlu1 %v9593_v62, %s5246_s20  ;;  %1308 = vrot.lane.b32.xlu2 %v5118_v32, %s5245_s19  ;;  %v7260_v27 = vpop.f32.mrf.mxu0 }
 0x344   : > { %1372 = vrot.lane.b32.xlu0 %v9594_v5, %s5245_s19 }
 0x345   : > { %v1711_v42 = vpop.permute.xlu1 %1710  ;;  %v2001_v17 = vpop.permute.xlu2 %2000 }
 0x346   : > { %v1359_v20 = vpop.permute.xlu0 %1358 }
 0x347   : > { %v2318_v31 = vsel %vm2236_vm0, %v5119_v24, %v1359_v20 }
 0x348   : > { %v2431_v19 = vsel %vm2349_vm1, %v2318_v31, %v1711_v42  ;;  %v7271_v42 = vld [vmem:[%s5669_s18 + $0x448] sm:$0xff]  ;;  %v5122_v31 = vld [vmem:[%s5669_s18 + $0x190] sm:$0xff] }
 0x349   : > { %v2287_v37 = vsel %vm2236_vm0, %v5122_v31, %v1297_v0 }
 0x34b   : > { %1660 = vrot.lane.b32.xlu1 %v9596_v59, %s5246_s20  ;;  %2012 = vrot.lane.b32.xlu2 %v9594_v5, %s5247_s26  ;;  %v7258_v5 = vpop.f32.mrf.mxu1 }
 0x34c   : > { %2076 = vrot.lane.b32.xlu0 %v7240_v41, %s5247_s26 }
 0x34d   : > { %v1647_v62 = vpop.permute.xlu1 %1646  ;;  %v1299_v18 = vpop.permute.xlu2 %1298 }
 0x34e   : > { %v2063_v32 = vpop.permute.xlu0 %2062  ;;  %v2399_v55 = vsel %vm2349_vm1, %v2286_v4, %v1647_v62 }
 0x34f   : > { %v2544_v59 = vsel %vm2462_vm2, %v2431_v19, %v2063_v32  ;;  %v2512_v23 = vsel %vm2462_vm2, %v2399_v55, %v1999_v15  ;;  %v4452_v55 = vld [vmem:[%s9457_s4 + $0x68] sm:$0xff] }
 0x350   : > { %4838 = vmatmul.msk.f32.gmra.mxu3 %vm2601_vm3, %v2544_v59  ;;  %4950 = vmatmul.msk.f32.gmra.mxu2 %vm2601_vm3, %v2544_v59 }
 0x351   : > { %4806 = vmatmul.msk.f32.gmra.mxu0 %vm2601_vm3, %v2512_v23  ;;  %4918 = vmatmul.msk.f32.gmra.mxu1 %vm2601_vm3, %v2512_v23  ;;  %v7283_v23 = vpop.f32.mrf.mxu0 }
 0x352   : > { %9597 = vst [vmem:[#allocation31_spill] sm:$0xff] %v7283_v23  ;;  %4522 = vmatpush.msrb.mxu2 %v4452_v55  ;;  %v7310_v55 = vld [vmem:[%s5669_s18 + $0x450] sm:$0xff] }
 0x353   : > { %1726 = vrot.lane.b32.xlu1 %v6621_v57, %s5246_s20  ;;  %1310 = vrot.lane.b32.xlu2 %v6959_v36, %s5245_s19  ;;  %v4462_v57 = vld [vmem:[%s9457_s4 + $0xb8] sm:$0xff]  ;;  %v5121_v36 = vld [vmem:[%s5669_s18 + $0x290] sm:$0xff] }
 0x354   : > { %1374 = vrot.lane.b32.xlu0 %v6587_v63, %s5245_s19  ;;  %4593 = vmatpush.msrb.mxu3 %v4462_v57 }
 0x355   : > { %v1713_v15 = vpop.permute.xlu1 %1712  ;;  %v2003_v20 = vpop.permute.xlu2 %2002 }
 0x356   : > { %v1361_v19 = vpop.permute.xlu0 %1360 }
 0x357   : > { %v2319_v24 = vsel %vm2236_vm0, %v5121_v36, %v1361_v19  ;;  %v5123_v36 = vld [vmem:[%s5669_s18 + $0x298] sm:$0xff] }
 0x359   : > { %v7307_v0 = vpop.f32.mrf.mxu0 }
 0x35a   : > { %9598 = vst [vmem:[#allocation28_spill] sm:$0xff] %v7307_v0 }
 0x35b   : > { %1662 = vrot.lane.b32.xlu1 %v6592_v12, %s5246_s20  ;;  %2014 = vrot.lane.b32.xlu2 %v6587_v63, %s5247_s26  ;;  %v2432_v12 = vsel %vm2349_vm1, %v2319_v24, %v1713_v15  ;;  %v7297_v63 = vpop.f32.mrf.mxu1  ;;  %v5124_v24 = vld [vmem:[%s5669_s18 + $0x198] sm:$0xff] }
 0x35c   : > { %2078 = vrot.lane.b32.xlu0 %v7271_v42, %s5247_s26  ;;  %v2288_v31 = vsel %vm2236_vm0, %v5124_v24, %v1299_v18 }
 0x35d   : > { %v1649_v4 = vpop.permute.xlu1 %1648  ;;  %v1301_v23 = vpop.permute.xlu2 %1300 }
 0x35e   : > { %v2065_v62 = vpop.permute.xlu0 %2064  ;;  %v2400_v32 = vsel %vm2349_vm1, %v2287_v37, %v1649_v4 }
 0x35f   : > { %v2545_v59 = vsel %vm2462_vm2, %v2432_v12, %v2065_v62  ;;  %v2513_v19 = vsel %vm2462_vm2, %v2400_v32, %v2001_v17 }
 0x360   : > { %4839 = vmatmul.msk.f32.gmra.mxu3 %vm2601_vm3, %v2545_v59  ;;  %4951 = vmatmul.msk.f32.gmra.mxu2 %vm2601_vm3, %v2545_v59 }
 0x361   : > { %4807 = vmatmul.msk.f32.gmra.mxu0 %vm2601_vm3, %v2513_v19  ;;  %4919 = vmatmul.msk.f32.gmra.mxu1 %vm2601_vm3, %v2513_v19  ;;  %v7326_v62 = vpop.f32.mrf.mxu0 }
 0x362   : > { %9599 = vst [vmem:[#allocation27_spill] sm:$0xff] %v7326_v62 }
 0x363   : > { %1728 = vrot.lane.b32.xlu1 %v6678_v8, %s5246_s20  ;;  %1312 = vrot.lane.b32.xlu2 %v6993_v51, %s5245_s19  ;;  %v4451_v8 = vld [vmem:[%s9457_s4 + $0x60] sm:$0xff] }
 0x364   : > { %1376 = vrot.lane.b32.xlu0 %v6648_v7, %s5245_s19  ;;  %4523 = vmatpush.msrb.mxu2 %v4451_v8 }
 0x365   : > { %v1715_v17 = vpop.permute.xlu1 %1714  ;;  %v2005_v57 = vpop.permute.xlu2 %2004 }
 0x366   : > { %v1363_v15 = vpop.permute.xlu0 %1362 }
 0x367   : > { %v2320_v51 = vsel %vm2236_vm0, %v5123_v36, %v1363_v15 }
 0x369   : > { %v7346_v8 = vpop.f32.mrf.mxu0 }
 0x36a   : > { %9600 = vst [vmem:[#allocation54_spill] sm:$0xff] %v7346_v8 }
 0x36b   : > { %1664 = vrot.lane.b32.xlu1 %v6652_v10, %s5246_s20  ;;  %2016 = vrot.lane.b32.xlu2 %v6648_v7, %s5247_s26  ;;  %v2433_v10 = vsel %vm2349_vm1, %v2320_v51, %v1715_v17  ;;  %v7333_v7 = vpop.f32.mrf.mxu1  ;;  %v7344_v17 = vld [vmem:[%s5669_s18 + $0x458] sm:$0xff] }
 0x36c   : > { %2080 = vrot.lane.b32.xlu0 %v7310_v55, %s5247_s26 }
 0x36d   : > { %v1651_v37 = vpop.permute.xlu1 %1650  ;;  %v1303_v59 = vpop.permute.xlu2 %1302 }
 0x36e   : > { %v2067_v4 = vpop.permute.xlu0 %2066  ;;  %v2401_v12 = vsel %vm2349_vm1, %v2288_v31, %v1651_v37 }
 0x36f   : > { %v2546_v32 = vsel %vm2462_vm2, %v2433_v10, %v2067_v4  ;;  %v2514_v19 = vsel %vm2462_vm2, %v2401_v12, %v2003_v20 }
 0x370   : > { %4840 = vmatmul.msk.f32.gmra.mxu3 %vm2601_vm3, %v2546_v32  ;;  %4952 = vmatmul.msk.f32.gmra.mxu2 %vm2601_vm3, %v2546_v32 }
 0x371   : > { %4808 = vmatmul.msk.f32.gmra.mxu0 %vm2601_vm3, %v2514_v19  ;;  %4920 = vmatmul.msk.f32.gmra.mxu1 %vm2601_vm3, %v2514_v19  ;;  %v7377_v19 = vld [vmem:[%s5669_s18 + $0x460] sm:$0xff] }
 0x373   : > { %1730 = vrot.lane.b32.xlu1 %v6733_v40, %s5246_s20  ;;  %1314 = vrot.lane.b32.xlu2 %v7027_v26, %s5245_s19  ;;  %v5125_v40 = vld [vmem:[%s5669_s18 + $0x2a0] sm:$0xff] }
 0x374   : > { %1378 = vrot.lane.b32.xlu0 %v6702_v48, %s5245_s19  ;;  %v5126_v26 = vld [vmem:[%s5669_s18 + $0x1a0] sm:$0xff] }
 0x375   : > { %v1717_v18 = vpop.permute.xlu1 %1716  ;;  %v2007_v15 = vpop.permute.xlu2 %2006  ;;  %v2289_v51 = vsel %vm2236_vm0, %v5126_v26, %v1301_v23 }
 0x376   : > { %v1365_v20 = vpop.permute.xlu0 %1364  ;;  %v7372_v23 = vpop.f32.mrf.mxu0 }
 0x377   : > { %v2321_v36 = vsel %vm2236_vm0, %v5125_v40, %v1365_v20  ;;  %9601 = vst [vmem:[#allocation55_spill] sm:$0xff] %v7372_v23  ;;  %v4450_v20 = vld [vmem:[%s9457_s4 + $0x58] sm:$0xff] }
 0x378   : > { %v2434_v37 = vsel %vm2349_vm1, %v2321_v36, %v1717_v18  ;;  %4524 = vmatpush.msrb.mxu2 %v4450_v20  ;;  %v5128_v36 = vld [vmem:[%s5669_s18 + $0x1a8] sm:$0xff]  ;;  %v5129_v20 = vld [vmem:[%s5669_s18 + $0x2b0] sm:$0xff] }
 0x379   : > { %v2290_v26 = vsel %vm2236_vm0, %v5128_v36, %v1303_v59 }
 0x37b   : > { %1666 = vrot.lane.b32.xlu1 %v6711_v35, %s5246_s20  ;;  %2018 = vrot.lane.b32.xlu2 %v6702_v48, %s5247_s26  ;;  %v7364_v48 = vpop.f32.mrf.mxu1 }
 0x37c   : > { %2082 = vrot.lane.b32.xlu0 %v7344_v17, %s5247_s26 }
 0x37d   : > { %v1653_v24 = vpop.permute.xlu1 %1652  ;;  %v1305_v12 = vpop.permute.xlu2 %1304 }
 0x37e   : > { %v2069_v31 = vpop.permute.xlu0 %2068  ;;  %v2402_v4 = vsel %vm2349_vm1, %v2289_v51, %v1653_v24 }
 0x37f   : > { %v2547_v35 = vsel %vm2462_vm2, %v2434_v37, %v2069_v31  ;;  %v2515_v10 = vsel %vm2462_vm2, %v2402_v4, %v2005_v57 }
 0x380   : > { %4841 = vmatmul.msk.f32.gmra.mxu3 %vm2601_vm3, %v2547_v35  ;;  %4953 = vmatmul.msk.f32.gmra.mxu2 %vm2601_vm3, %v2547_v35 }
 0x381   : > { %4809 = vmatmul.msk.f32.gmra.mxu0 %vm2601_vm3, %v2515_v10  ;;  %4921 = vmatmul.msk.f32.gmra.mxu1 %vm2601_vm3, %v2515_v10 }
 0x383   : > { %1732 = vrot.lane.b32.xlu1 %v6786_v52, %s5246_s20  ;;  %1316 = vrot.lane.b32.xlu2 %v7065_v50, %s5245_s19  ;;  %v4461_v52 = vld [vmem:[%s9457_s4 + $0xb0] sm:$0xff]  ;;  %v5127_v50 = vld [vmem:[%s5669_s18 + $0x2a8] sm:$0xff]  ;;  %v7403_v10 = vpop.f32.mrf.mxu1 }
 0x384   : > { %1380 = vrot.lane.b32.xlu0 %v6758_v60, %s5245_s19  ;;  %4594 = vmatpush.msrb.mxu3 %v4461_v52 }
 0x385   : > { %v1719_v57 = vpop.permute.xlu1 %1718  ;;  %v2009_v18 = vpop.permute.xlu2 %2008 }
 0x386   : > { %v1367_v32 = vpop.permute.xlu0 %1366 }
 0x387   : > { %v2322_v40 = vsel %vm2236_vm0, %v5127_v50, %v1367_v32  ;;  %v7416_v32 = vld [vmem:[%s5669_s18 + $0x468] sm:$0xff]  ;;  %v5130_v50 = vld [vmem:[%s5669_s18 + $0x1b0] sm:$0xff] }
 0x388   : > { %v2435_v31 = vsel %vm2349_vm1, %v2322_v40, %v1719_v57  ;;  %v2291_v40 = vsel %vm2236_vm0, %v5130_v50, %v1305_v12 }
 0x38b   : > { %1668 = vrot.lane.b32.xlu1 %v6761_v21, %s5246_s20  ;;  %2020 = vrot.lane.b32.xlu2 %v6758_v60, %s5247_s26  ;;  %v7393_v21 = vpop.f32.mrf.mxu0 }
 0x38c   : > { %2084 = vrot.lane.b32.xlu0 %v7377_v19, %s5247_s26  ;;  %9602 = vst [vmem:[#allocation56_spill] sm:$0xff] %v7393_v21 }
 0x38d   : > { %v1655_v51 = vpop.permute.xlu1 %1654  ;;  %v1307_v60 = vpop.permute.xlu2 %1306 }
 0x38e   : > { %v2071_v24 = vpop.permute.xlu0 %2070  ;;  %v2403_v37 = vsel %vm2349_vm1, %v2290_v26, %v1655_v51 }
 0x38f   : > { %v2548_v4 = vsel %vm2462_vm2, %v2435_v31, %v2071_v24  ;;  %v2516_v35 = vsel %vm2462_vm2, %v2403_v37, %v2007_v15  ;;  %v7437_v37 = vpop.f32.mrf.mxu1 }
 0x390   : > { %4842 = vmatmul.msk.f32.gmra.mxu3 %vm2601_vm3, %v2548_v4  ;;  %4954 = vmatmul.msk.f32.gmra.mxu2 %vm2601_vm3, %v2548_v4  ;;  %9604 = vst [vmem:[#allocation58_spill] sm:$0xff] %v7437_v37 }
 0x391   : > { %4810 = vmatmul.msk.f32.gmra.mxu0 %vm2601_vm3, %v2516_v35  ;;  %4922 = vmatmul.msk.f32.gmra.mxu1 %vm2601_vm3, %v2516_v35  ;;  %v7450_v35 = vld [vmem:[%s5669_s18 + $0x470] sm:$0xff] }
 0x393   : > { %1734 = vrot.lane.b32.xlu1 %v6837_v43, %s5246_s20  ;;  %1318 = vrot.lane.b32.xlu2 %v7101_v54, %s5245_s19  ;;  %v7413_v57 = vpop.f32.mrf.mxu0  ;;  %v4449_v43 = vld [vmem:[%s9457_s4 + $0x50] sm:$0xff] }
 0x394   : > { %1382 = vrot.lane.b32.xlu0 %v6811_v61, %s5245_s19  ;;  %9603 = vst [vmem:[#allocation57_spill] sm:$0xff] %v7413_v57  ;;  %4525 = vmatpush.msrb.mxu2 %v4449_v43  ;;  %v5164_v57 = vld [vmem:[%s5669_s18 + $0x300] sm:$0xff] }
 0x395   : > { %v1721_v59 = vpop.permute.xlu1 %1720  ;;  %v2011_v52 = vpop.permute.xlu2 %2010 }
 0x396   : > { %v1369_v15 = vpop.permute.xlu0 %1368 }
 0x397   : > { %v2323_v54 = vsel %vm2236_vm0, %v5129_v20, %v1369_v15  ;;  %v5132_v20 = vld [vmem:[%s5669_s18 + $0x1b8] sm:$0xff] }
 0x39b   : > { %1670 = vrot.lane.b32.xlu1 %v6814_v16, %s5246_s20  ;;  %2022 = vrot.lane.b32.xlu2 %v6811_v61, %s5247_s26  ;;  %v2436_v16 = vsel %vm2349_vm1, %v2323_v54, %v1721_v59  ;;  %v7439_v12 = vpop.f32.mrf.mxu0  ;;  %v2292_v54 = vsel %vm2236_vm0, %v5132_v20, %v1307_v60 }
 0x39c   : > { %2086 = vrot.lane.b32.xlu0 %v7416_v32, %s5247_s26  ;;  %9605 = vst [vmem:[#allocation59_spill] sm:$0xff] %v7439_v12  ;;  %v1072_v12 = vld [vmem:[%s5669_s18 + $0x4a0] sm:$0xff] }
 0x39d   : > { %v1657_v36 = vpop.permute.xlu1 %1656  ;;  %v1309_v61 = vpop.permute.xlu2 %1308 }
 0x39e   : > { %v2073_v26 = vpop.permute.xlu0 %2072  ;;  %v2404_v51 = vsel %vm2349_vm1, %v2291_v40, %v1657_v36 }
 0x39f   : > { %v2549_v24 = vsel %vm2462_vm2, %v2436_v16, %v2073_v26  ;;  %v2517_v31 = vsel %vm2462_vm2, %v2404_v51, %v2009_v18  ;;  %v7473_v51 = vpop.f32.mrf.mxu1 }
 0x3a0   : > { %4843 = vmatmul.msk.f32.gmra.mxu3 %vm2601_vm3, %v2549_v24  ;;  %4955 = vmatmul.msk.f32.gmra.mxu2 %vm2601_vm3, %v2549_v24  ;;  %9607 = vst [vmem:[#allocation61_spill] sm:$0xff] %v7473_v51 }
 0x3a1   : > { %4811 = vmatmul.msk.f32.gmra.mxu0 %vm2601_vm3, %v2517_v31  ;;  %4923 = vmatmul.msk.f32.gmra.mxu1 %vm2601_vm3, %v2517_v31  ;;  %v7486_v31 = vld [vmem:[%s5669_s18 + $0x478] sm:$0xff] }
 0x3a3   : > { %1736 = vrot.lane.b32.xlu1 %v6877_v33, %s5246_s20  ;;  %1320 = vrot.lane.b32.xlu2 %v7135_v9, %s5245_s19  ;;  %v7456_v15 = vpop.f32.mrf.mxu0  ;;  %v5131_v33 = vld [vmem:[%s5669_s18 + $0x2b8] sm:$0xff]  ;;  %v4460_v9 = vld [vmem:[%s9457_s4 + $0xa8] sm:$0xff] }
 0x3a4   : > { %1384 = vrot.lane.b32.xlu0 %v6857_v2, %s5245_s19  ;;  %9606 = vst [vmem:[#allocation60_spill] sm:$0xff] %v7456_v15  ;;  %4595 = vmatpush.msrb.mxu3 %v4460_v9 }
 0x3a5   : > { %v1723_v18 = vpop.permute.xlu1 %1722  ;;  %v2013_v59 = vpop.permute.xlu2 %2012 }
 0x3a6   : > { %v1371_v4 = vpop.permute.xlu0 %1370 }
 0x3a7   : > { %v2324_v43 = vsel %vm2236_vm0, %v5131_v33, %v1371_v4  ;;  %v5133_v33 = vld [vmem:[%s5669_s18 + $0x2c0] sm:$0xff] }
 0x3a8   : > { %v2437_v40 = vsel %vm2349_vm1, %v2324_v43, %v1723_v18 }
 0x3ab   : > { %1672 = vrot.lane.b32.xlu1 %v6860_v6, %s5246_s20  ;;  %2024 = vrot.lane.b32.xlu2 %v6857_v2, %s5247_s26  ;;  %v7481_v60 = vpop.f32.mrf.mxu0 }
 0x3ac   : > { %2088 = vrot.lane.b32.xlu0 %v7450_v35, %s5247_s26  ;;  %9608 = vst [vmem:[#allocation62_spill] sm:$0xff] %v7481_v60 }
 0x3ad   : > { %v1659_v6 = vpop.permute.xlu1 %1658  ;;  %v1311_v2 = vpop.permute.xlu2 %1310 }
 0x3ae   : > { %v2075_v50 = vpop.permute.xlu0 %2074  ;;  %v2405_v36 = vsel %vm2349_vm1, %v2292_v54, %v1659_v6 }
 0x3af   : > { %v2550_v26 = vsel %vm2462_vm2, %v2437_v40, %v2075_v50  ;;  %v2518_v16 = vsel %vm2462_vm2, %v2405_v36, %v2011_v52 }
 0x3b0   : > { %4844 = vmatmul.msk.f32.gmra.mxu3 %vm2601_vm3, %v2550_v26  ;;  %4956 = vmatmul.msk.f32.gmra.mxu2 %vm2601_vm3, %v2550_v26  ;;  %v1068_v26 = vld [vmem:[%s5669_s18 + $0x480] sm:$0xff] }
 0x3b1   : > { %4812 = vmatmul.msk.f32.gmra.mxu0 %vm2601_vm3, %v2518_v16  ;;  %4924 = vmatmul.msk.f32.gmra.mxu1 %vm2601_vm3, %v2518_v16  ;;  %v5135_v16 = vld [vmem:[%s5669_s18 + $0x380] sm:$0xff] }
 0x3b3   : > { %1738 = vrot.lane.b32.xlu1 %v6923_v1, %s5246_s20  ;;  %1322 = vrot.lane.b32.xlu2 %v7174_v45, %s5245_s19  ;;  %v7492_v1 = vpop.f32.mrf.mxu2  ;;  %v7494_v4 = vpop.f32.mrf.mxu0  ;;  %v4448_v45 = vld [vmem:[%s9457_s4 + $0x48] sm:$0xff] }
 0x3b4   : > { %1386 = vrot.lane.b32.xlu0 %v6897_v49, %s5245_s19  ;;  %9609 = vst [vmem:[#allocation63_spill] sm:$0xff] %v7492_v1  ;;  %4526 = vmatpush.msrb.mxu2 %v4448_v45  ;;  %v9701_v1 = vld [vmem:[#allocation45_spill] sm:$0xff] }
 0x3b5   : > { %v1725_v52 = vpop.permute.xlu1 %1724  ;;  %v2015_v18 = vpop.permute.xlu2 %2014  ;;  %9610 = vst [vmem:[#allocation64_spill] sm:$0xff] %v7494_v4 }
 0x3b6   : > { %v1373_v24 = vpop.permute.xlu0 %1372 }
 0x3b7   : > { %v2325_v43 = vsel %vm2236_vm0, %v5133_v33, %v1373_v24 }
 0x3b8   : > { %v2438_v6 = vsel %vm2349_vm1, %v2325_v43, %v1725_v52 }
 0x3bb   : > { %1674 = vrot.lane.b32.xlu1 %v6900_v3, %s5246_s20  ;;  %2026 = vrot.lane.b32.xlu2 %v6897_v49, %s5247_s26  ;;  %v5134_v3 = vld [vmem:[%s5669_s18 + $0x1c0] sm:$0xff]  ;;  %v7525_v52 = vpop.f32.mrf.mxu2  ;;  %v7527_v24 = vpop.f32.mrf.mxu0 }
 0x3bc   : > { %2090 = vrot.lane.b32.xlu0 %v7486_v31, %s5247_s26  ;;  %v2293_v9 = vsel %vm2236_vm0, %v5134_v3, %v1309_v61  ;;  %v7514_v61 = vpop.f32.mrf.mxu1  ;;  %9613 = vst [vmem:[#allocation67_spill] sm:$0xff] %v7525_v52  ;;  %v1069_v3 = vld [vmem:[%s5669_s18 + $0x488] sm:$0xff]  ;;  %v9700_v52 = vld [vmem:[#allocation44_spill] sm:$0xff] }
 0x3bd   : > { %v1661_v20 = vpop.permute.xlu1 %1660  ;;  %v7511_v49 = vpop.permute.xlu2 %1312  ;;  %9611 = vst [vmem:[#allocation65_spill] sm:$0xff] %v7514_v61 }
 0x3be   : > { %v2077_v54 = vpop.permute.xlu0 %2076  ;;  %v2406_v50 = vsel %vm2349_vm1, %v2293_v9, %v1661_v20  ;;  %9614 = vst [vmem:[#allocation68_spill] sm:$0xff] %v7527_v24  ;;  %v5136_v9 = vld [vmem:[%s5669_s18 + $0x388] sm:$0xff]  ;;  %v1070_v24 = vld [vmem:[%s5669_s18 + $0x490] sm:$0xff] }
 0x3bf   : > { %v2551_v40 = vsel %vm2462_vm2, %v2438_v6, %v2077_v54  ;;  %v2519_v36 = vsel %vm2462_vm2, %v2406_v50, %v2013_v59  ;;  %v7523_v59 = vpop.f32.mrf.mxu3  ;;  %v4447_v54 = vld [vmem:[%s9457_s4 + $0x40] sm:$0xff] }
 0x3c0   : > { %4845 = vmatmul.msk.f32.gmra.mxu3 %vm2601_vm3, %v2551_v40  ;;  %4957 = vmatmul.msk.f32.gmra.mxu2 %vm2601_vm3, %v2551_v40  ;;  %9612 = vst [vmem:[#allocation66_spill] sm:$0xff] %v7523_v59 }
 0x3c1   : > { %4813 = vmatmul.msk.f32.gmra.mxu0 %vm2601_vm3, %v2519_v36  ;;  %4925 = vmatmul.msk.f32.gmra.mxu1 %vm2601_vm3, %v2519_v36  ;;  %v5138_v36 = vld [vmem:[%s5669_s18 + $0x1c8] sm:$0xff] }
 0x3c2   : > { %4527 = vmatpush.msrb.mxu2 %v4447_v54 }
 0x3c3   : > { %1740 = vrot.lane.b32.xlu1 %v6956_v47, %s5246_s20  ;;  %2092 = vrot.lane.b32.xlu2 %v1068_v26, %s5247_s26  ;;  %v5137_v47 = vld [vmem:[%s5669_s18 + $0x2c8] sm:$0xff]  ;;  %v7542_v50 = vpop.f32.mrf.mxu2  ;;  %v7544_v40 = vpop.f32.mrf.mxu0 }
 0x3c4   : > { %1388 = vrot.lane.b32.xlu0 %v5135_v16, %s5245_s19  ;;  %9616 = vst [vmem:[#allocation70_spill] sm:$0xff] %v7542_v50 }
 0x3c5   : > { %v1727_v33 = vpop.permute.xlu1 %1726  ;;  %v2017_v45 = vpop.permute.xlu2 %2016 }
 0x3c6   : > { %v1375_v43 = vpop.permute.xlu0 %1374 }
 0x3c7   : > { %v2326_v20 = vsel %vm2236_vm0, %v5137_v47, %v1375_v43  ;;  %v7540_v6 = vpop.f32.mrf.mxu3 }
 0x3c8   : > { %9615 = vst [vmem:[#allocation69_spill] sm:$0xff] %v7540_v6  ;;  %v2439_v16 = vsel %vm2349_vm1, %v2326_v20, %v1727_v33  ;;  %v5139_v33 = vld [vmem:[%s5669_s18 + $0x390] sm:$0xff] }
 0x3cb   : > { %1742 = vrot.lane.b32.xlu1 %v6990_v28, %s5246_s20  ;;  %2094 = vrot.lane.b32.xlu2 %v1069_v3, %s5247_s26  ;;  %v2294_v28 = vsel %vm2236_vm0, %v5138_v36, %v1311_v2  ;;  %v7557_v2 = vpop.f32.mrf.mxu1  ;;  %v7568_v20 = vpop.f32.mrf.mxu2 }
 0x3cc   : > { %1390 = vrot.lane.b32.xlu0 %v5136_v9, %s5245_s19  ;;  %9617 = vst [vmem:[#allocation71_spill] sm:$0xff] %v7557_v2  ;;  %v7570_v36 = vpop.f32.mrf.mxu0 }
 0x3cd   : > { %v1663_v26 = vpop.permute.xlu1 %1662  ;;  %v7554_v54 = vpop.permute.xlu2 %1314  ;;  %9619 = vst [vmem:[#allocation73_spill] sm:$0xff] %v7568_v20 }
 0x3ce   : > { %v2079_v43 = vpop.permute.xlu0 %2078  ;;  %v2407_v3 = vsel %vm2349_vm1, %v2294_v28, %v1663_v26 }
 0x3cf   : > { %v2552_v9 = vsel %vm2462_vm2, %v2439_v16, %v2079_v43  ;;  %v2520_v47 = vsel %vm2462_vm2, %v2407_v3, %v2015_v18  ;;  %v7566_v18 = vpop.f32.mrf.mxu3  ;;  %v1071_v43 = vld [vmem:[%s5669_s18 + $0x498] sm:$0xff] }
 0x3d0   : > { %4846 = vmatmul.msk.f32.gmra.mxu3 %vm2601_vm3, %v2552_v9  ;;  %4958 = vmatmul.msk.f32.gmra.mxu2 %vm2601_vm3, %v2552_v9  ;;  %9618 = vst [vmem:[#allocation72_spill] sm:$0xff] %v7566_v18  ;;  %v5140_v3 = vld [vmem:[%s5669_s18 + $0x398] sm:$0xff]  ;;  %v4459_v9 = vld [vmem:[%s9457_s4 + $0xa0] sm:$0xff] }
 0x3d1   : > { %4814 = vmatmul.msk.f32.gmra.mxu0 %vm2601_vm3, %v2520_v47  ;;  %4926 = vmatmul.msk.f32.gmra.mxu1 %vm2601_vm3, %v2520_v47 }
 0x3d2   : > { %4596 = vmatpush.msrb.mxu3 %v4459_v9 }
 0x3d3   : > { %1744 = vrot.lane.b32.xlu1 %v7024_v11, %s5246_s20  ;;  %2096 = vrot.lane.b32.xlu2 %v1070_v24, %s5247_s26  ;;  %v5141_v11 = vld [vmem:[%s5669_s18 + $0x2d0] sm:$0xff] }
 0x3d4   : > { %1392 = vrot.lane.b32.xlu0 %v5139_v33, %s5245_s19  ;;  %v7585_v33 = vpop.f32.mrf.mxu2  ;;  %v7587_v4 = vpop.f32.mrf.mxu0 }
 0x3d5   : > { %v1729_v28 = vpop.permute.xlu1 %1728  ;;  %v2019_v16 = vpop.permute.xlu2 %2018  ;;  %9621 = vst [vmem:[#allocation75_spill] sm:$0xff] %v7585_v33 }
 0x3d6   : > { %v1377_v26 = vpop.permute.xlu0 %1376 }
 0x3d7   : > { %v2327_v24 = vsel %vm2236_vm0, %v5141_v11, %v1377_v26  ;;  %v7583_v47 = vpop.f32.mrf.mxu3 }
 0x3d8   : > { %9620 = vst [vmem:[#allocation74_spill] sm:$0xff] %v7583_v47 }
 0x3db   : > { %1746 = vrot.lane.b32.xlu1 %v7058_v14, %s5246_s20  ;;  %2098 = vrot.lane.b32.xlu2 %v1071_v43, %s5247_s26  ;;  %v2440_v43 = vsel %vm2349_vm1, %v2327_v24, %v1729_v28  ;;  %v5143_v28 = vld [vmem:[%s5669_s18 + $0x3a0] sm:$0xff] }
 0x3dc   : > { %1394 = vrot.lane.b32.xlu0 %v5140_v3, %s5245_s19  ;;  %v5142_v3 = vld [vmem:[%s5669_s18 + $0x1d0] sm:$0xff] }
 0x3dd   : > { %v2295_v14 = vsel %vm2236_vm0, %v5142_v3, %v7511_v49  ;;  %v1665_v26 = vpop.permute.xlu1 %1664  ;;  %v7598_v9 = vpop.permute.xlu2 %1316 }
 0x3de   : > { %v2081_v11 = vpop.permute.xlu0 %2080  ;;  %v2408_v60 = vsel %vm2349_vm1, %v2295_v14, %v1665_v26  ;;  %v7601_v49 = vpop.f32.mrf.mxu1  ;;  %v1073_v26 = vld [vmem:[%s5669_s18 + $0x4a8] sm:$0xff] }
 0x3df   : > { %v2553_v15 = vsel %vm2462_vm2, %v2440_v43, %v2081_v11  ;;  %v2521_v47 = vsel %vm2462_vm2, %v2408_v60, %v2017_v45  ;;  %9622 = vst [vmem:[#allocation76_spill] sm:$0xff] %v7601_v49  ;;  %v7612_v60 = vpop.f32.mrf.mxu2  ;;  %v7614_v45 = vpop.f32.mrf.mxu0  ;;  %v4446_v43 = vld [vmem:[%s9457_s4 + $0x38] sm:$0xff] }
 0x3e0   : > { %4847 = vmatmul.msk.f32.gmra.mxu3 %vm2601_vm3, %v2553_v15  ;;  %4959 = vmatmul.msk.f32.gmra.mxu2 %vm2601_vm3, %v2553_v15  ;;  %v7610_v15 = vpop.f32.mrf.mxu3  ;;  %9624 = vst [vmem:[#allocation78_spill] sm:$0xff] %v7612_v60 }
 0x3e1   : > { %4815 = vmatmul.msk.f32.gmra.mxu0 %vm2601_vm3, %v2521_v47  ;;  %4927 = vmatmul.msk.f32.gmra.mxu1 %vm2601_vm3, %v2521_v47  ;;  %9623 = vst [vmem:[#allocation77_spill] sm:$0xff] %v7610_v15  ;;  %v5144_v47 = vld [vmem:[%s5669_s18 + $0x3a8] sm:$0xff] }
 0x3e2   : > { %4528 = vmatpush.msrb.mxu2 %v4446_v43 }
 0x3e3   : > { %1748 = vrot.lane.b32.xlu1 %v7092_v29, %s5246_s20  ;;  %2100 = vrot.lane.b32.xlu2 %v1072_v12, %s5247_s26  ;;  %v5145_v29 = vld [vmem:[%s5669_s18 + $0x2d8] sm:$0xff] }
 0x3e4   : > { %1396 = vrot.lane.b32.xlu0 %v5143_v28, %s5245_s19 }
 0x3e5   : > { %v1731_v24 = vpop.permute.xlu1 %1730  ;;  %v2021_v14 = vpop.permute.xlu2 %2020 }
 0x3e6   : > { %v1379_v3 = vpop.permute.xlu0 %1378 }
 0x3e7   : > { %v2328_v12 = vsel %vm2236_vm0, %v5145_v29, %v1379_v3  ;;  %v7629_v28 = vpop.f32.mrf.mxu2  ;;  %v7631_v15 = vpop.f32.mrf.mxu0 }
 0x3e8   : > { %v7627_v11 = vpop.f32.mrf.mxu3  ;;  %9626 = vst [vmem:[#allocation80_spill] sm:$0xff] %v7629_v28  ;;  %v2441_v29 = vsel %vm2349_vm1, %v2328_v12, %v1731_v24  ;;  %v1074_v28 = vld [vmem:[%s5669_s18 + $0x4b0] sm:$0xff] }
 0x3e9   : > { %9625 = vst [vmem:[#allocation79_spill] sm:$0xff] %v7627_v11  ;;  %v5147_v24 = vld [vmem:[%s5669_s18 + $0x3b0] sm:$0xff] }
 0x3ea   : > { %9627 = vst [vmem:[#allocation81_spill] sm:$0xff] %v7631_v15 }
 0x3eb   : > { %1750 = vrot.lane.b32.xlu1 %v7128_v13, %s5246_s20  ;;  %2102 = vrot.lane.b32.xlu2 %v1073_v26, %s5247_s26 }
 0x3ec   : > { %1398 = vrot.lane.b32.xlu0 %v5144_v47, %s5245_s19  ;;  %v5146_v47 = vld [vmem:[%s5669_s18 + $0x1d8] sm:$0xff] }
 0x3ed   : > { %v2296_v13 = vsel %vm2236_vm0, %v5146_v47, %v7554_v54  ;;  %v1667_v3 = vpop.permute.xlu1 %1666  ;;  %v7642_v43 = vpop.permute.xlu2 %1318 }
 0x3ee   : > { %v2083_v60 = vpop.permute.xlu0 %2082  ;;  %v2409_v33 = vsel %vm2349_vm1, %v2296_v13, %v1667_v3  ;;  %v7645_v54 = vpop.f32.mrf.mxu1  ;;  %v1075_v3 = vld [vmem:[%s5669_s18 + $0x4b8] sm:$0xff] }
 0x3ef   : > { %v2554_v26 = vsel %vm2462_vm2, %v2441_v29, %v2083_v60  ;;  %v2522_v11 = vsel %vm2462_vm2, %v2409_v33, %v2019_v16  ;;  %9628 = vst [vmem:[#allocation82_spill] sm:$0xff] %v7645_v54  ;;  %v7656_v33 = vpop.f32.mrf.mxu2  ;;  %v7658_v60 = vpop.f32.mrf.mxu0  ;;  %v4445_v29 = vld [vmem:[%s9457_s4 + $0x30] sm:$0xff] }
 0x3f0   : > { %4848 = vmatmul.msk.f32.gmra.mxu3 %vm2601_vm3, %v2554_v26  ;;  %4960 = vmatmul.msk.f32.gmra.mxu2 %vm2601_vm3, %v2554_v26  ;;  %v7654_v16 = vpop.f32.mrf.mxu3  ;;  %9630 = vst [vmem:[#allocation84_spill] sm:$0xff] %v7656_v33 }
 0x3f1   : > { %4816 = vmatmul.msk.f32.gmra.mxu0 %vm2601_vm3, %v2522_v11  ;;  %4928 = vmatmul.msk.f32.gmra.mxu1 %vm2601_vm3, %v2522_v11  ;;  %9629 = vst [vmem:[#allocation83_spill] sm:$0xff] %v7654_v16  ;;  %v5148_v11 = vld [vmem:[%s5669_s18 + $0x3b8] sm:$0xff] }
 0x3f2   : > { %9631 = vst [vmem:[#allocation85_spill] sm:$0xff] %v7658_v60  ;;  %4529 = vmatpush.msrb.mxu2 %v4445_v29 }
 0x3f3   : > { %1752 = vrot.lane.b32.xlu1 %v7162_v34, %s5246_s20  ;;  %2104 = vrot.lane.b32.xlu2 %v1074_v28, %s5247_s26  ;;  %v5149_v34 = vld [vmem:[%s5669_s18 + $0x2e0] sm:$0xff] }
 0x3f4   : > { %1400 = vrot.lane.b32.xlu0 %v5147_v24, %s5245_s19 }
 0x3f5   : > { %v1733_v12 = vpop.permute.xlu1 %1732  ;;  %v2023_v13 = vpop.permute.xlu2 %2022 }
 0x3f6   : > { %v1381_v47 = vpop.permute.xlu0 %1380 }
 0x3f7   : > { %v2329_v28 = vsel %vm2236_vm0, %v5149_v34, %v1381_v47  ;;  %v7673_v24 = vpop.f32.mrf.mxu2  ;;  %v7675_v33 = vpop.f32.mrf.mxu0 }
 0x3f8   : > { %v7671_v26 = vpop.f32.mrf.mxu3  ;;  %9633 = vst [vmem:[#allocation87_spill] sm:$0xff] %v7673_v24  ;;  %v1076_v24 = vld [vmem:[%s5669_s18 + $0x4c0] sm:$0xff] }
 0x3f9   : > { %9632 = vst [vmem:[#allocation86_spill] sm:$0xff] %v7671_v26 }
 0x3fa   : > { %9634 = vst [vmem:[#allocation88_spill] sm:$0xff] %v7675_v33 }
 0x3fb   : > { %1754 = vrot.lane.b32.xlu1 %v7204_v44, %s5246_s20  ;;  %2106 = vrot.lane.b32.xlu2 %v1075_v3, %s5247_s26  ;;  %v2442_v3 = vsel %vm2349_vm1, %v2329_v28, %v1733_v12  ;;  %v5151_v12 = vld [vmem:[%s5669_s18 + $0x3c0] sm:$0xff] }
 0x3fc   : > { %1402 = vrot.lane.b32.xlu0 %v5148_v11, %s5245_s19  ;;  %v5150_v11 = vld [vmem:[%s5669_s18 + $0x1e0] sm:$0xff] }
 0x3fd   : > { %v2297_v44 = vsel %vm2236_vm0, %v5150_v11, %v7598_v9  ;;  %v1669_v47 = vpop.permute.xlu1 %1668  ;;  %v7686_v29 = vpop.permute.xlu2 %1320 }
 0x3fe   : > { %v2085_v34 = vpop.permute.xlu0 %2084  ;;  %v2410_v16 = vsel %vm2349_vm1, %v2297_v44, %v1669_v47  ;;  %v7689_v9 = vpop.f32.mrf.mxu1  ;;  %v4458_v47 = vld [vmem:[%s9457_s4 + $0x98] sm:$0xff] }
 0x3ff   : > { %v2555_v60 = vsel %vm2462_vm2, %v2442_v3, %v2085_v34  ;;  %v2523_v26 = vsel %vm2462_vm2, %v2410_v16, %v2021_v14  ;;  %9635 = vst [vmem:[#allocation89_spill] sm:$0xff] %v7689_v9  ;;  %v7700_v16 = vpop.f32.mrf.mxu2  ;;  %v5152_v3 = vld [vmem:[%s5669_s18 + $0x3c8] sm:$0xff]  ;;  %4597 = vmatpush.msrb.mxu3 %v4458_v47 }
 0x400   : > { %4849 = vmatmul.msk.f32.gmra.mxu3 %vm2601_vm3, %v2555_v60  ;;  %4961 = vmatmul.msk.f32.gmra.mxu2 %vm2601_vm3, %v2555_v60  ;;  %v7698_v14 = vpop.f32.mrf.mxu3  ;;  %9637 = vst [vmem:[#allocation91_spill] sm:$0xff] %v7700_v16  ;;  %v7702_v60 = vpop.f32.mrf.mxu0 }
 0x401   : > { %4817 = vmatmul.msk.f32.gmra.mxu0 %vm2601_vm3, %v2523_v26  ;;  %4929 = vmatmul.msk.f32.gmra.mxu1 %vm2601_vm3, %v2523_v26  ;;  %9636 = vst [vmem:[#allocation90_spill] sm:$0xff] %v7698_v14  ;;  %v1077_v26 = vld [vmem:[%s5669_s18 + $0x4c8] sm:$0xff] }
 0x402   : > { %9638 = vst [vmem:[#allocation92_spill] sm:$0xff] %v7702_v60  ;;  %v5154_v14 = vld [vmem:[%s5669_s18 + $0x1e8] sm:$0xff] }
 0x403   : > { %1756 = vrot.lane.b32.xlu1 %v7240_v41, %s5246_s20  ;;  %2108 = vrot.lane.b32.xlu2 %v1076_v24, %s5247_s26  ;;  %v5153_v41 = vld [vmem:[%s5669_s18 + $0x2e8] sm:$0xff] }
 0x404   : > { %1404 = vrot.lane.b32.xlu0 %v5151_v12, %s5245_s19 }
 0x405   : > { %v1735_v28 = vpop.permute.xlu1 %1734  ;;  %v2025_v44 = vpop.permute.xlu2 %2024 }
 0x406   : > { %v1383_v11 = vpop.permute.xlu0 %1382 }
 0x407   : > { %v2330_v24 = vsel %vm2236_vm0, %v5153_v41, %v1383_v11  ;;  %v7717_v12 = vpop.f32.mrf.mxu2 }
 0x408   : > { %v7715_v34 = vpop.f32.mrf.mxu3  ;;  %9640 = vst [vmem:[#allocation94_spill] sm:$0xff] %v7717_v12  ;;  %v7719_v16 = vpop.f32.mrf.mxu0  ;;  %v1078_v12 = vld [vmem:[%s5669_s18 + $0x4d0] sm:$0xff] }
 0x409   : > { %9639 = vst [vmem:[#allocation93_spill] sm:$0xff] %v7715_v34 }
 0x40a   : > { %9641 = vst [vmem:[#allocation95_spill] sm:$0xff] %v7719_v16 }
 0x40b   : > { %1758 = vrot.lane.b32.xlu1 %v7271_v42, %s5246_s20  ;;  %2110 = vrot.lane.b32.xlu2 %v1077_v26, %s5247_s26  ;;  %v2443_v42 = vsel %vm2349_vm1, %v2330_v24, %v1735_v28 }
 0x40c   : > { %1406 = vrot.lane.b32.xlu0 %v5152_v3, %s5245_s19  ;;  %v2298_v3 = vsel %vm2236_vm0, %v5154_v14, %v7642_v43  ;;  %v7733_v43 = vpop.f32.mrf.mxu1  ;;  %v5155_v14 = vld [vmem:[%s5669_s18 + $0x3d0] sm:$0xff] }
 0x40d   : > { %v1671_v60 = vpop.permute.xlu1 %1670  ;;  %v7730_v41 = vpop.permute.xlu2 %1322  ;;  %9642 = vst [vmem:[#allocation96_spill] sm:$0xff] %v7733_v43 }
 0x40e   : > { %v2087_v33 = vpop.permute.xlu0 %2086  ;;  %v2411_v11 = vsel %vm2349_vm1, %v2298_v3, %v1671_v60 }
 0x40f   : > { %v2556_v47 = vsel %vm2462_vm2, %v2443_v42, %v2087_v33  ;;  %v2524_v26 = vsel %vm2462_vm2, %v2411_v11, %v2023_v13  ;;  %v7744_v13 = vpop.f32.mrf.mxu2  ;;  %v1079_v42 = vld [vmem:[%s5669_s18 + $0x4d8] sm:$0xff] }
 0x410   : > { %4850 = vmatmul.msk.f32.gmra.mxu3 %vm2601_vm3, %v2556_v47  ;;  %4962 = vmatmul.msk.f32.gmra.mxu2 %vm2601_vm3, %v2556_v47  ;;  %v7742_v33 = vpop.f32.mrf.mxu3  ;;  %9644 = vst [vmem:[#allocation98_spill] sm:$0xff] %v7744_v13  ;;  %v7746_v60 = vpop.f32.mrf.mxu0  ;;  %v5156_v11 = vld [vmem:[%s5669_s18 + $0x3d8] sm:$0xff]  ;;  %v4444_v47 = vld [vmem:[%s9457_s4 + $0x28] sm:$0xff] }
 0x411   : > { %4818 = vmatmul.msk.f32.gmra.mxu0 %vm2601_vm3, %v2524_v26  ;;  %4930 = vmatmul.msk.f32.gmra.mxu1 %vm2601_vm3, %v2524_v26  ;;  %9643 = vst [vmem:[#allocation97_spill] sm:$0xff] %v7742_v33 }
 0x412   : > { %9645 = vst [vmem:[#allocation99_spill] sm:$0xff] %v7746_v60  ;;  %4530 = vmatpush.msrb.mxu2 %v4444_v47 }
 0x413   : > { %1760 = vrot.lane.b32.xlu1 %v7310_v55, %s5246_s20  ;;  %2112 = vrot.lane.b32.xlu2 %v1078_v12, %s5247_s26  ;;  %v5157_v55 = vld [vmem:[%s5669_s18 + $0x2f0] sm:$0xff] }
 0x414   : > { %1408 = vrot.lane.b32.xlu0 %v5155_v14, %s5245_s19 }
 0x415   : > { %v1737_v28 = vpop.permute.xlu1 %1736  ;;  %v7748_v3 = vpop.permute.xlu2 %2026 }
 0x416   : > { %v1385_v24 = vpop.permute.xlu0 %1384 }
 0x417   : > { %v2331_v12 = vsel %vm2236_vm0, %v5157_v55, %v1385_v24  ;;  %v7763_v14 = vpop.f32.mrf.mxu2 }
 0x418   : > { %v7761_v26 = vpop.f32.mrf.mxu3  ;;  %9647 = vst [vmem:[#allocation101_spill] sm:$0xff] %v7763_v14  ;;  %v7765_v13 = vpop.f32.mrf.mxu0  ;;  %v2444_v55 = vsel %vm2349_vm1, %v2331_v12, %v1737_v28  ;;  %v1080_v14 = vld [vmem:[%s5669_s18 + $0x4e0] sm:$0xff] }
 0x419   : > { %9646 = vst [vmem:[#allocation100_spill] sm:$0xff] %v7761_v26  ;;  %v5159_v28 = vld [vmem:[%s5669_s18 + $0x3e0] sm:$0xff] }
 0x41a   : > { %9648 = vst [vmem:[#allocation102_spill] sm:$0xff] %v7765_v13 }
 0x41b   : > { %1762 = vrot.lane.b32.xlu1 %v7344_v17, %s5246_s20  ;;  %2114 = vrot.lane.b32.xlu2 %v1079_v42, %s5247_s26 }
 0x41c   : > { %1410 = vrot.lane.b32.xlu0 %v5156_v11, %s5245_s19  ;;  %v5158_v11 = vld [vmem:[%s5669_s18 + $0x1f0] sm:$0xff] }
 0x41d   : > { %v2299_v17 = vsel %vm2236_vm0, %v5158_v11, %v7686_v29  ;;  %v1673_v24 = vpop.permute.xlu1 %1672  ;;  %v7776_v47 = vpop.permute.xlu2 %2092 }
 0x41e   : > { %v2089_v33 = vpop.permute.xlu0 %2088  ;;  %v2412_v34 = vsel %vm2349_vm1, %v2299_v17, %v1673_v24  ;;  %v7779_v29 = vpop.f32.mrf.mxu1  ;;  %v1081_v24 = vld [vmem:[%s5669_s18 + $0x4e8] sm:$0xff] }
 0x41f   : > { %v2557_v42 = vsel %vm2462_vm2, %v2444_v55, %v2089_v33  ;;  %v2525_v26 = vsel %vm2462_vm2, %v2412_v34, %v2025_v44  ;;  %9649 = vst [vmem:[#allocation103_spill] sm:$0xff] %v7779_v29  ;;  %v7790_v34 = vpop.f32.mrf.mxu2  ;;  %v5160_v55 = vld [vmem:[%s5669_s18 + $0x3e8] sm:$0xff] }
 0x420   : > { %4851 = vmatmul.msk.f32.gmra.mxu3 %vm2601_vm3, %v2557_v42  ;;  %4963 = vmatmul.msk.f32.gmra.mxu2 %vm2601_vm3, %v2557_v42  ;;  %v7788_v44 = vpop.f32.mrf.mxu3  ;;  %9651 = vst [vmem:[#allocation105_spill] sm:$0xff] %v7790_v34  ;;  %v7792_v33 = vpop.f32.mrf.mxu0  ;;  %v4443_v34 = vld [vmem:[%s9457_s4 + $0x20] sm:$0xff] }
 0x421   : > { %4819 = vmatmul.msk.f32.gmra.mxu0 %vm2601_vm3, %v2525_v26  ;;  %4931 = vmatmul.msk.f32.gmra.mxu1 %vm2601_vm3, %v2525_v26  ;;  %9650 = vst [vmem:[#allocation104_spill] sm:$0xff] %v7788_v44  ;;  %v2595_v26 = vld [vmem:[%s9455_s2] sm:$0x3] }
 0x422   : > { %9652 = vst [vmem:[#allocation106_spill] sm:$0xff] %v7792_v33  ;;  %4531 = vmatpush.msrb.mxu2 %v4443_v34  ;;  %v7825_v60 = vperm.slane %v2595_v26, 0 }
 0x423   : > { %1764 = vrot.lane.b32.xlu1 %v7377_v19, %s5246_s20  ;;  %2116 = vrot.lane.b32.xlu2 %v1080_v14, %s5247_s26  ;;  %v7804_v19 = vperm.slane %v2595_v26, 1  ;;  %v5161_v14 = vld [vmem:[%s5669_s18 + $0x2f8] sm:$0xff]  ;;  %v1082_v26 = vld [vmem:[%s5669_s18 + $0x4f0] sm:$0xff] }
 0x424   : > { %1412 = vrot.lane.b32.xlu0 %v5159_v28, %s5245_s19  ;;  %v4457_v28 = vld [vmem:[%s9457_s4 + $0x90] sm:$0xff]  ;;  %v3004_v0 = vadd.f32 %v9700_v52, %v7825_v60  ;;  %v9703_v52 = vld [vmem:[#allocation38_spill] sm:$0xff] }
 0x425   : > { %v1739_v12 = vpop.permute.xlu1 %1738  ;;  %v7797_v17 = vpop.permute.xlu2 %2094  ;;  %4598 = vmatpush.msrb.mxu3 %v4457_v28  ;;  %v2995_v37 = vadd.f32 %v9703_v52, %v7825_v60 }
 0x426   : > { %v1387_v11 = vpop.permute.xlu0 %1386  ;;  %v3676_v52 = vmax.f32 %v3004_v0, 0.0 }
 0x427   : > { %v2332_v42 = vsel %vm2236_vm0, %v5161_v14, %v1387_v11  ;;  %v5162_v11 = vld [vmem:[%s5669_s18 + $0x1f8] sm:$0xff] }
 0x428   : > { %v7815_v44 = vpop.f32.mrf.mxu3  ;;  %v2445_v33 = vsel %vm2349_vm1, %v2332_v42, %v1739_v12 }
 0x429   : > { %9653 = vst [vmem:[#allocation107_spill] sm:$0xff] %v7815_v44  ;;  %v9656_v44 = vld [vmem:[#allocation10_spill] sm:$0xff] }
 0x42a   : > { %v3309_v28 = vadd.f32 %v9656_v44, %v7804_v19  ;;  %v9657_v44 = vld [vmem:[#allocation14_spill] sm:$0xff] }
 0x42b   : > { %1766 = vrot.lane.b32.xlu1 %v7416_v32, %s5246_s20  ;;  %2118 = vrot.lane.b32.xlu2 %v1081_v24, %s5247_s26  ;;  %v7817_v32 = vpop.f32.mrf.mxu2  ;;  %v2300_v24 = vsel %vm2236_vm0, %v5162_v11, %v7730_v41  ;;  %v3312_v42 = vadd.f32 %v9657_v44, %v7804_v19  ;;  %v7843_v11 = vpop.f32.mrf.mxu1  ;;  %v9661_v44 = vld [vmem:[#allocation13_spill] sm:$0xff] }
 0x42c   : > { %1414 = vrot.lane.b32.xlu0 %v5160_v55, %s5245_s19  ;;  %9654 = vst [vmem:[#allocation108_spill] sm:$0xff] %v7817_v32  ;;  %v7819_v55 = vpop.f32.mrf.mxu0 }
 0x42d   : > { %9655 = vst [vmem:[#allocation109_spill] sm:$0xff] %v7819_v55  ;;  %v1675_v14 = vpop.permute.xlu1 %1674  ;;  %v3868_v55 = vld [vmem:[%s9456_s3] sm:$0x3]  ;;  %v7838_v12 = vpop.permute.xlu2 %2096 }
 0x42e   : > { %v2091_v13 = vpop.permute.xlu0 %2090  ;;  %v2413_v34 = vsel %vm2349_vm1, %v2300_v24, %v1675_v14  ;;  %9658 = vst [vmem:[#allocation10_spill] sm:$0xff] %v7843_v11  ;;  %v3645_v14 = vmax.f32 %v3309_v28, 0.0 }
 0x42f   : > { %v2558_v32 = vsel %vm2462_vm2, %v2445_v33, %v2091_v13  ;;  %v2526_v41 = vsel %vm2462_vm2, %v2413_v34, %v7748_v3  ;;  %v9659_v13 = vld [vmem:[#allocation19_spill] sm:$0xff]  ;;  %v5163_v3 = vld [vmem:[%s5669_s18 + $0x3f0] sm:$0xff]  ;;  %v7855_v34 = vperm.slane %v3868_v55, 1 }
 0x430   : > { %4852 = vmatmul.msk.f32.gmra.mxu3 %vm2601_vm3, %v2558_v32  ;;  %4964 = vmatmul.msk.f32.gmra.mxu2 %vm2601_vm3, %v2558_v32  ;;  %v3315_v33 = vadd.f32 %v9659_v13, %v7804_v19  ;;  %v9660_v32 = vld [vmem:[#allocation9_spill] sm:$0xff]  ;;  %v7860_v16 = vpop.f32.mrf.mxu3  ;;  %v3647_v13 = vmax.f32 %v3312_v42, 0.0 }
 0x431   : > { %4820 = vmatmul.msk.f32.gmra.mxu0 %vm2601_vm3, %v2526_v41  ;;  %4932 = vmatmul.msk.f32.gmra.mxu1 %vm2601_vm3, %v2526_v41  ;;  %v2956_v24 = vadd.f32 %v9660_v32, %v7825_v60  ;;  %v2959_v41 = vadd.f32 %v9661_v44, %v7825_v60  ;;  %9662 = vst [vmem:[#allocation14_spill] sm:$0xff] %v7860_v16  ;;  %v7870_v32 = vperm.slane %v3868_v55, 0  ;;  %v9667_v16 = vld [vmem:[#allocation26_spill] sm:$0xff] }
 0x432   : > { %v3911_v42 = vmul.f32 %v7855_v34, %v3645_v14  ;;  %v9669_v55 = vld [vmem:[#allocation30_spill] sm:$0xff] }
 0x433   : > { %1768 = vrot.lane.b32.xlu1 %v7450_v35, %s5246_s20  ;;  %2120 = vrot.lane.b32.xlu2 %v1082_v26, %s5247_s26  ;;  %v9664_v35 = vld [vmem:[#allocation22_spill] sm:$0xff]  ;;  %v7866_v43 = vpop.f32.mrf.mxu2  ;;  %v3649_v26 = vmax.f32 %v3315_v33, 0.0  ;;  %v3644_v44 = vmax.f32 %v2956_v24, 0.0  ;;  %v3646_v20 = vmax.f32 %v2959_v41, 0.0  ;;  %v3324_v21 = vadd.f32 %v9669_v55, %v7804_v19 }
 0x434   : > { %1416 = vrot.lane.b32.xlu0 %v5163_v3, %s5245_s19  ;;  %v9663_v3 = vld [vmem:[#allocation17_spill] sm:$0xff]  ;;  %v3318_v29 = vadd.f32 %v9664_v35, %v7804_v19  ;;  %9665 = vst [vmem:[#allocation19_spill] sm:$0xff] %v7866_v43  ;;  %v7868_v28 = vpop.f32.mrf.mxu0  ;;  %v3913_v24 = vmul.f32 %v7855_v34, %v3647_v13 }
 0x435   : > { %v2962_v11 = vadd.f32 %v9663_v3, %v7825_v60  ;;  %9666 = vst [vmem:[#allocation9_spill] sm:$0xff] %v7868_v28  ;;  %v1741_v9 = vpop.permute.xlu1 %1740  ;;  %v3321_v3 = vadd.f32 %v9667_v16, %v7804_v19  ;;  %v9668_v43 = vld [vmem:[#allocation21_spill] sm:$0xff]  ;;  %v7882_v54 = vpop.permute.xlu2 %2098  ;;  %v3655_v55 = vmax.f32 %v3324_v21, 0.0 }
 0x436   : > { %v1389_v18 = vpop.permute.xlu0 %1388  ;;  %v2965_v28 = vadd.f32 %v9668_v43, %v7825_v60  ;;  %v3651_v49 = vmax.f32 %v3318_v29, 0.0  ;;  %v9670_v43 = vld [vmem:[#allocation25_spill] sm:$0xff] }
 0x437   : > { %v2333_v35 = vsel %vm2236_vm0, %v5164_v57, %v1389_v18  ;;  %v3648_v14 = vmax.f32 %v2962_v11, 0.0  ;;  %v1083_v57 = vld [vmem:[%s5669_s18 + $0x4f8] sm:$0xff]  ;;  %v3915_v18 = vmul.f32 %v7855_v34, %v3649_v26  ;;  %v2968_v41 = vadd.f32 %v9670_v43, %v7825_v60 }
 0x438   : > { %v2446_v33 = vsel %vm2349_vm1, %v2333_v35, %v1741_v9  ;;  %v7896_v9 = vmul.f32 %v7870_v32, %v3644_v44  ;;  %v3653_v29 = vmax.f32 %v3321_v3, 0.0  ;;  %v9672_v11 = vld [vmem:[#allocation29_spill] sm:$0xff]  ;;  %v7908_v26 = vmul.f32 %v7870_v32, %v3646_v20  ;;  %v7910_v44 = vpop.f32.mrf.mxu3 }
 0x439   : > { %v2559_v16 = vsel %vm2462_vm2, %v2446_v33, %v7776_v47  ;;  %4821 = vmatmul.msk.f32.gmra.mxu0 %vm2601_vm3, %v6616_v25  ;;  %v2971_v47 = vadd.f32 %v9672_v11, %v7825_v60  ;;  %v5165_v13 = vld [vmem:[%s5669_s18 + $0x3f8] sm:$0xff]  ;;  %v7905_v25 = vsel %vm4140_vm5, %v3911_v42, -inf  ;;  %v3650_v35 = vmax.f32 %v2965_v28, 0.0  ;;  %9673 = vst [vmem:[#allocation17_spill] sm:$0xff] %v7910_v44  ;;  %v9674_v42 = vld [vmem:[#allocation32_spill] sm:$0xff]  ;;  %v5166_v44 = vld [vmem:[%s5669_s18 + $0x308] sm:$0xff] }
 0x43a   : > { %4853 = vmatmul.msk.f32.gmra.mxu3 %vm2601_vm3, %v2559_v16  ;;  %4965 = vmatmul.msk.f32.gmra.mxu2 %vm2601_vm3, %v2559_v16  ;;  %9671 = vst [vmem:[#allocation13_spill] sm:$0xff] %v7896_v9  ;;  %v7914_v3 = vsel %vm4140_vm5, %v3913_v24, -inf  ;;  %v7917_v33 = vmul.f32 %v7870_v32, %v3648_v14  ;;  %v2974_v16 = vadd.f32 %v9674_v42, %v7825_v60  ;;  %v7925_v21 = vsel %vm4140_vm5, %v3915_v18, -inf  ;;  %v9676_v43 = vld [vmem:[#allocation33_spill] sm:$0xff] }
 0x43b   : > { %1770 = vrot.lane.b32.xlu1 %v7486_v31, %s5246_s20  ;;  %2122 = vrot.lane.b32.xlu2 %v1083_v57, %s5247_s26  ;;  %v3917_v31 = vmul.f32 %v7855_v34, %v3651_v49  ;;  %v7922_v20 = vpop.f32.mrf.mxu2  ;;  %v3652_v28 = vmax.f32 %v2968_v41, 0.0  ;;  %v3327_v57 = vadd.f32 %v9676_v43, %v7804_v19  ;;  %v3330_v24 = vadd.f32 %v6635_v56, %v7804_v19  ;;  %s5004_s20 = sshll.u32 %s4749_s25, 7 }
 0x43c   : > { %1418 = vrot.lane.b32.xlu0 %v5165_v13, %s5245_s19  ;;  %9675 = vst [vmem:[#allocation22_spill] sm:$0xff] %v7922_v20  ;;  %v7931_v11 = vpop.f32.mrf.mxu0  ;;  %v3919_v49 = vmul.f32 %v7855_v34, %v3653_v29  ;;  %v3654_v13 = vmax.f32 %v2971_v47, 0.0  ;;  %v3333_v42 = vadd.f32 %v6671_v22, %v7804_v19  ;;  %v7939_v41 = vmul.f32 %v7870_v32, %v3650_v35  ;;  %s9385_s19 = scalar_lea.vmem [#allocation3], %s4756_s29  ;;  %s4678_s10 = scalar_lea.hbm %s9459_s6, %s5004_s20 }
 0x43d   : > { %9677 = vst [vmem:[#allocation26_spill] sm:$0xff] %v7931_v11  ;;  %v1743_v20 = vpop.permute.xlu1 %1742  ;;  %v3921_v43 = vmul.f32 %v7855_v34, %v3655_v55  ;;  %v3336_v56 = vadd.f32 %v6706_v30, %v7804_v19  ;;  %v7945_v23 = vpop.permute.xlu2 %2100  ;;  %v7948_v29 = vsel %vm4140_vm5, %v3917_v31, -inf  ;;  %v3656_v22 = vmax.f32 %v2974_v16, 0.0  ;;  %s4679_s11 = sshll.u32 %s9385_s19, 4  ;;  %s4681_s12 = sshll.u32 %s4678_s10, 4  ;;  %s4680_s11 = int_to_ptr.vmem [resolvable:$true] %s4679_s11  ;;  %s4682_s12 = int_to_ptr.hbm [resolvable:$true] %s4681_s12 }
 0x43e   : > { %v1391_v14 = vpop.permute.xlu0 %1390  ;;  %v3339_v47 = vadd.f32 %v6742_v53, %v7804_v19  ;;  %v3657_v55 = vmax.f32 %v3327_v57, 0.0  ;;  %v2977_v30 = vadd.f32 %v6626_v46, %v7825_v60  ;;  %v7962_v31 = vsel %vm4140_vm5, %v3919_v49, -inf  ;;  %s5195_s13 = sshra.s32 %s4682_s12, 4  ;;  %s5196_s13 = int_to_ptr.hbm [resolvable:$true] %s5195_s13 }
 0x43f   : > { %v2334_v18 = vsel %vm2236_vm0, %v5166_v44, %v1391_v14  ;;  %v7955_v44 = vmul.f32 %v7870_v32, %v3652_v28  ;;  %9679 = vst [vmem:[#allocation30_spill] sm:$0xff] %v7962_v31  ;;  %v7965_v53 = vmul.f32 %v7870_v32, %v3654_v13  ;;  %v3661_v16 = vmax.f32 %v3333_v42, 0.0  ;;  %v9682_v42 = vld [vmem:[#allocation18_spill] sm:$0xff]  ;;  %s5197_s25 = scalar_lea.hbm %s5196_s13, 128  ;;  %p5202_p2 = scmp.lt.s32.totalorder %s5196_s13, %s9459_s6 }
 0x440   : > { %v2447_v11 = vsel %vm2349_vm1, %v2334_v18, %v1743_v20  ;;  %v3659_v20 = vmax.f32 %v3330_v24, 0.0  ;;  %v7970_v28 = vsel %vm4140_vm5, %v3921_v43, -inf  ;;  %v2983_v46 = vadd.f32 %v6704_v38, %v7825_v60  ;;  %p5198_p13 = scmp.ne.s32.totalorder %s5196_s13, %s5197_s25  ;;  %p5203_p3 = scmp.lt.s32.totalorder %s5201_s17, %s5197_s25 }
 0x441   : > { %v2560_v35 = vsel %vm2462_vm2, %v2447_v11, %v7797_v17  ;;  %9678 = vst [vmem:[#allocation21_spill] sm:$0xff] %v7955_v44  ;;  %v2980_v17 = vadd.f32 %v6667_v39, %v7825_v60  ;;  %v3663_v57 = vmax.f32 %v3336_v56, 0.0  ;;  %v2986_v24 = vadd.f32 %v6740_v58, %v7825_v60  ;;  %v7976_v11 = vpop.f32.mrf.mxu3  ;;  %v9681_v39 = vld [vmem:[#allocation34_spill] sm:$0xff] }
 0x442   : > { %4854 = vmatmul.msk.f32.gmra.mxu3 %vm2601_vm3, %v2560_v35  ;;  %4966 = vmatmul.msk.f32.gmra.mxu2 %vm2601_vm3, %v2560_v35  ;;  %9680 = vst [vmem:[#allocation25_spill] sm:$0xff] %v7976_v11  ;;  %v7979_v14 = vmul.f32 %v7870_v32, %v3656_v22  ;;  %v3665_v49 = vmax.f32 %v3339_v47, 0.0  ;;  %v2989_v13 = vadd.f32 %v9681_v39, %v7825_v60  ;;  %v3658_v56 = vmax.f32 %v2977_v30, 0.0  ;;  %v9684_v35 = vld [vmem:[#allocation35_spill] sm:$0xff]  ;;  %p5199_p0 = pnand %p5198_p13, %p5323_p6  ;;  %p5204_p4 = por %p5203_p3, %p5202_p2 }
 0x443   : > { %v3031_v18 = vadd.f32 %v9682_v42, %v7825_v60  ;;  %v7985_v43 = vpop.f32.mrf.mxu2  ;;  %v3923_v38 = vmul.f32 %v7855_v34, %v3657_v55  ;;  %v3925_v58 = vmul.f32 %v7855_v34, %v3659_v20  ;;  %v3342_v11 = vadd.f32 %v9684_v35, %v7804_v19  ;;  %v5167_v42 = vld [vmem:[%s5669_s18 + $0x310] sm:$0xff]  ;;  %v8002_v35 = vld [vmem:[%s9456_s3 + $0x2] sm:$0x3] }
 0x444   : > { %9683 = vst [vmem:[#allocation29_spill] sm:$0xff] %v7985_v43  ;;  %v7991_v6 = vpop.f32.mrf.mxu0  ;;  %v3660_v47 = vmax.f32 %v2980_v17, 0.0  ;;  %v3927_v2 = vmul.f32 %v7855_v34, %v3661_v16  ;;  %v3079_v39 = vadd.f32 %v7544_v40, %v7825_v60  ;;  %v3662_v55 = vmax.f32 %v2983_v46, 0.0  ;;  %p5200_p1 = pneg %p5199_p0 }
 0x445   : > { %9685 = vst [vmem:[#allocation32_spill] sm:$0xff] %v7991_v6  ;;  %v1745_v15 = vpop.permute.xlu1 %1744  ;;  %v3929_v30 = vmul.f32 %v7855_v34, %v3663_v57  ;;  %v3664_v20 = vmax.f32 %v2986_v24, 0.0  ;;  %v8005_v6 = vpop.permute.xlu2 %2102  ;;  %v3931_v16 = vmul.f32 %v7855_v34, %v3665_v49  ;;  %v3666_v40 = vmax.f32 %v2989_v13, 0.0 }
 0x446   : > { %v1393_v22 = vpop.permute.xlu0 %1392  ;;  %v3694_v50 = vmax.f32 %v3031_v18, 0.0  ;;  %v8011_v46 = vsel %vm4140_vm5, %v3923_v38, -inf  ;;  %v8014_v57 = vmul.f32 %v7870_v32, %v3658_v56  ;;  %v3667_v24 = vmax.f32 %v3342_v11, 0.0  ;;  %v4442_v18 = vld [vmem:[%s9457_s4 + $0x18] sm:$0xff]  ;;  %p5205_p5 = pnand %p5204_p4, %p5200_p1 }
 0x447   : > { %v2335_v43 = vsel %vm2236_vm0, %v5167_v42, %v1393_v22  ;;  %v9686_v42 = vld [vmem:[#allocation36_spill] sm:$0xff]  ;;  %v8029_v49 = vmul.f32 %v7870_v32, %v3660_v47  ;;  %v8032_v11 = vperm.slane %v8002_v35, 0  ;;  %v3726_v13 = vmax.f32 %v3079_v39, 0.0  ;;  %4532 = vmatpush.msrb.mxu2 %v4442_v18  ;;  %v9696_v18 = vld [vmem:[#allocation39_spill] sm:$0xff] }
 0x448   : > { %v2448_v17 = vsel %vm2349_vm1, %v2335_v43, %v1745_v15  ;;  %v2992_v59 = vadd.f32 %v9686_v42, %v7825_v60  ;;  %v8021_v15 = vld [vmem:[%s9456_s3 + $0x4] sm:$0x3]  ;;  %v8038_v43 = vsel %vm4140_vm5, %v3927_v2, -inf  ;;  %v3928_v38 = vmul.f32 %v7870_v32, %v3662_v55  ;;  %v9695_v42 = vld [vmem:[#allocation37_spill] sm:$0xff] }
 0x449   : > { %v2561_v22 = vsel %vm2462_vm2, %v2448_v17, %v7838_v12  ;;  %9687 = vst [vmem:[#allocation33_spill] sm:$0xff] %v8021_v15  ;;  %v8026_v12 = vsel %vm4140_vm5, %v3925_v58, -inf  ;;  %v8042_v56 = vsel %vm4140_vm5, %v3929_v30, -inf  ;;  %v8045_v58 = vmul.f32 %v7870_v32, %v3664_v20  ;;  %v8047_v47 = vpop.f32.mrf.mxu3 }
 0x44a   : > { %4855 = vmatmul.msk.f32.gmra.mxu3 %vm2601_vm3, %v2561_v22  ;;  %4967 = vmatmul.msk.f32.gmra.mxu2 %vm2601_vm3, %v2561_v22  ;;  %9688 = vst [vmem:[#allocation34_spill] sm:$0xff] %v8026_v12  ;;  %v8050_v39 = vsel %vm4140_vm5, %v3931_v16, -inf  ;;  %v8053_v17 = vmul.f32 %v7870_v32, %v3666_v40  ;;  %v3960_v2 = vmul.f32 %v8032_v11, %v3694_v50  ;;  %v8057_v55 = vperm.slane %v8021_v15, 0  ;;  %v8069_v40 = vld [vmem:[%s9456_s3 + $0x6] sm:$0x3]  ;;  %v9698_v15 = vld [vmem:[#allocation41_spill] sm:$0xff] }
 0x44b   : > { %9689 = vst [vmem:[#allocation18_spill] sm:$0xff] %v8029_v49  ;;  %v8059_v30 = vpop.f32.mrf.mxu2  ;;  %v3933_v20 = vmul.f32 %v7855_v34, %v3667_v24  ;;  %v3668_v22 = vmax.f32 %v2992_v59, 0.0  ;;  %v3348_v16 = vadd.f32 %v9696_v18, %v7804_v19  ;;  %v3351_v8 = vadd.f32 %v9698_v15, %v7804_v19  ;;  %v5168_v24 = vld [vmem:[%s5669_s18 + $0x318] sm:$0xff]  ;;  %v9699_v18 = vld [vmem:[#allocation43_spill] sm:$0xff] }
 0x44c   : > { %9690 = vst [vmem:[#allocation35_spill] sm:$0xff] %v8038_v43  ;;  %v3354_v62 = vadd.f32 %v9699_v18, %v7804_v19  ;;  %v4306_v15 = vmax.f32 %v3928_v38, %v3960_v2 }
 0x44d   : > { %9691 = vst [vmem:[#allocation36_spill] sm:$0xff] %v8042_v56  ;;  %v1747_v51 = vpop.permute.xlu1 %1746  ;;  %v3673_v2 = vmax.f32 %v3351_v8, 0.0 }
 0x44e   : > { %9692 = vst [vmem:[#allocation110_spill] sm:$0xff] %v8047_v47  ;;  %v3345_v47 = vadd.f32 %v9695_v42, %v7804_v19  ;;  %v1395_v50 = vpop.permute.xlu0 %1394  ;;  %v3126_v61 = vpop.f32.mrf.mxu0 }
 0x44f   : > { %9693 = vst [vmem:[#allocation111_spill] sm:$0xff] %v8050_v39  ;;  %v2336_v59 = vsel %vm2236_vm0, %v5168_v24, %v1395_v50  ;;  %v3127_v42 = vadd.f32 %v3126_v61, %v7825_v60  ;;  %v3357_v39 = vadd.f32 %v9701_v1, %v7804_v19  ;;  %v8089_v50 = vpop.permute.xlu2 %2104  ;;  %v8092_v24 = vsel %vm4140_vm5, %v3933_v20, -inf }
 0x450   : > { %9694 = vst [vmem:[#allocation112_spill] sm:$0xff] %v8059_v30  ;;  %v3992_v30 = vmul.f32 %v8057_v55, %v3726_v13  ;;  %v2449_v56 = vsel %vm2349_vm1, %v2336_v59, %v1747_v51  ;;  %v8085_v13 = vperm.slane %v8069_v40, 0  ;;  %v3669_v18 = vmax.f32 %v3345_v47, 0.0  ;;  %v9704_v51 = vld [vmem:[#allocation40_spill] sm:$0xff]  ;;  %v9708_v47 = vld [vmem:[#allocation42_spill] sm:$0xff] }
 0x451   : > { %9697 = vst [vmem:[#allocation37_spill] sm:$0xff] %v8069_v40  ;;  %v3758_v43 = vmax.f32 %v3127_v42, 0.0  ;;  %v2562_v61 = vsel %vm2462_vm2, %v2449_v56, %v7882_v54  ;;  %v3671_v1 = vmax.f32 %v3348_v16, 0.0  ;;  %v2998_v38 = vadd.f32 %v9704_v51, %v7825_v60 }
 0x452   : > { %9702 = vst [vmem:[#allocation39_spill] sm:$0xff] %v8092_v24  ;;  %4856 = vmatmul.msk.f32.gmra.mxu3 %vm2601_vm3, %v2562_v61  ;;  %4968 = vmatmul.msk.f32.gmra.mxu2 %vm2601_vm3, %v2562_v61  ;;  %v8100_v59 = vmax.f32 %v4306_v15, %v3992_v30  ;;  %v8106_v56 = vmul.f32 %v7870_v32, %v3668_v22  ;;  %v3675_v16 = vmax.f32 %v3354_v62, 0.0  ;;  %v8111_v42 = vperm.slane %v8002_v35, 1  ;;  %v8113_v61 = vpop.f32.mrf.mxu3  ;;  %v9710_v30 = vld [vmem:[#allocation23_spill] sm:$0xff] }
 0x453   : > { %v8103_v54 = vmul.f32 %v8085_v13, %v3758_v43  ;;  %v3001_v20 = vadd.f32 %v9708_v47, %v7825_v60  ;;  %9709 = vst [vmem:[#allocation45_spill] sm:$0xff] %v8113_v61  ;;  %v3677_v8 = vmax.f32 %v3357_v39, 0.0  ;;  %v3034_v15 = vadd.f32 %v9710_v30, %v7825_v60  ;;  %v8117_v43 = vpop.f32.mrf.mxu2  ;;  %v9712_v35 = vld [vmem:[#allocation47_spill] sm:$0xff]  ;;  %v5169_v30 = vld [vmem:[%s5669_s18 + $0x320] sm:$0xff] }
 0x454   : > { %9705 = vst [vmem:[#allocation41_spill] sm:$0xff] %v8100_v59  ;;  %v3935_v51 = vmul.f32 %v7855_v34, %v3669_v18  ;;  %v3670_v47 = vmax.f32 %v2995_v37, 0.0  ;;  %v3937_v62 = vmul.f32 %v7855_v34, %v3671_v1  ;;  %v3360_v40 = vadd.f32 %v9712_v35, %v7804_v19  ;;  %v9713_v37 = vld [vmem:[#allocation46_spill] sm:$0xff] }
 0x455   : > { %9706 = vst [vmem:[#allocation43_spill] sm:$0xff] %v8103_v54  ;;  %v3672_v61 = vmax.f32 %v2998_v38, 0.0  ;;  %v3939_v0 = vmul.f32 %v7855_v34, %v3673_v2  ;;  %v3082_v39 = vadd.f32 %v7570_v36, %v7825_v60  ;;  %v1749_v24 = vpop.permute.xlu1 %1748  ;;  %v3674_v22 = vmax.f32 %v3001_v20, 0.0 }
 0x456   : > { %9707 = vst [vmem:[#allocation44_spill] sm:$0xff] %v8106_v56  ;;  %v1397_v56 = vpop.permute.xlu0 %1396  ;;  %v3941_v18 = vmul.f32 %v7855_v34, %v3675_v16  ;;  %v3007_v1 = vadd.f32 %v9713_v37, %v7825_v60  ;;  %v8135_v35 = vmul.f32 %v8032_v11, %v3676_v52  ;;  %v3943_v38 = vmul.f32 %v8111_v42, %v3677_v8  ;;  %v9716_v16 = vld [vmem:[#allocation49_spill] sm:$0xff] }
 0x457   : > { %9711 = vst [vmem:[#allocation38_spill] sm:$0xff] %v8117_v43  ;;  %v2337_v43 = vsel %vm2236_vm0, %v5169_v30, %v1397_v56  ;;  %v3696_v2 = vmax.f32 %v3034_v15, 0.0  ;;  %v8141_v56 = vsel %vm4140_vm5, %v3935_v51, -inf  ;;  %v8144_v20 = vmul.f32 %v7870_v32, %v3670_v47  ;;  %v8159_v8 = vpop.permute.xlu2 %2106  ;;  %v4441_v15 = vld [vmem:[%s9457_s4 + $0x10] sm:$0xff] }
 0x458   : > { %v2450_v54 = vsel %vm2349_vm1, %v2337_v43, %v1749_v24  ;;  %9714 = vst [vmem:[#allocation40_spill] sm:$0xff] %v8135_v35  ;;  %v3679_v34 = vmax.f32 %v3360_v40, 0.0  ;;  %v3363_v30 = vadd.f32 %v9716_v16, %v7804_v19  ;;  %v8151_v24 = vsel %vm4140_vm5, %v3937_v62, -inf  ;;  %v4456_v40 = vld [vmem:[%s9457_s4 + $0x88] sm:$0xff]  ;;  %v9722_v62 = vld [vmem:[#allocation50_spill] sm:$0xff]  ;;  %4533 = vmatpush.msrb.mxu2 %v4441_v15 }
 0x459   : > { %v2563_v36 = vsel %vm2462_vm2, %v2450_v54, %v7945_v23  ;;  %9715 = vst [vmem:[#allocation42_spill] sm:$0xff] %v8141_v56  ;;  %v8154_v52 = vmul.f32 %v7870_v32, %v3672_v61  ;;  %v8157_v23 = vsel %vm4140_vm5, %v3939_v0, -inf  ;;  %v3728_v54 = vmax.f32 %v3082_v39, 0.0  ;;  %v9721_v61 = vld [vmem:[#allocation7_spill] sm:$0xff]  ;;  %4599 = vmatpush.msrb.mxu3 %v4456_v40  ;;  %v9727_v15 = vld [vmem:[#allocation6_spill] sm:$0xff] }
 0x45a   : > { %4857 = vmatmul.msk.f32.gmra.mxu3 %vm2601_vm3, %v2563_v36  ;;  %4969 = vmatmul.msk.f32.gmra.mxu2 %vm2601_vm3, %v2563_v36  ;;  %9717 = vst [vmem:[#allocation23_spill] sm:$0xff] %v8151_v24  ;;  %v8168_v43 = vmul.f32 %v7870_v32, %v3674_v22  ;;  %v3678_v51 = vmax.f32 %v3007_v1, 0.0  ;;  %v3366_v47 = vadd.f32 %v9721_v61, %v7804_v19  ;;  %v8174_v39 = vpop.f32.mrf.mxu3  ;;  %v8177_v37 = vsel %vm4140_vm5, %v3941_v18, -inf  ;;  %v9726_v61 = vld [vmem:[#allocation48_spill] sm:$0xff]  ;;  %v5170_v35 = vld [vmem:[%s5669_s18 + $0x328] sm:$0xff] }
 0x45b   : > { %9718 = vst [vmem:[#allocation47_spill] sm:$0xff] %v8154_v52  ;;  %v3369_v0 = vadd.f32 %v9722_v62, %v7804_v19  ;;  %v8182_v32 = vsel %vm4140_vm5, %v3943_v38, -inf  ;;  %v3962_v22 = vmul.f32 %v8032_v11, %v3696_v2  ;;  %v8185_v1 = vpop.f32.mrf.mxu2  ;;  %v3945_v16 = vmul.f32 %v8111_v42, %v3679_v34  ;;  %v9728_v36 = vld [vmem:[#allocation8_spill] sm:$0xff] }
 0x45c   : > { %9719 = vst [vmem:[#allocation46_spill] sm:$0xff] %v8157_v23  ;;  %v3010_v62 = vadd.f32 %v9726_v61, %v7825_v60  ;;  %v3681_v40 = vmax.f32 %v3363_v30, 0.0  ;;  %v3013_v18 = vadd.f32 %v9727_v15, %v7825_v60  ;;  %v3994_v38 = vmul.f32 %v8057_v55, %v3728_v54 }
 0x45d   : > { %9720 = vst [vmem:[#allocation49_spill] sm:$0xff] %v8168_v43  ;;  %v1751_v34 = vpop.permute.xlu1 %1750  ;;  %v8199_v9 = vmul.f32 %v8032_v11, %v3678_v51  ;;  %v3683_v30 = vmax.f32 %v3366_v47, 0.0  ;;  %v3685_v61 = vmax.f32 %v3369_v0, 0.0  ;;  %v9729_v43 = vld [vmem:[#allocation52_spill] sm:$0xff] }
 0x45e   : > { %9723 = vst [vmem:[#allocation7_spill] sm:$0xff] %v8174_v39  ;;  %v3129_v59 = vpop.f32.mrf.mxu0  ;;  %v3016_v39 = vadd.f32 %v9728_v36, %v7825_v60  ;;  %v3372_v23 = vadd.f32 %v9729_v43, %v7804_v19  ;;  %v4325_v36 = vmax.f32 %v8045_v58, %v3962_v22  ;;  %v3680_v51 = vmax.f32 %v3010_v62, 0.0 }
 0x45f   : > { %9724 = vst [vmem:[#allocation50_spill] sm:$0xff] %v8177_v37  ;;  %v1399_v37 = vpop.permute.xlu0 %1398  ;;  %v3947_v47 = vmul.f32 %v8111_v42, %v3681_v40  ;;  %v3682_v43 = vmax.f32 %v3013_v18, 0.0  ;;  %v3949_v22 = vmul.f32 %v8111_v42, %v3683_v30 }
 0x460   : > { %9725 = vst [vmem:[#allocation113_spill] sm:$0xff] %v8185_v1  ;;  %v2338_v2 = vsel %vm2236_vm0, %v5170_v35, %v1399_v37  ;;  %v3130_v1 = vadd.f32 %v3129_v59, %v7825_v60  ;;  %v8210_v35 = vsel %vm4140_vm5, %v3945_v16, -inf  ;;  %v3684_v0 = vmax.f32 %v3016_v39, 0.0  ;;  %v9732_v16 = vld [vmem:[#allocation51_spill] sm:$0xff] }
 0x461   : > { %v2451_v15 = vsel %vm2349_vm1, %v2338_v2, %v1751_v34  ;;  %v8215_v58 = vmax.f32 %v4325_v36, %v3994_v38  ;;  %v3019_v62 = vadd.f32 %v9732_v16, %v7825_v60  ;;  %v3687_v18 = vmax.f32 %v3372_v23, 0.0  ;;  %v9734_v39 = vld [vmem:[#allocation11_spill] sm:$0xff] }
 0x462   : > { %v3760_v52 = vmax.f32 %v3130_v1, 0.0  ;;  %v2564_v54 = vsel %vm2462_vm2, %v2451_v15, %v8005_v6  ;;  %v3951_v1 = vmul.f32 %v8111_v42, %v3685_v61  ;;  %v8226_v40 = vpop.f32.mrf.mxu3  ;;  %v3022_v38 = vadd.f32 %v9734_v39, %v7825_v60  ;;  %v8236_v15 = vpop.permute.xlu2 %2108  ;;  %v5171_v61 = vld [vmem:[%s5669_s18 + $0x330] sm:$0xff] }
 0x463   : > { %4858 = vmatmul.msk.f32.gmra.mxu3 %vm2601_vm3, %v2564_v54  ;;  %4970 = vmatmul.msk.f32.gmra.mxu2 %vm2601_vm3, %v2564_v54  ;;  %9730 = vst [vmem:[#allocation48_spill] sm:$0xff] %v8215_v58  ;;  %v8232_v34 = vpop.f32.mrf.mxu2  ;;  %v8241_v36 = vmul.f32 %v8032_v11, %v3680_v51  ;;  %v8244_v23 = vsel %vm4140_vm5, %v3947_v47, -inf  ;;  %v9737_v54 = vld [vmem:[#allocation53_spill] sm:$0xff]  ;;  %v8252_v30 = vmul.f32 %v8032_v11, %v3684_v0  ;;  %v8259_v47 = vsel %vm4140_vm5, %v3949_v22, -inf }
 0x464   : > { %v8218_v37 = vmul.f32 %v8085_v13, %v3760_v52  ;;  %9733 = vst [vmem:[#allocation8_spill] sm:$0xff] %v8226_v40  ;;  %v9735_v52 = vld [vmem:[#allocation20_spill] sm:$0xff]  ;;  %v3375_v16 = vadd.f32 %v9737_v54, %v7804_v19  ;;  %v3085_v6 = vadd.f32 %v7587_v4, %v7825_v60  ;;  %v3686_v54 = vmax.f32 %v3019_v62, 0.0 }
 0x465   : > { %v3037_v2 = vadd.f32 %v9735_v52, %v7825_v60  ;;  %9736 = vst [vmem:[#allocation52_spill] sm:$0xff] %v8232_v34  ;;  %v8249_v52 = vmul.f32 %v8032_v11, %v3682_v43  ;;  %v1753_v59 = vpop.permute.xlu1 %1752  ;;  %v3953_v58 = vmul.f32 %v8111_v42, %v3687_v18  ;;  %v3688_v0 = vmax.f32 %v3022_v38, 0.0  ;;  %v8266_v34 = vpop.f32.mrf.mxu1  ;;  %v9742_v62 = vld [vmem:[#allocation12_spill] sm:$0xff] }
 0x466   : > { %9731 = vst [vmem:[#allocation6_spill] sm:$0xff] %v8218_v37  ;;  %v8262_v37 = vsel %vm4140_vm5, %v3951_v1, -inf  ;;  %v3689_v1 = vmax.f32 %v3375_v16, 0.0  ;;  %v3730_v38 = vmax.f32 %v3085_v6, 0.0  ;;  %v9743_v16 = vld [vmem:[#allocation16_spill] sm:$0xff] }
 0x467   : > { %v1401_v39 = vpop.permute.xlu0 %1400  ;;  %9738 = vst [vmem:[#allocation51_spill] sm:$0xff] %v8252_v30  ;;  %v3698_v40 = vmax.f32 %v3037_v2, 0.0  ;;  %v8298_v6 = vsel %vm4140_vm5, %v3953_v58, -inf  ;;  %v8301_v2 = vmul.f32 %v8032_v11, %v3688_v0  ;;  %v9747_v58 = vld [vmem:[#allocation15_spill] sm:$0xff] }
 0x468   : > { %v2339_v51 = vsel %vm2236_vm0, %v5171_v61, %v1401_v39  ;;  %9739 = vst [vmem:[#allocation11_spill] sm:$0xff] %v8259_v47  ;;  %v3025_v39 = vadd.f32 %v9742_v62, %v7825_v60  ;;  %v3996_v0 = vmul.f32 %v8057_v55, %v3730_v38 }
 0x469   : > { %9740 = vst [vmem:[#allocation20_spill] sm:$0xff] %v8262_v37  ;;  %v2452_v43 = vsel %vm2349_vm1, %v2339_v51, %v1753_v59  ;;  %v3378_v51 = vadd.f32 %v9743_v16, %v7804_v19  ;;  %v3964_v16 = vmul.f32 %v8032_v11, %v3698_v40  ;;  %v5172_v37 = vld [vmem:[%s5669_s18 + $0x338] sm:$0xff] }
 0x46a   : > { %9741 = vst [vmem:[#allocation53_spill] sm:$0xff] %v8266_v34  ;;  %v2565_v4 = vsel %vm2462_vm2, %v2452_v43, %v8089_v50  ;;  %v9744_v43 = vld [vmem:[#allocation24_spill] sm:$0xff]  ;;  %v8292_v59 = vpop.f32.mrf.mxu3  ;;  %v8295_v50 = vmul.f32 %v8032_v11, %v3686_v54  ;;  %v3690_v22 = vmax.f32 %v3025_v39, 0.0  ;;  %v3390_v54 = vadd.f32 %v7333_v7, %v7804_v19  ;;  %v8317_v39 = vpop.permute.xlu2 %2110 }
 0x46b   : > { %4859 = vmatmul.msk.f32.gmra.mxu3 %vm2601_vm3, %v2565_v4  ;;  %4971 = vmatmul.msk.f32.gmra.mxu2 %vm2601_vm3, %v2565_v4  ;;  %v3381_v62 = vadd.f32 %v9744_v43, %v7804_v19  ;;  %v3384_v4 = vadd.f32 %v7258_v5, %v7804_v19  ;;  %9745 = vst [vmem:[#allocation12_spill] sm:$0xff] %v8292_v59  ;;  %v8304_v18 = vpop.f32.mrf.mxu2  ;;  %v3691_v31 = vmax.f32 %v3378_v51, 0.0 }
 0x46c   : > { %9746 = vst [vmem:[#allocation16_spill] sm:$0xff] %v8304_v18  ;;  %v3955_v43 = vmul.f32 %v8111_v42, %v3689_v1  ;;  %v3387_v5 = vadd.f32 %v7297_v63, %v7804_v19  ;;  %v3028_v34 = vadd.f32 %v9747_v58, %v7825_v60  ;;  %v4344_v44 = vmax.f32 %v8053_v17, %v3964_v16 }
 0x46d   : > { %v1755_v1 = vpop.permute.xlu1 %1754  ;;  %v3693_v63 = vmax.f32 %v3381_v62, 0.0  ;;  %v3695_v30 = vmax.f32 %v3384_v4, 0.0  ;;  %v3040_v58 = vadd.f32 %v7260_v27, %v7825_v60  ;;  %v8323_v47 = vpop.f32.mrf.mxu1  ;;  %v3699_v51 = vmax.f32 %v3390_v54, 0.0 }
 0x46e   : > { %v3132_v59 = vpop.f32.mrf.mxu0  ;;  %v3393_v62 = vadd.f32 %v7364_v48, %v7804_v19  ;;  %v3692_v17 = vmax.f32 %v3028_v34, 0.0  ;;  %v8343_v16 = vsel %vm4140_vm5, %v3955_v43, -inf  ;;  %v8346_v48 = vmul.f32 %v8032_v11, %v3690_v22 }
 0x46f   : > { %v1403_v61 = vpop.permute.xlu0 %1402  ;;  %v3133_v18 = vadd.f32 %v3132_v59, %v7825_v60  ;;  %v3697_v59 = vmax.f32 %v3387_v5, 0.0  ;;  %v3957_v5 = vmul.f32 %v8111_v42, %v3691_v31  ;;  %v3961_v34 = vmul.f32 %v8111_v42, %v3695_v30 }
 0x470   : > { %v2340_v40 = vsel %vm2236_vm0, %v5172_v37, %v1403_v61  ;;  %v3965_v22 = vmul.f32 %v8111_v42, %v3699_v51  ;;  %v3396_v31 = vadd.f32 %v7403_v10, %v7804_v19  ;;  %v8364_v30 = vmul.f32 %v8032_v11, %v3692_v17  ;;  %v9754_v10 = vld [vmem:[#allocation31_spill] sm:$0xff] }
 0x471   : > { %v2453_v7 = vsel %vm2349_vm1, %v2340_v40, %v1755_v1  ;;  %v3762_v38 = vmax.f32 %v3133_v18, 0.0  ;;  %v8335_v18 = vmax.f32 %v4344_v44, %v3996_v0  ;;  %v3959_v44 = vmul.f32 %v8111_v42, %v3693_v63 }
 0x472   : > { %v2566_v37 = vsel %vm2462_vm2, %v2453_v7, %v8159_v8  ;;  %v8349_v54 = vpop.f32.mrf.mxu3  ;;  %v3700_v0 = vmax.f32 %v3040_v58, 0.0  ;;  %v3963_v43 = vmul.f32 %v8111_v42, %v3697_v59  ;;  %v3701_v7 = vmax.f32 %v3393_v62, 0.0  ;;  %9752 = vst [vmem:[#allocation116_spill] sm:$0xff] %v8364_v30 }
 0x473   : > { %4860 = vmatmul.msk.f32.gmra.mxu3 %vm2601_vm3, %v2566_v37  ;;  %4972 = vmatmul.msk.f32.gmra.mxu2 %vm2601_vm3, %v2566_v37  ;;  %9748 = vst [vmem:[#allocation24_spill] sm:$0xff] %v8335_v18  ;;  %v8338_v8 = vmul.f32 %v8085_v13, %v3762_v38  ;;  %v8353_v40 = vpop.f32.mrf.mxu2  ;;  %v3088_v58 = vadd.f32 %v7614_v45, %v7825_v60  ;;  %v5173_v37 = vld [vmem:[%s5669_s18 + $0x340] sm:$0xff]  ;;  %v8373_v62 = vsel %vm4140_vm5, %v3957_v5, -inf  ;;  %v8379_v17 = vsel %vm4140_vm5, %v3959_v44, -inf }
 0x474   : > { %9750 = vst [vmem:[#allocation114_spill] sm:$0xff] %v8349_v54  ;;  %v3043_v4 = vadd.f32 %v9754_v10, %v7825_v60  ;;  %v8382_v45 = vsel %vm4140_vm5, %v3961_v34, -inf  ;;  %v8392_v10 = vpop.permute.xlu2 %2112  ;;  %v8398_v44 = vsel %vm4140_vm5, %v3965_v22, -inf  ;;  %v3967_v34 = vmul.f32 %v8111_v42, %v3701_v7  ;;  %v4440_v22 = vld [vmem:[%s9457_s4 + $0x8] sm:$0xff] }
 0x475   : > { %9749 = vst [vmem:[#allocation15_spill] sm:$0xff] %v8338_v8  ;;  %v1757_v59 = vpop.permute.xlu1 %1756  ;;  %v8388_v51 = vpop.f32.mrf.mxu1  ;;  %v3732_v27 = vmax.f32 %v3088_v58, 0.0  ;;  %4534 = vmatpush.msrb.mxu2 %v4440_v22 }
 0x476   : > { %9751 = vst [vmem:[#allocation115_spill] sm:$0xff] %v8353_v40  ;;  %v3702_v8 = vmax.f32 %v3043_v4, 0.0  ;;  %v9766_v40 = vld [vmem:[#allocation44_spill] sm:$0xff]  ;;  %v8430_v4 = vsel %vm4140_vm5, %v3967_v34, -inf }
 0x477   : > { %v1405_v38 = vpop.permute.xlu0 %1404  ;;  %9753 = vst [vmem:[#allocation117_spill] sm:$0xff] %v8373_v62 }
 0x478   : > { %v2341_v1 = vsel %vm2236_vm0, %v5173_v37, %v1405_v38  ;;  %9755 = vst [vmem:[#allocation31_spill] sm:$0xff] %v8379_v17  ;;  %v3966_v38 = vmul.f32 %v8032_v11, %v3700_v0  ;;  %v3872_v37 = vld [vmem:[%s9456_s3 + $0x8] sm:$0x3]  ;;  %v3703_v0 = vmax.f32 %v3396_v31, 0.0  ;;  %v9774_v17 = vld [vmem:[#allocation54_spill] sm:$0xff] }
 0x479   : > { %v2454_v63 = vsel %vm2349_vm1, %v2341_v1, %v1757_v59  ;;  %9756 = vst [vmem:[#allocation118_spill] sm:$0xff] %v8382_v45  ;;  %v8395_v1 = vsel %vm4140_vm5, %v3963_v43, -inf  ;;  %v8416_v18 = vperm.slane %v3872_v37, 1  ;;  %v8425_v30 = vperm.slane %v3872_v37, 0  ;;  %v9770_v45 = vld [vmem:[#allocation28_spill] sm:$0xff] }
 0x47a   : > { %9757 = vst [vmem:[#allocation119_spill] sm:$0xff] %v8388_v51  ;;  %v2567_v5 = vsel %vm2462_vm2, %v2454_v63, %v8236_v15  ;;  %v9760_v63 = vld [vmem:[#allocation58_spill] sm:$0xff]  ;;  %v8418_v59 = vpop.f32.mrf.mxu3  ;;  %v4363_v51 = vmax.f32 %v9766_v40, %v3966_v38  ;;  %v3046_v58 = vadd.f32 %v9770_v45, %v7825_v60  ;;  %v3998_v40 = vmul.f32 %v8057_v55, %v3732_v27  ;;  %v5174_v38 = vld [vmem:[%s5669_s18 + $0x348] sm:$0xff] }
 0x47b   : > { %9758 = vst [vmem:[#allocation120_spill] sm:$0xff] %v8395_v1  ;;  %4861 = vmatmul.msk.f32.gmra.mxu3 %vm2601_vm3, %v2567_v5  ;;  %4973 = vmatmul.msk.f32.gmra.mxu2 %vm2601_vm3, %v2567_v5  ;;  %v3399_v43 = vadd.f32 %v9760_v63, %v7804_v19  ;;  %v8427_v31 = vpop.f32.mrf.mxu2  ;;  %v3969_v5 = vmul.f32 %v8111_v42, %v3703_v0  ;;  %v9771_v0 = vld [vmem:[#allocation67_spill] sm:$0xff] }
 0x47c   : > { %9759 = vst [vmem:[#allocation121_spill] sm:$0xff] %v8398_v44  ;;  %v8442_v15 = vmul.f32 %v8032_v11, %v3702_v8 }
 0x47d   : > { %9763 = vst [vmem:[#allocation58_spill] sm:$0xff] %v8418_v59  ;;  %v9769_v59 = vld [vmem:[#allocation63_spill] sm:$0xff]  ;;  %v3705_v54 = vmax.f32 %v3399_v43, 0.0  ;;  %v1759_v34 = vpop.permute.xlu1 %1758  ;;  %v9773_v43 = vld [vmem:[#allocation61_spill] sm:$0xff]  ;;  %v8458_v7 = vsel %vm4140_vm5, %v3969_v5, -inf }
 0x47e   : > { %9767 = vst [vmem:[#allocation44_spill] sm:$0xff] %v8427_v31  ;;  %v3501_v22 = vadd.f32 %v9769_v59, %v7804_v19  ;;  %v3135_v63 = vpop.f32.mrf.mxu0  ;;  %v3504_v59 = vadd.f32 %v9771_v0, %v7804_v19  ;;  %v9772_v31 = vld [vmem:[#allocation27_spill] sm:$0xff]  ;;  %v3402_v27 = vadd.f32 %v9773_v43, %v7804_v19  ;;  %v8468_v43 = vmax.f32 %v4363_v51, %v3998_v40 }
 0x47f   : > { %9768 = vst [vmem:[#allocation122_spill] sm:$0xff] %v8430_v4  ;;  %v1407_v1 = vpop.permute.xlu0 %1406  ;;  %v3136_v44 = vadd.f32 %v3135_v63, %v7825_v60  ;;  %v3049_v45 = vadd.f32 %v9772_v31, %v7825_v60  ;;  %v9777_v31 = vld [vmem:[#allocation65_spill] sm:$0xff] }
 0x480   : > { %v2342_v37 = vsel %vm2236_vm0, %v5174_v38, %v1407_v1  ;;  %v3052_v1 = vadd.f32 %v9774_v17, %v7825_v60  ;;  %v8453_v38 = vpop.f32.mrf.mxu1  ;;  %9776 = vst [vmem:[#allocation28_spill] sm:$0xff] %v8458_v7  ;;  %v3773_v0 = vmax.f32 %v3501_v22, 0.0  ;;  %v3405_v49 = vadd.f32 %v9777_v31, %v7804_v19  ;;  %v9781_v22 = vld [vmem:[#allocation66_spill] sm:$0xff]  ;;  %v9787_v7 = vld [vmem:[#allocation71_spill] sm:$0xff] }
 0x481   : > { %v2455_v61 = vsel %vm2349_vm1, %v2342_v37, %v1759_v34  ;;  %9775 = vst [vmem:[#allocation63_spill] sm:$0xff] %v8453_v38  ;;  %v3764_v63 = vmax.f32 %v3136_v44, 0.0  ;;  %v9778_v37 = vld [vmem:[#allocation33_spill] sm:$0xff]  ;;  %v3704_v17 = vmax.f32 %v3046_v58, 0.0  ;;  %v3971_v44 = vmul.f32 %v8111_v42, %v3705_v54 }
 0x482   : > { %v2568_v8 = vsel %vm2462_vm2, %v2455_v61, %v8317_v39  ;;  %v8463_v34 = vperm.slane %v9778_v37, 1  ;;  %9779 = vst [vmem:[#allocation67_spill] sm:$0xff] %v8468_v43  ;;  %v8473_v61 = vpop.permute.xlu2 %2114  ;;  %v3151_v31 = vadd.f32 %v9781_v22, %v7825_v60  ;;  %v3775_v37 = vmax.f32 %v3504_v59, 0.0 }
 0x483   : > { %4862 = vmatmul.msk.f32.gmra.mxu3 %vm2601_vm3, %v2568_v8  ;;  %4974 = vmatmul.msk.f32.gmra.mxu2 %vm2601_vm3, %v2568_v8  ;;  %v8471_v39 = vmul.f32 %v8085_v13, %v3764_v63  ;;  %v3706_v38 = vmax.f32 %v3049_v45, 0.0  ;;  %v8479_v8 = vpop.f32.mrf.mxu3  ;;  %v3707_v51 = vmax.f32 %v3402_v27, 0.0  ;;  %v3708_v58 = vmax.f32 %v3052_v1, 0.0  ;;  %v8483_v40 = vpop.f32.mrf.mxu2  ;;  %v9784_v45 = vld [vmem:[#allocation70_spill] sm:$0xff]  ;;  %v9786_v1 = vld [vmem:[#allocation81_spill] sm:$0xff]  ;;  %v5175_v63 = vld [vmem:[%s5669_s18 + $0x350] sm:$0xff] }
 0x484   : > { %9782 = vst [vmem:[#allocation61_spill] sm:$0xff] %v8479_v8  ;;  %v4039_v22 = vmul.f32 %v8416_v18, %v3773_v0  ;;  %v3709_v59 = vmax.f32 %v3405_v49, 0.0  ;;  %v3507_v4 = vadd.f32 %v9784_v45, %v7804_v19  ;;  %v8493_v8 = vmul.f32 %v8032_v11, %v3704_v17 }
 0x485   : > { %9780 = vst [vmem:[#allocation27_spill] sm:$0xff] %v8471_v39  ;;  %v8496_v27 = vsel %vm4140_vm5, %v3971_v44, -inf  ;;  %v3091_v54 = vadd.f32 %v9786_v1, %v7825_v60  ;;  %v1761_v5 = vpop.permute.xlu1 %1760  ;;  %v3774_v43 = vmax.f32 %v3151_v31, 0.0  ;;  %v4041_v49 = vmul.f32 %v8416_v18, %v3775_v37  ;;  %v4455_v31 = vld [vmem:[%s9457_s4 + $0x80] sm:$0xff] }
 0x486   : > { %9783 = vst [vmem:[#allocation54_spill] sm:$0xff] %v8483_v40  ;;  %v8504_v0 = vmul.f32 %v8032_v11, %v3706_v38  ;;  %v3973_v17 = vmul.f32 %v8111_v42, %v3707_v51  ;;  %v3974_v44 = vmul.f32 %v8057_v55, %v3708_v58  ;;  %v3408_v24 = vadd.f32 %v9787_v7, %v7804_v19  ;;  %v9789_v38 = vld [vmem:[#allocation69_spill] sm:$0xff]  ;;  %v9804_v58 = vld [vmem:[#allocation82_spill] sm:$0xff] }
 0x487   : > { %v1409_v56 = vpop.permute.xlu0 %1408  ;;  %9785 = vst [vmem:[#allocation65_spill] sm:$0xff] %v8496_v27  ;;  %v3975_v11 = vmul.f32 %v8463_v34, %v3709_v59  ;;  %v3777_v42 = vmax.f32 %v3507_v4, 0.0  ;;  %v8526_v7 = vsel %vm4140_vm5, %v4039_v22, -inf  ;;  %v3734_v59 = vmax.f32 %v3091_v54, 0.0  ;;  %4600 = vmatpush.msrb.mxu3 %v4455_v31  ;;  %v4439_v4 = vld [vmem:[%s9457_s4] sm:$0xff]  ;;  %v9796_v22 = vld [vmem:[#allocation49_spill] sm:$0xff] }
 0x488   : > { %v2343_v39 = vsel %vm2236_vm0, %v5175_v63, %v1409_v56  ;;  %v8511_v1 = vpop.f32.mrf.mxu1  ;;  %9791 = vst [vmem:[#allocation66_spill] sm:$0xff] %v8526_v7  ;;  %4535 = vmatpush.msrb.mxu2 %v4439_v4  ;;  %v8548_v54 = vsel %vm4140_vm5, %v3973_v17, -inf  ;;  %v9800_v31 = vld [vmem:[#allocation13_spill] sm:$0xff]  ;;  %v9801_v63 = vld [vmem:[#allocation40_spill] sm:$0xff] }
 0x489   : > { %v2456_v45 = vsel %vm2349_vm1, %v2343_v39, %v1761_v5  ;;  %9788 = vst [vmem:[#allocation33_spill] sm:$0xff] %v8511_v1  ;;  %v3154_v39 = vadd.f32 %v9789_v38, %v7825_v60  ;;  %v9790_v5 = vld [vmem:[#allocation55_spill] sm:$0xff]  ;;  %v3414_v1 = vadd.f32 %v9804_v58, %v7804_v19  ;;  %v4043_v4 = vmul.f32 %v8416_v18, %v3777_v42  ;;  %v9808_v42 = vld [vmem:[#allocation57_spill] sm:$0xff] }
 0x48a   : > { %v2569_v56 = vsel %vm2462_vm2, %v2456_v45, %v8392_v10  ;;  %v3055_v37 = vadd.f32 %v9790_v5, %v7825_v60  ;;  %v9792_v10 = vld [vmem:[#allocation47_spill] sm:$0xff]  ;;  %v8536_v45 = vmul.f32 %v8425_v30, %v3774_v43  ;;  %v9797_v5 = vld [vmem:[#allocation76_spill] sm:$0xff]  ;;  %9799 = vst [vmem:[#allocation69_spill] sm:$0xff] %v8548_v54  ;;  %v9802_v43 = vmax.f32 %v9800_v31, %v9801_v63  ;;  %v5176_v31 = vld [vmem:[%s5669_s18 + $0x358] sm:$0xff] }
 0x48b   : > { %4863 = vmatmul.msk.f32.gmra.mxu3 %vm2601_vm3, %v2569_v56  ;;  %4975 = vmatmul.msk.f32.gmra.mxu2 %vm2601_vm3, %v2569_v56  ;;  %v8539_v56 = vsel %vm4140_vm5, %v4041_v49, -inf  ;;  %v3411_v51 = vadd.f32 %v9797_v5, %v7804_v19  ;;  %v8545_v40 = vpop.f32.mrf.mxu3  ;;  %v3711_v49 = vmax.f32 %v3408_v24, 0.0  ;;  %v8557_v38 = vpop.f32.mrf.mxu2  ;;  %v4144_v5 = vsel %vm4140_vm5, %v3975_v11, -inf  ;;  %v9806_v63 = vld [vmem:[#allocation56_spill] sm:$0xff]  ;;  %v9807_v11 = vld [vmem:[#allocation73_spill] sm:$0xff] }
 0x48c   : > { %9794 = vst [vmem:[#allocation70_spill] sm:$0xff] %v8536_v45  ;;  %v8553_v27 = vmax.f32 %v9802_v43, %v3974_v44  ;;  %v3710_v17 = vmax.f32 %v3055_v37, 0.0  ;;  %v3058_v44 = vadd.f32 %v9806_v63, %v7825_v60  ;;  %v4000_v24 = vmul.f32 %v8057_v55, %v3734_v59 }
 0x48d   : > { %9795 = vst [vmem:[#allocation81_spill] sm:$0xff] %v8539_v56  ;;  %v8559_v56 = vpop.permute.xlu2 %2116  ;;  %v3713_v7 = vmax.f32 %v3411_v51, 0.0  ;;  %v3061_v37 = vadd.f32 %v9808_v42, %v7825_v60  ;;  %v3977_v62 = vmul.f32 %v8463_v34, %v3711_v49  ;;  %v3715_v63 = vmax.f32 %v3414_v1, 0.0 }
 0x48e   : > { %9798 = vst [vmem:[#allocation71_spill] sm:$0xff] %v8545_v40  ;;  %v3776_v40 = vmax.f32 %v3154_v39, 0.0  ;;  %v3138_v45 = vpop.f32.mrf.mxu0  ;;  %v3510_v39 = vadd.f32 %v9807_v11, %v7804_v19  ;;  %v9810_v51 = vmax.f32 %v7905_v25, %v8182_v32  ;;  %v8588_v11 = vsel %vm4140_vm5, %v4043_v4, -inf }
 0x48f   : > { %9803 = vst [vmem:[#allocation55_spill] sm:$0xff] %v8553_v27  ;;  %v1411_v54 = vpop.permute.xlu0 %1410  ;;  %v3139_v43 = vadd.f32 %v3138_v45, %v7825_v60  ;;  %v3712_v49 = vmax.f32 %v3058_v44, 0.0  ;;  %v9815_v25 = vmax.f32 %v8144_v20, %v8442_v15  ;;  %v3979_v4 = vmul.f32 %v8463_v34, %v3713_v7 }
 0x490   : > { %9805 = vst [vmem:[#allocation47_spill] sm:$0xff] %v8557_v38  ;;  %v2344_v58 = vsel %vm2236_vm0, %v5176_v31, %v1411_v54  ;;  %v1763_v38 = vpop.permute.xlu1 %1762  ;;  %v8575_v12 = vpop.f32.mrf.mxu1  ;;  %v8582_v45 = vmax.f32 %v9810_v51, %v4144_v5  ;;  %v8585_v31 = vmul.f32 %v8425_v30, %v3776_v40  ;;  %v3976_v5 = vmul.f32 %v8057_v55, %v3710_v17  ;;  %v9821_v17 = vld [vmem:[#allocation59_spill] sm:$0xff] }
 0x491   : > { %v2457_v27 = vsel %vm2349_vm1, %v2344_v58, %v1763_v38  ;;  %9809 = vst [vmem:[#allocation49_spill] sm:$0xff] %v8575_v12  ;;  %v3766_v59 = vmax.f32 %v3139_v43, 0.0  ;;  %v9813_v38 = vld [vmem:[#allocation89_spill] sm:$0xff]  ;;  %v8599_v32 = vmax.f32 %v9815_v25, %v4000_v24  ;;  %v3779_v58 = vmax.f32 %v3510_v39, 0.0 }
 0x492   : > { %v2570_v54 = vsel %vm2462_vm2, %v2457_v27, %v8473_v61  ;;  %9811 = vst [vmem:[#allocation76_spill] sm:$0xff] %v8585_v31  ;;  %v3417_v1 = vadd.f32 %v9813_v38, %v7804_v19  ;;  %v9814_v61 = vld [vmem:[#allocation72_spill] sm:$0xff]  ;;  %v3714_v43 = vmax.f32 %v3061_v37, 0.0  ;;  %v4163_v44 = vsel %vm4140_vm5, %v3977_v62, -inf }
 0x493   : > { %9812 = vst [vmem:[#allocation13_spill] sm:$0xff] %v8588_v11  ;;  %4864 = vmatmul.msk.f32.gmra.mxu3 %vm2601_vm3, %v2570_v54  ;;  %4976 = vmatmul.msk.f32.gmra.mxu2 %vm2601_vm3, %v2570_v54  ;;  %v3157_v27 = vadd.f32 %v9814_v61, %v7825_v60  ;;  %v8602_v40 = vmul.f32 %v8085_v13, %v3766_v59  ;;  %v9818_v54 = vld [vmem:[#allocation75_spill] sm:$0xff]  ;;  %v8610_v20 = vpop.f32.mrf.mxu3  ;;  %v8612_v15 = vpop.f32.mrf.mxu2  ;;  %v9822_v37 = vld [vmem:[#allocation60_spill] sm:$0xff] }
 0x494   : > { %9816 = vst [vmem:[#allocation40_spill] sm:$0xff] %v8599_v32  ;;  %v3981_v42 = vmul.f32 %v8463_v34, %v3715_v63  ;;  %v3513_v51 = vadd.f32 %v9818_v54, %v7804_v19  ;;  %v3064_v7 = vadd.f32 %v9821_v17, %v7825_v60  ;;  %v3717_v39 = vmax.f32 %v3417_v1, 0.0  ;;  %v9823_v62 = vld [vmem:[#allocation96_spill] sm:$0xff]  ;;  %v9824_v54 = vld [vmem:[#allocation85_spill] sm:$0xff] }
 0x495   : > { %9817 = vst [vmem:[#allocation82_spill] sm:$0xff] %v8602_v40  ;;  %v3067_v59 = vadd.f32 %v9822_v37, %v7825_v60  ;;  %v3420_v63 = vadd.f32 %v9823_v62, %v7804_v19  ;;  %v3978_v61 = vmul.f32 %v8057_v55, %v3712_v49  ;;  %v3778_v25 = vmax.f32 %v3157_v27, 0.0  ;;  %v2119_v62 = vpop.permute.xlu2 %2118  ;;  %v9825_v49 = vld [vmem:[#allocation74_spill] sm:$0xff] }
 0x496   : > { %9819 = vst [vmem:[#allocation56_spill] sm:$0xff] %v8610_v20  ;;  %v3094_v20 = vadd.f32 %v9824_v54, %v7825_v60  ;;  %v4182_v17 = vsel %vm4140_vm5, %v3979_v4, -inf  ;;  %v4045_v1 = vmul.f32 %v8416_v18, %v3779_v58  ;;  %v3980_v37 = vmul.f32 %v8057_v55, %v3714_v43 }
 0x497   : > { %9820 = vst [vmem:[#allocation73_spill] sm:$0xff] %v8612_v15  ;;  %v1413_v38 = vpop.permute.xlu0 %1412  ;;  %v5177_v15 = vld [vmem:[%s5669_s18 + $0x360] sm:$0xff]  ;;  %v4201_v12 = vsel %vm4140_vm5, %v3981_v42, -inf  ;;  %v3160_v27 = vadd.f32 %v9825_v49, %v7825_v60  ;;  %v3781_v11 = vmax.f32 %v3513_v51, 0.0  ;;  %v3983_v4 = vmul.f32 %v8463_v34, %v3717_v39 }
 0x498   : > { %v2345_v24 = vsel %vm2236_vm0, %v5177_v15, %v1413_v38  ;;  %v1765_v40 = vpop.permute.xlu1 %1764  ;;  %v8634_v54 = vpop.f32.mrf.mxu1  ;;  %v3716_v38 = vmax.f32 %v3064_v7, 0.0  ;;  %v3718_v58 = vmax.f32 %v3067_v59, 0.0  ;;  %v3719_v31 = vmax.f32 %v3420_v63, 0.0 }
 0x499   : > { %v2458_v32 = vsel %vm2349_vm1, %v2345_v24, %v1765_v40  ;;  %9826 = vst [vmem:[#allocation57_spill] sm:$0xff] %v8634_v54  ;;  %v9827_v40 = vmax.f32 %v7908_v26, %v8199_v9  ;;  %v9828_v42 = vmax.f32 %v7914_v3, %v8210_v35  ;;  %v9829_v24 = vmax.f32 %v7917_v33, %v8241_v36  ;;  %v9831_v3 = vld [vmem:[#allocation103_spill] sm:$0xff] }
 0x49a   : > { %v2571_v15 = vsel %vm2462_vm2, %v2458_v32, %v8559_v56  ;;  %v8652_v56 = vmul.f32 %v8425_v30, %v3778_v25  ;;  %v3736_v32 = vmax.f32 %v3094_v20, 0.0  ;;  %v9830_v39 = vmax.f32 %v7925_v21, %v8244_v23  ;;  %v9833_v33 = vld [vmem:[#allocation11_spill] sm:$0xff] }
 0x49b   : > { %4865 = vmatmul.msk.f32.gmra.mxu3 %vm2601_vm3, %v2571_v15  ;;  %4977 = vmatmul.msk.f32.gmra.mxu2 %vm2601_vm3, %v2571_v15  ;;  %v8644_v43 = vmax.f32 %v9827_v40, %v3976_v5  ;;  %v8649_v51 = vmax.f32 %v9828_v42, %v4163_v44  ;;  %v8657_v7 = vmax.f32 %v9829_v24, %v3978_v61  ;;  %v8665_v26 = vsel %vm4140_vm5, %v4045_v1, -inf  ;;  %v8680_v59 = vpop.f32.mrf.mxu3  ;;  %v8682_v63 = vpop.f32.mrf.mxu2 }
 0x49c   : > { %v8662_v9 = vmax.f32 %v9830_v39, %v4182_v17  ;;  %v3423_v35 = vadd.f32 %v9831_v3, %v7804_v19  ;;  %v9832_v5 = vmax.f32 %v7939_v41, %v8249_v52  ;;  %v9834_v36 = vmax.f32 %v7948_v29, %v9833_v33  ;;  %9835 = vst [vmem:[#allocation89_spill] sm:$0xff] %v8680_v59  ;;  %v9837_v29 = vld [vmem:[#allocation78_spill] sm:$0xff]  ;;  %v9841_v33 = vld [vmem:[#allocation21_spill] sm:$0xff] }
 0x49d   : > { %v3780_v21 = vmax.f32 %v3160_v27, 0.0  ;;  %v4047_v23 = vmul.f32 %v8416_v18, %v3781_v11  ;;  %9836 = vst [vmem:[#allocation72_spill] sm:$0xff] %v8682_v63  ;;  %v3982_v61 = vmul.f32 %v8057_v55, %v3716_v38  ;;  %v4220_v25 = vsel %vm4140_vm5, %v3983_v4, -inf  ;;  %v5178_v11 = vld [vmem:[%s5669_s18 + $0x368] sm:$0xff]  ;;  %v9838_v38 = vld [vmem:[#allocation80_spill] sm:$0xff] }
 0x49e   : > { %v8672_v44 = vmax.f32 %v9832_v5, %v3980_v37  ;;  %v8677_v20 = vmax.f32 %v9834_v36, %v4201_v12  ;;  %v3984_v41 = vmul.f32 %v8057_v55, %v3718_v58  ;;  %v3985_v52 = vmul.f32 %v8463_v34, %v3719_v31  ;;  %v3141_v1 = vpop.f32.mrf.mxu0  ;;  %v9839_v58 = vld [vmem:[#allocation62_spill] sm:$0xff]  ;;  %v9842_v36 = vld [vmem:[#allocation51_spill] sm:$0xff] }
 0x49f   : > { %v1415_v17 = vpop.permute.xlu0 %1414  ;;  %v3516_v12 = vadd.f32 %v9837_v29, %v7804_v19  ;;  %v4002_v37 = vmul.f32 %v8057_v55, %v3736_v32  ;;  %v3142_v27 = vadd.f32 %v3141_v1, %v7825_v60  ;;  %v3519_v4 = vadd.f32 %v9838_v38, %v7804_v19  ;;  %v9844_v29 = vld [vmem:[#allocation30_spill] sm:$0xff]  ;;  %v9848_v38 = vld [vmem:[#allocation79_spill] sm:$0xff] }
 0x4a0   : > { %v2346_v49 = vsel %vm2236_vm0, %v5178_v11, %v1415_v17  ;;  %v1767_v15 = vpop.permute.xlu1 %1766  ;;  %v3070_v40 = vadd.f32 %v9839_v58, %v7825_v60  ;;  %v3721_v31 = vmax.f32 %v3423_v35, 0.0  ;;  %v8700_v24 = vmul.f32 %v8425_v30, %v3780_v21  ;;  %v8705_v39 = vpop.f32.mrf.mxu1  ;;  %v9845_v35 = vld [vmem:[#allocation20_spill] sm:$0xff] }
 0x4a1   : > { %v2459_v42 = vsel %vm2349_vm1, %v2346_v49, %v1767_v15  ;;  %v8703_v32 = vsel %vm4140_vm5, %v4047_v23, -inf  ;;  %9840 = vst [vmem:[#allocation75_spill] sm:$0xff] %v8705_v39  ;;  %v3768_v3 = vmax.f32 %v3142_v27, 0.0  ;;  %v9843_v17 = vmax.f32 %v9841_v33, %v9842_v36  ;;  %v9847_v23 = vld [vmem:[#allocation77_spill] sm:$0xff] }
 0x4a2   : > { %v2572_v5 = vsel %vm2462_vm2, %v2459_v42, %v2119_v62  ;;  %v9846_v11 = vmax.f32 %v9844_v29, %v9845_v35  ;;  %v4239_v21 = vsel %vm4140_vm5, %v3985_v52, -inf  ;;  %v3163_v15 = vadd.f32 %v9847_v23, %v7825_v60  ;;  %v2121_v62 = vpop.permute.xlu2 %2120  ;;  %v9860_v23 = vld [vmem:[#allocation53_spill] sm:$0xff] }
 0x4a3   : > { %v8711_v1 = vmax.f32 %v9843_v17, %v3982_v61  ;;  %4866 = vmatmul.msk.f32.gmra.mxu3 %vm2601_vm3, %v2572_v5  ;;  %4978 = vmatmul.msk.f32.gmra.mxu2 %vm2601_vm3, %v2572_v5  ;;  %v3783_v27 = vmax.f32 %v3516_v12, 0.0  ;;  %v3166_v61 = vadd.f32 %v9848_v38, %v7825_v60  ;;  %v9849_v58 = vmax.f32 %v9792_v10, %v8493_v8  ;;  %v9853_v17 = vld [vmem:[#allocation83_spill] sm:$0xff]  ;;  %v9854_v8 = vld [vmem:[#allocation84_spill] sm:$0xff]  ;;  %v8745_v35 = vpop.f32.mrf.mxu3 }
 0x4a4   : > { %v8716_v49 = vmax.f32 %v9846_v11, %v4220_v25  ;;  %v8731_v25 = vmul.f32 %v8085_v13, %v3768_v3  ;;  %v9852_v52 = vmax.f32 %v7965_v53, %v8295_v50  ;;  %v3785_v36 = vmax.f32 %v3519_v4, 0.0  ;;  %9856 = vst [vmem:[#allocation96_spill] sm:$0xff] %v8745_v35  ;;  %v8747_v11 = vpop.f32.mrf.mxu2  ;;  %v5179_v53 = vld [vmem:[%s5669_s18 + $0x370] sm:$0xff] }
 0x4a5   : > { %v8728_v42 = vmax.f32 %v9849_v58, %v4002_v37  ;;  %v3720_v5 = vmax.f32 %v3070_v40, 0.0  ;;  %v3987_v12 = vmul.f32 %v8463_v34, %v3721_v31  ;;  %v3169_v29 = vadd.f32 %v9853_v17, %v7825_v60  ;;  %v9855_v37 = vld [vmem:[#allocation64_spill] sm:$0xff]  ;;  %9857 = vst [vmem:[#allocation85_spill] sm:$0xff] %v8747_v11  ;;  %v9859_v40 = vld [vmem:[#allocation10_spill] sm:$0xff] }
 0x4a6   : > { %9851 = vst [vmem:[#allocation60_spill] sm:$0xff] %v8731_v25  ;;  %v8736_v33 = vmax.f32 %v9852_v52, %v3984_v41  ;;  %v3522_v10 = vadd.f32 %v9854_v8, %v7804_v19  ;;  %v3073_v3 = vadd.f32 %v9855_v37, %v7825_v60  ;;  %v9858_v50 = vmax.f32 %v7970_v28, %v8298_v6  ;;  %v9861_v8 = vld [vmem:[#allocation88_spill] sm:$0xff] }
 0x4a7   : > { %9850 = vst [vmem:[#allocation59_spill] sm:$0xff] %v8728_v42  ;;  %v3782_v4 = vmax.f32 %v3163_v15, 0.0  ;;  %v3426_v31 = vadd.f32 %v9859_v40, %v7804_v19  ;;  %v3429_v38 = vadd.f32 %v9860_v23, %v7804_v19  ;;  %v1417_v58 = vpop.permute.xlu0 %1416  ;;  %v4049_v52 = vmul.f32 %v8416_v18, %v3783_v27 }
 0x4a8   : > { %v8754_v41 = vmax.f32 %v9858_v50, %v4239_v21  ;;  %v3784_v17 = vmax.f32 %v3166_v61, 0.0  ;;  %v3097_v37 = vadd.f32 %v9861_v8, %v7825_v60  ;;  %v2347_v25 = vsel %vm2236_vm0, %v5179_v53, %v1417_v58  ;;  %v1769_v28 = vpop.permute.xlu1 %1768  ;;  %v3452_v27 = vpop.f32.mrf.mxu1  ;;  %v9862_v53 = vld [vmem:[#allocation68_spill] sm:$0xff] }
 0x4a9   : > { %v4051_v6 = vmul.f32 %v8416_v18, %v3785_v36  ;;  %v3986_v21 = vmul.f32 %v8057_v55, %v3720_v5  ;;  %v4258_v15 = vsel %vm4140_vm5, %v3987_v12, -inf  ;;  %v2460_v50 = vsel %vm2349_vm1, %v2347_v25, %v1769_v28 }
 0x4aa   : > { %v3786_v40 = vmax.f32 %v3169_v29, 0.0  ;;  %v3787_v23 = vmax.f32 %v3522_v10, 0.0  ;;  %v3722_v42 = vmax.f32 %v3073_v3, 0.0  ;;  %v2573_v61 = vsel %vm2462_vm2, %v2460_v50, %v2121_v62 }
 0x4ab   : > { %v8771_v8 = vmul.f32 %v8425_v30, %v3782_v4  ;;  %v3723_v39 = vmax.f32 %v3426_v31, 0.0  ;;  %v3076_v58 = vadd.f32 %v9862_v53, %v7825_v60  ;;  %v3725_v36 = vmax.f32 %v3429_v38, 0.0  ;;  %4867 = vmatmul.msk.f32.gmra.mxu3 %vm2601_vm3, %v2573_v61  ;;  %4979 = vmatmul.msk.f32.gmra.mxu2 %vm2601_vm3, %v2573_v61  ;;  %v8806_v28 = vpop.f32.mrf.mxu3  ;;  %v5180_v61 = vld [vmem:[%s5669_s18 + $0x378] sm:$0xff]  ;;  %s4667_s18 = scalar_lea.sflag [#allocation4], %s5666_s16 }
 0x4ac   : > { %v8778_v25 = vsel %vm4140_vm5, %v4049_v52, -inf  ;;  %v8781_v5 = vmul.f32 %v8425_v30, %v3784_v17  ;;  %v3432_v62 = vadd.f32 %v8323_v47, %v7804_v19  ;;  %v3738_v12 = vmax.f32 %v3097_v37, 0.0  ;;  %v2123_v52 = vpop.permute.xlu2 %2122  ;;  %9867 = vst [vmem:[#allocation103_spill] sm:$0xff] %v8806_v28  ;;  %v9871_v28 = vld [vmem:[#allocation37_spill] sm:$0xff] }
 0x4ad   : > { %v8786_v29 = vsel %vm4140_vm5, %v4051_v6, -inf  ;;  %v9863_v10 = vmax.f32 %v7979_v14, %v8301_v2  ;;  %v9864_v4 = vmax.f32 %v8011_v46, %v8343_v16  ;;  %v3453_v38 = vadd.f32 %v3452_v27, %v7804_v19  ;;  %v9866_v14 = vld [vmem:[#allocation87_spill] sm:$0xff]  ;;  %v8808_v6 = vpop.f32.mrf.mxu2 }
 0x4ae   : > { %v8800_v47 = vmul.f32 %v8425_v30, %v3786_v40  ;;  %v4053_v17 = vmul.f32 %v8416_v18, %v3787_v23  ;;  %v3988_v37 = vmul.f32 %v8057_v55, %v3722_v42  ;;  %v3525_v2 = vadd.f32 %v9866_v14, %v7804_v19  ;;  %9868 = vst [vmem:[#allocation11_spill] sm:$0xff] %v8808_v6  ;;  %v3144_v27 = vpop.f32.mrf.mxu0  ;;  %v9870_v14 = vld [vmem:[#allocation92_spill] sm:$0xff] }
 0x4af   : > { %v8791_v3 = vmax.f32 %v9863_v10, %v3986_v21  ;;  %v8796_v31 = vmax.f32 %v9864_v4, %v4258_v15  ;;  %v3989_v46 = vmul.f32 %v8463_v34, %v3723_v39  ;;  %v3724_v16 = vmax.f32 %v3076_v58, 0.0  ;;  %v9869_v15 = vld [vmem:[#allocation86_spill] sm:$0xff]  ;;  %v1419_v40 = vpop.permute.xlu0 %1418 }
 0x4b0   : > { %9865 = vst [vmem:[#allocation74_spill] sm:$0xff] %v8800_v47  ;;  %v3991_v21 = vmul.f32 %v8463_v34, %v3725_v36  ;;  %v3172_v50 = vadd.f32 %v9869_v15, %v7825_v60  ;;  %v3727_v23 = vmax.f32 %v3432_v62, 0.0  ;;  %v4004_v42 = vmul.f32 %v8057_v55, %v3738_v12  ;;  %v1771_v4 = vpop.permute.xlu1 %1770  ;;  %v3455_v12 = vpop.f32.mrf.mxu1 }
 0x4b1   : > { %v2348_v53 = vsel %vm2236_vm0, %v5180_v61, %v1419_v40  ;;  %v3145_v10 = vadd.f32 %v3144_v27, %v7825_v60  ;;  %v3100_v39 = vadd.f32 %v9870_v14, %v7825_v60  ;;  %v3741_v58 = vmax.f32 %v3453_v38, 0.0 }
 0x4b2   : > { %v8821_v36 = vperm.slane %v9871_v28, 1  ;;  %v2461_v15 = vsel %vm2349_vm1, %v2348_v53, %v1771_v4  ;;  %v8825_v6 = vsel %vm4140_vm5, %v4053_v17, -inf  ;;  %v3789_v62 = vmax.f32 %v3525_v2, 0.0  ;;  %v9878_v53 = vld [vmem:[#allocation34_spill] sm:$0xff] }
 0x4b3   : > { %9872 = vst [vmem:[#allocation78_spill] sm:$0xff] %v8825_v6  ;;  %v3770_v35 = vmax.f32 %v3145_v10, 0.0  ;;  %v2574_v40 = vsel %vm2462_vm2, %v2461_v15, %v2123_v52  ;;  %v9873_v27 = vmax.f32 %v8014_v57, %v8346_v48  ;;  %v4277_v38 = vsel %vm4140_vm5, %v3989_v46, -inf  ;;  %v9876_v57 = vld [vmem:[#allocation22_spill] sm:$0xff] }
 0x4b4   : > { %v3990_v28 = vmul.f32 %v8057_v55, %v3724_v16  ;;  %v4296_v14 = vsel %vm4140_vm5, %v3991_v21, -inf  ;;  %4868 = vmatmul.msk.f32.gmra.mxu3 %vm2601_vm3, %v2574_v40  ;;  %4980 = vmatmul.msk.f32.gmra.mxu2 %vm2601_vm3, %v2574_v40  ;;  %v3993_v17 = vmul.f32 %v8463_v34, %v3727_v23  ;;  %v9874_v52 = vmax.f32 %v9796_v22, %v8504_v0  ;;  %v3873_v21 = vld [vmem:[%s9456_s3 + $0xa] sm:$0x3]  ;;  %v9879_v0 = vld [vmem:[#allocation117_spill] sm:$0xff]  ;;  %v9884_v15 = vld [vmem:[#allocation18_spill] sm:$0xff] }
 0x4b5   : > { %v8831_v61 = vmax.f32 %v9873_v27, %v3988_v37  ;;  %v3549_v48 = vadd.f32 %v9876_v57, %v7804_v19  ;;  %v8847_v37 = vmul.f32 %v8085_v13, %v3770_v35  ;;  %v3788_v55 = vmax.f32 %v3172_v50, 0.0  ;;  %v9881_v35 = vld [vmem:[#allocation95_spill] sm:$0xff]  ;;  %v9885_v40 = vld [vmem:[#allocation116_spill] sm:$0xff] }
 0x4b6   : > { %v8842_v2 = vmax.f32 %v9874_v52, %v4004_v42  ;;  %v3740_v46 = vmax.f32 %v3100_v39, 0.0  ;;  %v4007_v16 = vmul.f32 %v8821_v36, %v3741_v58  ;;  %v3456_v23 = vadd.f32 %v3455_v12, %v7804_v19  ;;  %v8864_v39 = vpop.f32.mrf.mxu3  ;;  %v8866_v58 = vpop.f32.mrf.mxu2  ;;  %v9888_v52 = vld [vmem:[#allocation35_spill] sm:$0xff] }
 0x4b7   : > { %9877 = vst [vmem:[#allocation62_spill] sm:$0xff] %v8847_v37  ;;  %v9880_v22 = vmax.f32 %v9878_v53, %v9879_v0  ;;  %v4055_v10 = vmul.f32 %v8416_v18, %v3789_v62  ;;  %v3103_v4 = vadd.f32 %v9881_v35, %v7825_v60  ;;  %v9886_v12 = vmax.f32 %v9884_v15, %v9885_v40  ;;  %v9892_v62 = vld [vmem:[#allocation90_spill] sm:$0xff]  ;;  %v3147_v50 = vpop.f32.mrf.mxu0 }
 0x4b8   : > { %9875 = vst [vmem:[#allocation80_spill] sm:$0xff] %v8842_v2  ;;  %v8880_v0 = vadd.f32 %v9892_v62, %v7825_v60  ;;  %v4315_v37 = vsel %vm4140_vm5, %v3993_v17, -inf  ;;  %v3805_v2 = vmax.f32 %v3549_v48, 0.0  ;;  %v8889_v15 = vmul.f32 %v8425_v30, %v3788_v55  ;;  %v3458_v48 = vpop.f32.mrf.mxu1 }
 0x4b9   : > { %v8857_v42 = vmax.f32 %v9880_v22, %v4277_v38  ;;  %9882 = vst [vmem:[#allocation21_spill] sm:$0xff] %v8864_v39  ;;  %v8871_v27 = vmax.f32 %v9886_v12, %v3990_v28  ;;  %v9889_v38 = vld [vmem:[#allocation31_spill] sm:$0xff]  ;;  %v9893_v22 = vld [vmem:[#allocation17_spill] sm:$0xff]  ;;  %v8885_v39 = vperm.slane %v3873_v21, 1  ;;  %v3148_v28 = vadd.f32 %v3147_v50, %v7825_v60  ;;  %v9898_v50 = vld [vmem:[#allocation118_spill] sm:$0xff] }
 0x4ba   : > { %9883 = vst [vmem:[#allocation51_spill] sm:$0xff] %v8866_v58  ;;  %v9890_v57 = vmax.f32 %v9888_v52, %v9889_v38  ;;  %v3196_v35 = vadd.f32 %v9893_v22, %v7825_v60  ;;  %v4146_v40 = vsel %vm4140_vm5, %v4007_v16, -inf  ;;  %v3743_v12 = vmax.f32 %v3456_v23, 0.0  ;;  %v9896_v38 = vld [vmem:[#allocation91_spill] sm:$0xff]  ;;  %v9897_v22 = vld [vmem:[#allocation36_spill] sm:$0xff] }
 0x4bb   : > { %9887 = vst [vmem:[#allocation30_spill] sm:$0xff] %v8871_v27  ;;  %v8894_v52 = vsel %vm4140_vm5, %v4055_v10, -inf  ;;  %v3742_v17 = vmax.f32 %v3103_v4, 0.0  ;;  %v3772_v62 = vmax.f32 %v3148_v28, 0.0  ;;  %v9899_v58 = vmax.f32 %v9897_v22, %v9898_v50  ;;  %v3874_v23 = vld [vmem:[%s9456_s3 + $0xc] sm:$0x3] }
 0x4bc   : > { %v8876_v53 = vmax.f32 %v9890_v57, %v4296_v14  ;;  %9894 = vst [vmem:[#allocation77_spill] sm:$0xff] %v8889_v15  ;;  %v4006_v14 = vmul.f32 %v8085_v13, %v3740_v46  ;;  %v8898_v57 = vadd.f32 %v9896_v38, %v7804_v19  ;;  %v3790_v46 = vmax.f32 %v8880_v0, 0.0  ;;  %v9901_v28 = vld [vmem:[#allocation29_spill] sm:$0xff]  ;;  %v9903_v0 = vld [vmem:[#allocation55_spill] sm:$0xff] }
 0x4bd   : > { %9895 = vst [vmem:[#allocation79_spill] sm:$0xff] %v8894_v52  ;;  %v8903_v55 = vmax.f32 %v9899_v58, %v4315_v37  ;;  %v3804_v11 = vmax.f32 %v3196_v35, 0.0  ;;  %v8906_v16 = vperm.slane %v3873_v21, 0  ;;  %v4147_v10 = vmax.f32 %v8582_v45, %v4146_v40  ;;  %v9902_v37 = vld [vmem:[#allocation119_spill] sm:$0xff]  ;;  %v9904_v45 = vld [vmem:[#allocation25_spill] sm:$0xff] }
 0x4be   : > { %9891 = vst [vmem:[#allocation20_spill] sm:$0xff] %v8876_v53  ;;  %v4071_v4 = vmul.f32 %v8885_v39, %v3805_v2  ;;  %v3552_v38 = vadd.f32 %v9901_v28, %v7804_v19  ;;  %v4038_v22 = vmul.f32 %v8425_v30, %v3772_v62  ;;  %v3435_v58 = vadd.f32 %v9902_v37, %v7804_v19  ;;  %v9905_v2 = vld [vmem:[#allocation99_spill] sm:$0xff]  ;;  %v3243_v28 = vpop.f32.mrf.mxu3  ;;  %v3596_v62 = vpop.f32.mrf.mxu2 }
 0x4bf   : > { %9900 = vst [vmem:[#allocation83_spill] sm:$0xff] %v8903_v55  ;;  %v4136_v35 = vmax.f32 %v9903_v0, %v4006_v14  ;;  %v4009_v21 = vmul.f32 %v8821_v36, %v3743_v12  ;;  %v3459_v50 = vadd.f32 %v3458_v48, %v7804_v19  ;;  %v4008_v59 = vmul.f32 %v8085_v13, %v3742_v17  ;;  %v9906_v48 = vld [vmem:[#allocation66_spill] sm:$0xff] }
 0x4c0   : > { %v3199_v40 = vadd.f32 %v9904_v45, %v7825_v60  ;;  %v3106_v63 = vadd.f32 %v9905_v2, %v7825_v60  ;;  %v8926_v54 = vperm.slane %v3874_v23, 0  ;;  %v3244_v37 = vadd.f32 %v3243_v28, %v7825_v60 }
 0x4c1   : > { %v4137_v55 = vmax.f32 %v4136_v35, %v4038_v22  ;;  %v3597_v14 = vadd.f32 %v3596_v62, %v7804_v19  ;;  %v8930_v12 = vperm.slane %v3874_v23, 1  ;;  %v4149_v0 = vmax.f32 %v4147_v10, %v9906_v48  ;;  %v3461_v23 = vpop.f32.mrf.mxu1 }
 0x4c2   : > { %v4070_v17 = vmul.f32 %v8906_v16, %v3804_v11  ;;  %v4150_v45 = vsel %vm4140_vm5, %v4071_v4, -inf  ;;  %v3807_v52 = vmax.f32 %v3552_v38, 0.0  ;;  %v4165_v2 = vsel %vm4140_vm5, %v4009_v21, -inf }
 0x4c3   : > { %v3745_v15 = vmax.f32 %v3459_v50, 0.0  ;;  %v3836_v53 = vmax.f32 %v3244_v37, 0.0  ;;  %v3837_v27 = vmax.f32 %v3597_v14, 0.0  ;;  %v3791_v22 = vmax.f32 %v8898_v57, 0.0  ;;  %v9907_v50 = vld [vmem:[#allocation112_spill] sm:$0xff] }
 0x4c4   : > { %v3729_v35 = vmax.f32 %v3435_v58, 0.0  ;;  %v4156_v28 = vmax.f32 %v8644_v43, %v4008_v59  ;;  %v3744_v62 = vmax.f32 %v3106_v63, 0.0  ;;  %v3806_v6 = vmax.f32 %v3199_v40, 0.0 }
 0x4c5   : > { %v4138_v47 = vmax.f32 %v4137_v55, %v4070_v17  ;;  %v4102_v10 = vmul.f32 %v8926_v54, %v3836_v53  ;;  %v4103_v11 = vmul.f32 %v8930_v12, %v3837_v27  ;;  %v4151_v4 = vmax.f32 %v4149_v0, %v4150_v45  ;;  %v9908_v55 = vld [vmem:[#allocation70_spill] sm:$0xff] }
 0x4c6   : > { %v4166_v38 = vmax.f32 %v8649_v51, %v4165_v2  ;;  %v4073_v21 = vmul.f32 %v8885_v39, %v3807_v52  ;;  %v3555_v37 = vadd.f32 %v9907_v50, %v7804_v19  ;;  %v4011_v57 = vmul.f32 %v8821_v36, %v3745_v15  ;;  %v9909_v27 = vld [vmem:[#allocation102_spill] sm:$0xff]  ;;  %v3246_v14 = vpop.f32.mrf.mxu3  ;;  %v3599_v52 = vpop.f32.mrf.mxu2  ;;  %v9911_v2 = vld [vmem:[#allocation81_spill] sm:$0xff] }
 0x4c7   : > { %v3462_v43 = vadd.f32 %v3461_v23, %v7804_v19  ;;  %v4139_v59 = vmax.f32 %v4138_v47, %v4102_v10  ;;  %v4152_v63 = vsel %vm4140_vm5, %v4103_v11, -inf  ;;  %v4157_v58 = vmax.f32 %v4156_v28, %v9908_v55  ;;  %v9910_v0 = vld [vmem:[#allocation110_spill] sm:$0xff] }
 0x4c8   : > { %v4010_v53 = vmul.f32 %v8085_v13, %v3744_v62  ;;  %v3109_v40 = vadd.f32 %v9909_v27, %v7825_v60  ;;  %v4153_v51 = vmax.f32 %v4151_v4, %v4152_v63  ;;  %v4072_v48 = vmul.f32 %v8906_v16, %v3806_v6 }
 0x4c9   : > { %v3202_v15 = vadd.f32 %v9910_v0, %v7825_v60  ;;  %v3247_v17 = vadd.f32 %v3246_v14, %v7825_v60  ;;  %v3600_v47 = vadd.f32 %v3599_v52, %v7804_v19  ;;  %4536 = vmatmul.f32.vlgmr.msrb.gmra.mxu2 %v4139_v59  ;;  %v8957_v45 = vmul.f32 %v8425_v30, %v3790_v46  ;;  %v3464_v55 = vpop.f32.mrf.mxu1  ;;  %v9912_v14 = vld [vmem:[#allocation38_spill] sm:$0xff]  ;;  %v9913_v52 = vld [vmem:[#allocation76_spill] sm:$0xff] }
 0x4ca   : > { %v4168_v28 = vmax.f32 %v4166_v38, %v9911_v2  ;;  %v4169_v62 = vsel %vm4140_vm5, %v4073_v21, -inf  ;;  %v3809_v23 = vmax.f32 %v3555_v37, 0.0  ;;  %4982 = vmatmul.msk.f32.vlgmr.msrb.gmra.mxu3 %vm4140_vm5, %v4153_v51  ;;  %v4184_v6 = vsel %vm4140_vm5, %v4011_v57, -inf }
 0x4cb   : > { %v3747_v10 = vmax.f32 %v3462_v43, 0.0  ;;  %v3838_v11 = vmax.f32 %v3247_v17, 0.0  ;;  %v3839_v4 = vmax.f32 %v3600_v47, 0.0  ;;  %v4057_v50 = vmul.f32 %v8416_v18, %v3791_v22 }
 0x4cc   : > { %v3995_v63 = vmul.f32 %v8463_v34, %v3729_v35  ;;  %v4175_v59 = vmax.f32 %v8657_v7, %v4010_v53  ;;  %v3746_v46 = vmax.f32 %v3109_v40, 0.0  ;;  %v3808_v27 = vmax.f32 %v3202_v15, 0.0 }
 0x4cd   : > { %v4104_v38 = vmul.f32 %v8926_v54, %v3838_v11  ;;  %v4105_v21 = vmul.f32 %v8930_v12, %v3839_v4  ;;  %v4158_v37 = vmax.f32 %v4157_v58, %v4072_v48  ;;  %v4170_v51 = vmax.f32 %v4168_v28, %v4169_v62  ;;  %v9914_v58 = vld [vmem:[#allocation106_spill] sm:$0xff]  ;;  %v9915_v28 = vld [vmem:[#allocation45_spill] sm:$0xff] }
 0x4ce   : > { %v4185_v57 = vmax.f32 %v8662_v9, %v4184_v6  ;;  %v4075_v43 = vmul.f32 %v8885_v39, %v3809_v23  ;;  %v3558_v22 = vadd.f32 %v9912_v14, %v7804_v19  ;;  %v4013_v35 = vmul.f32 %v8821_v36, %v3747_v10  ;;  %v3249_v17 = vpop.f32.mrf.mxu3  ;;  %v3602_v47 = vpop.f32.mrf.mxu2  ;;  %v9916_v11 = vld [vmem:[#allocation13_spill] sm:$0xff] }
 0x4cf   : > { %v3465_v7 = vadd.f32 %v3464_v55, %v7804_v19  ;;  %v4171_v53 = vsel %vm4140_vm5, %v4105_v21, -inf  ;;  %v4159_v40 = vmax.f32 %v4158_v37, %v4104_v38  ;;  %v4176_v0 = vmax.f32 %v4175_v59, %v9913_v52 }
 0x4d0   : > { %v4012_v15 = vmul.f32 %v8085_v13, %v3746_v46  ;;  %v3112_v48 = vadd.f32 %v9914_v58, %v7825_v60  ;;  %v4172_v9 = vmax.f32 %v4170_v51, %v4171_v53  ;;  %v4074_v2 = vmul.f32 %v8906_v16, %v3808_v27  ;;  %v9917_v51 = vld [vmem:[#allocation93_spill] sm:$0xff] }
 0x4d1   : > { %v3205_v62 = vadd.f32 %v9915_v28, %v7825_v60  ;;  %v3250_v23 = vadd.f32 %v3249_v17, %v7825_v60  ;;  %v3603_v6 = vadd.f32 %v3602_v47, %v7804_v19  ;;  %4539 = vmatmul.f32.gmra.mxu2 %v4159_v40  ;;  %v8985_v10 = vsel %vm4140_vm5, %v4057_v50, -inf }
 0x4d2   : > { %v4187_v4 = vmax.f32 %v4185_v57, %v9916_v11  ;;  %v4188_v59 = vsel %vm4140_vm5, %v4075_v43, -inf  ;;  %v3811_v46 = vmax.f32 %v3558_v22, 0.0  ;;  %4983 = vmatmul.msk.f32.gmra.mxu3 %vm4140_vm5, %v4172_v9  ;;  %v4203_v55 = vsel %vm4140_vm5, %v4013_v35, -inf  ;;  %v3467_v57 = vpop.f32.mrf.mxu1  ;;  %v9920_v11 = vld [vmem:[#allocation7_spill] sm:$0xff] }
 0x4d3   : > { %v3749_v27 = vmax.f32 %v3465_v7, 0.0  ;;  %v3840_v38 = vmax.f32 %v3250_v23, 0.0  ;;  %v3841_v21 = vmax.f32 %v3603_v6, 0.0  ;;  %v4334_v37 = vsel %vm4140_vm5, %v3995_v63, -inf  ;;  %v9918_v63 = vld [vmem:[#allocation113_spill] sm:$0xff] }
 0x4d4   : > { %v8994_v14 = vadd.f32 %v9917_v51, %v7825_v60  ;;  %v4194_v50 = vmax.f32 %v8672_v44, %v4012_v15  ;;  %v3748_v53 = vmax.f32 %v3112_v48, 0.0  ;;  %v3810_v40 = vmax.f32 %v3205_v62, 0.0 }
 0x4d5   : > { %v4106_v43 = vmul.f32 %v8926_v54, %v3840_v38  ;;  %v4107_v22 = vmul.f32 %v8930_v12, %v3841_v21  ;;  %v4177_v52 = vmax.f32 %v4176_v0, %v4074_v2  ;;  %v4189_v35 = vmax.f32 %v4187_v4, %v4188_v59  ;;  %v9919_v0 = vld [vmem:[#allocation109_spill] sm:$0xff] }
 0x4d6   : > { %v4204_v7 = vmax.f32 %v8677_v20, %v4203_v55  ;;  %v4077_v58 = vmul.f32 %v8885_v39, %v3811_v46  ;;  %v3561_v9 = vadd.f32 %v9918_v63, %v7804_v19  ;;  %v4015_v17 = vmul.f32 %v8821_v36, %v3749_v27  ;;  %v3252_v62 = vpop.f32.mrf.mxu3  ;;  %v3605_v23 = vpop.f32.mrf.mxu2 }
 0x4d7   : > { %v3468_v44 = vadd.f32 %v3467_v57, %v7804_v19  ;;  %v4190_v15 = vsel %vm4140_vm5, %v4107_v22, -inf  ;;  %v4178_v48 = vmax.f32 %v4177_v52, %v4106_v43  ;;  %v4195_v47 = vmax.f32 %v4194_v50, %v8652_v56  ;;  %v9921_v56 = vld [vmem:[#allocation94_spill] sm:$0xff]  ;;  %v9923_v43 = vld [vmem:[#allocation120_spill] sm:$0xff] }
 0x4d8   : > { %v4014_v28 = vmul.f32 %v8085_v13, %v3748_v53  ;;  %v3115_v2 = vadd.f32 %v9919_v0, %v7825_v60  ;;  %v4191_v20 = vmax.f32 %v4189_v35, %v4190_v15  ;;  %v4076_v6 = vmul.f32 %v8906_v16, %v3810_v40  ;;  %v9922_v40 = vld [vmem:[#allocation111_spill] sm:$0xff] }
 0x4d9   : > { %v3208_v4 = vadd.f32 %v9920_v11, %v7825_v60  ;;  %v3253_v59 = vadd.f32 %v3252_v62, %v7825_v60  ;;  %v3606_v46 = vadd.f32 %v3605_v23, %v7804_v19  ;;  %4542 = vmatmul.f32.gmra.mxu2 %v4178_v48  ;;  %v9017_v55 = vadd.f32 %v9921_v56, %v7804_v19  ;;  %v9925_v35 = vld [vmem:[#allocation63_spill] sm:$0xff] }
 0x4da   : > { %v4206_v27 = vmax.f32 %v4204_v7, %v8665_v26  ;;  %v4207_v38 = vsel %vm4140_vm5, %v4077_v58, -inf  ;;  %v3813_v21 = vmax.f32 %v3561_v9, 0.0  ;;  %4984 = vmatmul.msk.f32.gmra.mxu3 %vm4140_vm5, %v4191_v20  ;;  %v4222_v51 = vsel %vm4140_vm5, %v4015_v17, -inf  ;;  %v3470_v58 = vpop.f32.mrf.mxu1  ;;  %v9926_v20 = vld [vmem:[#allocation52_spill] sm:$0xff] }
 0x4db   : > { %v3751_v50 = vmax.f32 %v3468_v44, 0.0  ;;  %v3842_v53 = vmax.f32 %v3253_v59, 0.0  ;;  %v3843_v57 = vmax.f32 %v3606_v46, 0.0  ;;  %v9924_v22 = vmax.f32 %v9922_v40, %v9923_v43 }
 0x4dc   : > { %v9030_v63 = vadd.f32 %v9925_v35, %v7804_v19  ;;  %v4213_v26 = vmax.f32 %v8711_v1, %v4014_v28  ;;  %v3750_v7 = vmax.f32 %v3115_v2, 0.0  ;;  %v3812_v9 = vmax.f32 %v3208_v4, 0.0 }
 0x4dd   : > { %v9026_v52 = vmax.f32 %v9924_v22, %v4334_v37  ;;  %v4108_v15 = vmul.f32 %v8926_v54, %v3842_v53  ;;  %v4109_v17 = vmul.f32 %v8930_v12, %v3843_v57  ;;  %v4196_v44 = vmax.f32 %v4195_v47, %v4076_v6  ;;  %v9927_v47 = vld [vmem:[#allocation9_spill] sm:$0xff] }
 0x4de   : > { %v4208_v48 = vmax.f32 %v4206_v27, %v4207_v38  ;;  %v4223_v0 = vmax.f32 %v8716_v49, %v4222_v51  ;;  %v4079_v37 = vmul.f32 %v8885_v39, %v3813_v21  ;;  %v3564_v62 = vadd.f32 %v9926_v20, %v7804_v19  ;;  %v3255_v59 = vpop.f32.mrf.mxu3  ;;  %v3608_v46 = vpop.f32.mrf.mxu2  ;;  %v9928_v27 = vld [vmem:[#allocation8_spill] sm:$0xff] }
 0x4df   : > { %v4017_v23 = vmul.f32 %v8821_v36, %v3751_v50  ;;  %v3471_v1 = vadd.f32 %v3470_v58, %v7804_v19  ;;  %v4209_v28 = vsel %vm4140_vm5, %v4109_v17, -inf  ;;  %v4197_v2 = vmax.f32 %v4196_v44, %v4108_v15  ;;  %v9929_v20 = vld [vmem:[#allocation16_spill] sm:$0xff] }
 0x4e0   : > { %v4214_v11 = vmax.f32 %v4213_v26, %v8700_v24  ;;  %v4016_v4 = vmul.f32 %v8085_v13, %v3750_v7  ;;  %v3118_v6 = vadd.f32 %v9927_v47, %v7825_v60  ;;  %v4210_v49 = vmax.f32 %v4208_v48, %v4209_v28 }
 0x4e1   : > { %v4078_v56 = vmul.f32 %v8906_v16, %v3812_v9  ;;  %v3211_v38 = vadd.f32 %v9928_v27, %v7825_v60  ;;  %v3256_v21 = vadd.f32 %v3255_v59, %v7825_v60  ;;  %v3609_v51 = vadd.f32 %v3608_v46, %v7804_v19  ;;  %4545 = vmatmul.f32.gmra.mxu2 %v4197_v2  ;;  %v9930_v2 = vld [vmem:[#allocation26_spill] sm:$0xff] }
 0x4e2   : > { %v3792_v24 = vmax.f32 %v8994_v14, 0.0  ;;  %v4225_v50 = vmax.f32 %v4223_v0, %v8703_v32  ;;  %v4226_v53 = vsel %vm4140_vm5, %v4079_v37, -inf  ;;  %v3815_v57 = vmax.f32 %v3564_v62, 0.0  ;;  %4985 = vmatmul.msk.f32.gmra.mxu3 %vm4140_vm5, %v4210_v49  ;;  %v3473_v14 = vpop.f32.mrf.mxu1  ;;  %v9931_v49 = vld [vmem:[#allocation12_spill] sm:$0xff] }
 0x4e3   : > { %v4241_v40 = vsel %vm4140_vm5, %v4017_v23, -inf  ;;  %v3753_v43 = vmax.f32 %v3471_v1, 0.0  ;;  %v3844_v22 = vmax.f32 %v3256_v21, 0.0  ;;  %v3845_v35 = vmax.f32 %v3609_v51, 0.0 }
 0x4e4   : > { %v3793_v26 = vmax.f32 %v9017_v55, 0.0  ;;  %v3731_v7 = vmax.f32 %v9030_v63, 0.0  ;;  %v4232_v58 = vmax.f32 %v8736_v33, %v4016_v4  ;;  %v3752_v9 = vmax.f32 %v3118_v6, 0.0 }
 0x4e5   : > { %v3814_v15 = vmax.f32 %v3211_v38, 0.0  ;;  %v4110_v32 = vmul.f32 %v8926_v54, %v3844_v22  ;;  %v4111_v17 = vmul.f32 %v8930_v12, %v3845_v35  ;;  %v4215_v44 = vmax.f32 %v4214_v11, %v4078_v56 }
 0x4e6   : > { %v4227_v48 = vmax.f32 %v4225_v50, %v4226_v53  ;;  %v4242_v0 = vmax.f32 %v8754_v41, %v4241_v40  ;;  %v4081_v37 = vmul.f32 %v8885_v39, %v3815_v57  ;;  %v3567_v55 = vadd.f32 %v9929_v20, %v7804_v19  ;;  %v3258_v4 = vpop.f32.mrf.mxu3  ;;  %v3611_v47 = vpop.f32.mrf.mxu2 }
 0x4e7   : > { %v4019_v63 = vmul.f32 %v8821_v36, %v3753_v43  ;;  %v3474_v33 = vadd.f32 %v3473_v14, %v7804_v19  ;;  %v4228_v62 = vsel %vm4140_vm5, %v4111_v17, -inf  ;;  %v4216_v23 = vmax.f32 %v4215_v44, %v4110_v32  ;;  %v9932_v44 = vld [vmem:[#allocation115_spill] sm:$0xff] }
 0x4e8   : > { %v4233_v1 = vmax.f32 %v4232_v58, %v8771_v8  ;;  %v4018_v28 = vmul.f32 %v8085_v13, %v3752_v9  ;;  %v3121_v11 = vadd.f32 %v9930_v2, %v7825_v60  ;;  %v4229_v41 = vmax.f32 %v4227_v48, %v4228_v62 }
 0x4e9   : > { %v4080_v6 = vmul.f32 %v8906_v16, %v3814_v15  ;;  %v3214_v59 = vadd.f32 %v9931_v49, %v7825_v60  ;;  %v3259_v46 = vadd.f32 %v3258_v4, %v7825_v60  ;;  %v3612_v56 = vadd.f32 %v3611_v47, %v7804_v19  ;;  %4548 = vmatmul.f32.gmra.mxu2 %v4216_v23 }
 0x4ea   : > { %v9078_v8 = vmul.f32 %v8425_v30, %v3792_v24  ;;  %v4244_v27 = vmax.f32 %v4242_v0, %v8778_v25  ;;  %v4245_v38 = vsel %vm4140_vm5, %v4081_v37, -inf  ;;  %v3817_v21 = vmax.f32 %v3567_v55, 0.0  ;;  %4986 = vmatmul.msk.f32.gmra.mxu3 %vm4140_vm5, %v4229_v41  ;;  %v3476_v35 = vpop.f32.mrf.mxu1  ;;  %v9933_v55 = vld [vmem:[#allocation32_spill] sm:$0xff] }
 0x4eb   : > { %v4260_v51 = vsel %vm4140_vm5, %v4019_v63, -inf  ;;  %v3755_v50 = vmax.f32 %v3474_v33, 0.0  ;;  %v3846_v53 = vmax.f32 %v3259_v46, 0.0  ;;  %v3847_v57 = vmax.f32 %v3612_v56, 0.0 }
 0x4ec   : > { %v4059_v40 = vmul.f32 %v8416_v18, %v3793_v26  ;;  %v3997_v43 = vmul.f32 %v8463_v34, %v3731_v7  ;;  %v4251_v22 = vmax.f32 %v8791_v3, %v4018_v28  ;;  %v3754_v24 = vmax.f32 %v3121_v11, 0.0 }
 0x4ed   : > { %v3816_v58 = vmax.f32 %v3214_v59, 0.0  ;;  %v4112_v25 = vmul.f32 %v8926_v54, %v3846_v53  ;;  %v4113_v9 = vmul.f32 %v8930_v12, %v3847_v57  ;;  %v4234_v14 = vmax.f32 %v4233_v1, %v4080_v6  ;;  %v9934_v1 = vld [vmem:[#allocation114_spill] sm:$0xff] }
 0x4ee   : > { %v4246_v15 = vmax.f32 %v4244_v27, %v4245_v38  ;;  %v4261_v32 = vmax.f32 %v8796_v31, %v4260_v51  ;;  %v4083_v17 = vmul.f32 %v8885_v39, %v3817_v21  ;;  %v3570_v26 = vadd.f32 %v9932_v44, %v7804_v19  ;;  %v3261_v33 = vpop.f32.mrf.mxu3  ;;  %v3614_v62 = vpop.f32.mrf.mxu2  ;;  %v9935_v27 = vld [vmem:[#allocation97_spill] sm:$0xff] }
 0x4ef   : > { %v4021_v7 = vmul.f32 %v8821_v36, %v3755_v50  ;;  %v3477_v3 = vadd.f32 %v3476_v35, %v7804_v19  ;;  %v4247_v48 = vsel %vm4140_vm5, %v4113_v9, -inf  ;;  %v4235_v0 = vmax.f32 %v4234_v14, %v4112_v25 }
 0x4f0   : > { %v4252_v37 = vmax.f32 %v4251_v22, %v8781_v5  ;;  %v4020_v20 = vmul.f32 %v8085_v13, %v3754_v24  ;;  %v3124_v63 = vadd.f32 %v9933_v55, %v7825_v60  ;;  %v4248_v31 = vmax.f32 %v4246_v15, %v4247_v48  ;;  %v9937_v15 = vld [vmem:[#allocation33_spill] sm:$0xff] }
 0x4f1   : > { %v4082_v23 = vmul.f32 %v8906_v16, %v3816_v58  ;;  %v3217_v28 = vadd.f32 %v9934_v1, %v7825_v60  ;;  %v3262_v2 = vadd.f32 %v3261_v33, %v7825_v60  ;;  %v3615_v11 = vadd.f32 %v3614_v62, %v7804_v19  ;;  %4551 = vmatmul.f32.gmra.mxu2 %v4235_v0  ;;  %v9939_v0 = vld [vmem:[#allocation58_spill] sm:$0xff] }
 0x4f2   : > { %v9106_v5 = vsel %vm4140_vm5, %v4059_v40, -inf  ;;  %v4263_v41 = vmax.f32 %v4261_v32, %v8786_v29  ;;  %v4264_v4 = vsel %vm4140_vm5, %v4083_v17, -inf  ;;  %v3819_v47 = vmax.f32 %v3570_v26, 0.0  ;;  %4987 = vmatmul.msk.f32.gmra.mxu3 %vm4140_vm5, %v4248_v31  ;;  %v3479_v29 = vpop.f32.mrf.mxu1  ;;  %v9938_v17 = vld [vmem:[#allocation74_spill] sm:$0xff] }
 0x4f3   : > { %v4279_v6 = vsel %vm4140_vm5, %v4021_v7, -inf  ;;  %v3757_v49 = vmax.f32 %v3477_v3, 0.0  ;;  %v3848_v59 = vmax.f32 %v3262_v2, 0.0  ;;  %v3849_v46 = vmax.f32 %v3615_v11, 0.0  ;;  %v9941_v33 = vld [vmem:[#allocation78_spill] sm:$0xff] }
 0x4f4   : > { %v4353_v56 = vsel %vm4140_vm5, %v3997_v43, -inf  ;;  %v9115_v38 = vadd.f32 %v9935_v27, %v7825_v60  ;;  %v4270_v21 = vmax.f32 %v8831_v61, %v4020_v20  ;;  %v3756_v51 = vmax.f32 %v3124_v63, 0.0  ;;  %v9936_v43 = vld [vmem:[#allocation44_spill] sm:$0xff]  ;;  %v9940_v63 = vld [vmem:[#allocation98_spill] sm:$0xff] }
 0x4f5   : > { %v3818_v50 = vmax.f32 %v3217_v28, 0.0  ;;  %v4114_v53 = vmul.f32 %v8926_v54, %v3848_v59  ;;  %v4115_v57 = vmul.f32 %v8930_v12, %v3849_v46  ;;  %v4253_v40 = vmax.f32 %v4252_v37, %v4082_v23  ;;  %v9945_v46 = vld [vmem:[#allocation30_spill] sm:$0xff] }
 0x4f6   : > { %v4265_v22 = vmax.f32 %v4263_v41, %v4264_v4  ;;  %v4280_v24 = vmax.f32 %v8857_v42, %v4279_v6  ;;  %v4085_v35 = vmul.f32 %v8885_v39, %v3819_v47  ;;  %v3573_v58 = vadd.f32 %v9936_v43, %v7804_v19  ;;  %v3264_v7 = vpop.f32.mrf.mxu3  ;;  %v3617_v3 = vpop.f32.mrf.mxu2  ;;  %v9942_v41 = vld [vmem:[#allocation39_spill] sm:$0xff]  ;;  %v9943_v4 = vld [vmem:[#allocation121_spill] sm:$0xff] }
 0x4f7   : > { %v4023_v25 = vmul.f32 %v8821_v36, %v3757_v49  ;;  %v3480_v61 = vadd.f32 %v3479_v29, %v7804_v19  ;;  %v4266_v9 = vsel %vm4140_vm5, %v4115_v57, -inf  ;;  %v4254_v14 = vmax.f32 %v4253_v40, %v4114_v53  ;;  %v9946_v40 = vld [vmem:[#allocation20_spill] sm:$0xff] }
 0x4f8   : > { %v3441_v32 = vadd.f32 %v9937_v15, %v7804_v19  ;;  %v4271_v44 = vmax.f32 %v4270_v21, %v9938_v17  ;;  %v4022_v26 = vmul.f32 %v8085_v13, %v3756_v51  ;;  %v4267_v42 = vmax.f32 %v4265_v22, %v4266_v9 }
 0x4f9   : > { %v4084_v48 = vmul.f32 %v8906_v16, %v3818_v50  ;;  %v3220_v37 = vadd.f32 %v9939_v0, %v7825_v60  ;;  %v3265_v20 = vadd.f32 %v3264_v7, %v7825_v60  ;;  %v3618_v55 = vadd.f32 %v3617_v3, %v7804_v19  ;;  %4554 = vmatmul.f32.gmra.mxu2 %v4254_v14  ;;  %v9948_v14 = vld [vmem:[#allocation77_spill] sm:$0xff] }
 0x4fa   : > { %v3534_v31 = vadd.f32 %v9940_v63, %v7804_v19  ;;  %v4282_v62 = vmax.f32 %v4280_v24, %v9941_v33  ;;  %v4283_v13 = vsel %vm4140_vm5, %v4085_v35, -inf  ;;  %v3821_v23 = vmax.f32 %v3573_v58, 0.0  ;;  %4988 = vmatmul.msk.f32.gmra.mxu3 %vm4140_vm5, %v4267_v42  ;;  %v3482_v21 = vpop.f32.mrf.mxu1  ;;  %v9949_v42 = vld [vmem:[#allocation61_spill] sm:$0xff] }
 0x4fb   : > { %v4298_v1 = vsel %vm4140_vm5, %v4023_v25, -inf  ;;  %v3759_v28 = vmax.f32 %v3480_v61, 0.0  ;;  %v3850_v2 = vmax.f32 %v3265_v20, 0.0  ;;  %v3851_v11 = vmax.f32 %v3618_v55, 0.0 }
 0x4fc   : > { %v9944_v47 = vmax.f32 %v9942_v41, %v9943_v4  ;;  %v3794_v49 = vmax.f32 %v9115_v38, 0.0  ;;  %v3733_v59 = vmax.f32 %v3441_v32, 0.0  ;;  %v4289_v27 = vmax.f32 %v9945_v46, %v4022_v26 }
 0x4fd   : > { %v3820_v51 = vmax.f32 %v3220_v37, 0.0  ;;  %v4116_v29 = vmul.f32 %v8926_v54, %v3850_v2  ;;  %v4117_v50 = vmul.f32 %v8930_v12, %v3851_v11  ;;  %v4272_v53 = vmax.f32 %v4271_v44, %v4084_v48  ;;  %v9950_v37 = vld [vmem:[#allocation79_spill] sm:$0xff]  ;;  %v9952_v11 = vld [vmem:[#allocation101_spill] sm:$0xff] }
 0x4fe   : > { %v9145_v6 = vmax.f32 %v9944_v47, %v4353_v56  ;;  %v4284_v57 = vmax.f32 %v4282_v62, %v4283_v13  ;;  %v4299_v22 = vmax.f32 %v9946_v40, %v4298_v1  ;;  %v4087_v24 = vmul.f32 %v8885_v39, %v3821_v23  ;;  %v9947_v56 = vld [vmem:[#allocation54_spill] sm:$0xff]  ;;  %v3267_v17 = vpop.f32.mrf.mxu3  ;;  %v3620_v44 = vpop.f32.mrf.mxu2 }
 0x4ff   : > { %v3576_v35 = vadd.f32 %v9947_v56, %v7804_v19  ;;  %v4025_v38 = vmul.f32 %v8821_v36, %v3759_v28  ;;  %v3483_v43 = vadd.f32 %v3482_v21, %v7804_v19  ;;  %v4285_v58 = vsel %vm4140_vm5, %v4117_v50, -inf  ;;  %v9951_v28 = vld [vmem:[#allocation100_spill] sm:$0xff]  ;;  %v9953_v21 = vld [vmem:[#allocation83_spill] sm:$0xff] }
 0x500   : > { %v4273_v25 = vmax.f32 %v4272_v53, %v4116_v29  ;;  %v3795_v61 = vmax.f32 %v3534_v31, 0.0  ;;  %v3999_v9 = vmul.f32 %v8463_v34, %v3733_v59  ;;  %v4290_v15 = vmax.f32 %v4289_v27, %v9948_v14  ;;  %v9954_v50 = vld [vmem:[#allocation47_spill] sm:$0xff] }
 0x501   : > { %v4286_v32 = vmax.f32 %v4284_v57, %v4285_v58  ;;  %v4086_v26 = vmul.f32 %v8906_v16, %v3820_v51  ;;  %v3223_v7 = vadd.f32 %v9949_v42, %v7825_v60  ;;  %v3268_v3 = vadd.f32 %v3267_v17, %v7825_v60  ;;  %v9957_v58 = vld [vmem:[#allocation43_spill] sm:$0xff] }
 0x502   : > { %v3621_v48 = vadd.f32 %v3620_v44, %v7804_v19  ;;  %4557 = vmatmul.f32.gmra.mxu2 %v4273_v25  ;;  %v9166_v0 = vmul.f32 %v8425_v30, %v3794_v49  ;;  %v4301_v20 = vmax.f32 %v4299_v22, %v9950_v37  ;;  %v4302_v55 = vsel %vm4140_vm5, %v4087_v24, -inf  ;;  %v3485_v4 = vpop.f32.mrf.mxu1  ;;  %v9959_v17 = vld [vmem:[#allocation71_spill] sm:$0xff] }
 0x503   : > { %v3823_v63 = vmax.f32 %v3576_v35, 0.0  ;;  %4989 = vmatmul.msk.f32.gmra.mxu3 %vm4140_vm5, %v4286_v32  ;;  %v4317_v31 = vsel %vm4140_vm5, %v4025_v38, -inf  ;;  %v3761_v33 = vmax.f32 %v3483_v43, 0.0  ;;  %v3852_v62 = vmax.f32 %v3268_v3, 0.0  ;;  %v9955_v35 = vld [vmem:[#allocation49_spill] sm:$0xff] }
 0x504   : > { %v3853_v13 = vmax.f32 %v3621_v48, 0.0  ;;  %v4061_v23 = vmul.f32 %v8416_v18, %v3795_v61  ;;  %v4372_v1 = vsel %vm4140_vm5, %v3999_v9, -inf  ;;  %v3184_v2 = vadd.f32 %v9951_v28, %v7825_v60  ;;  %v9956_v43 = vld [vmem:[#allocation41_spill] sm:$0xff] }
 0x505   : > { %v9178_v41 = vadd.f32 %v9952_v11, %v7804_v19  ;;  %v3822_v47 = vmax.f32 %v3223_v7, 0.0  ;;  %v4118_v49 = vmul.f32 %v8926_v54, %v3852_v62  ;;  %v4291_v46 = vmax.f32 %v4290_v15, %v4086_v26 }
 0x506   : > { %v4119_v59 = vmul.f32 %v8930_v12, %v3853_v13  ;;  %v4303_v27 = vmax.f32 %v4301_v20, %v4302_v55  ;;  %v4318_v51 = vmax.f32 %v9953_v21, %v4317_v31  ;;  %v4089_v29 = vmul.f32 %v8885_v39, %v3823_v63  ;;  %v3270_v14 = vpop.f32.mrf.mxu3  ;;  %v3623_v15 = vpop.f32.mrf.mxu2  ;;  %v9960_v31 = vld [vmem:[#allocation42_spill] sm:$0xff] }
 0x507   : > { %v3579_v53 = vadd.f32 %v9954_v50, %v7804_v19  ;;  %v4027_v57 = vmul.f32 %v8821_v36, %v3761_v33  ;;  %v3486_v40 = vadd.f32 %v3485_v4, %v7804_v19  ;;  %v4292_v24 = vmax.f32 %v4291_v46, %v4118_v49  ;;  %v9961_v33 = vld [vmem:[#allocation122_spill] sm:$0xff] }
 0x508   : > { %v4304_v22 = vsel %vm4140_vm5, %v4119_v59, -inf  ;;  %v3796_v56 = vmax.f32 %v3184_v2, 0.0  ;;  %v3444_v38 = vadd.f32 %v9955_v35, %v7804_v19  ;;  %v9958_v25 = vmax.f32 %v9956_v43, %v9957_v58 }
 0x509   : > { %v4305_v9 = vmax.f32 %v4303_v27, %v4304_v22  ;;  %v4088_v32 = vmul.f32 %v8906_v16, %v3822_v47  ;;  %v3226_v44 = vadd.f32 %v9959_v17, %v7825_v60  ;;  %v3271_v26 = vadd.f32 %v3270_v14, %v7825_v60  ;;  %v9965_v22 = vld [vmem:[#allocation48_spill] sm:$0xff] }
 0x50a   : > { %v4309_v61 = vmax.f32 %v9958_v25, %v8957_v45  ;;  %v3624_v42 = vadd.f32 %v3623_v15, %v7804_v19  ;;  %4560 = vmatmul.f32.gmra.mxu2 %v4292_v24  ;;  %v9201_v7 = vsel %vm4140_vm5, %v4061_v23, -inf  ;;  %v4320_v3 = vmax.f32 %v4318_v51, %v8985_v10  ;;  %v3488_v2 = vpop.f32.mrf.mxu1  ;;  %v9968_v25 = vld [vmem:[#allocation56_spill] sm:$0xff] }
 0x50b   : > { %v4321_v45 = vsel %vm4140_vm5, %v4089_v29, -inf  ;;  %v3825_v48 = vmax.f32 %v3579_v53, 0.0  ;;  %4990 = vmatmul.msk.f32.gmra.mxu3 %vm4140_vm5, %v4305_v9  ;;  %v4336_v37 = vsel %vm4140_vm5, %v4027_v57, -inf  ;;  %v3763_v20 = vmax.f32 %v3486_v40, 0.0  ;;  %v9964_v57 = vld [vmem:[#allocation104_spill] sm:$0xff] }
 0x50c   : > { %v3854_v55 = vmax.f32 %v3271_v26, 0.0  ;;  %v3855_v63 = vmax.f32 %v3624_v42, 0.0  ;;  %v9962_v62 = vmax.f32 %v9960_v31, %v9961_v33  ;;  %v9213_v23 = vmul.f32 %v8425_v30, %v3796_v56 }
 0x50d   : > { %v3797_v10 = vmax.f32 %v9178_v41, 0.0  ;;  %v3735_v28 = vmax.f32 %v3444_v38, 0.0  ;;  %v3824_v11 = vmax.f32 %v3226_v44, 0.0  ;;  %v4310_v49 = vmax.f32 %v4309_v61, %v4088_v32 }
 0x50e   : > { %v9210_v13 = vmax.f32 %v9962_v62, %v4372_v1  ;;  %v4120_v4 = vmul.f32 %v8926_v54, %v3854_v55  ;;  %v4121_v47 = vmul.f32 %v8930_v12, %v3855_v63  ;;  %v4322_v59 = vmax.f32 %v4320_v3, %v4321_v45  ;;  %v9963_v1 = vld [vmem:[#allocation73_spill] sm:$0xff]  ;;  %v3273_v38 = vpop.f32.mrf.mxu3  ;;  %v3626_v43 = vpop.f32.mrf.mxu2 }
 0x50f   : > { %v4337_v46 = vmax.f32 %v9026_v52, %v4336_v37  ;;  %v4091_v27 = vmul.f32 %v8885_v39, %v3825_v48  ;;  %v3582_v21 = vadd.f32 %v9963_v1, %v7804_v19  ;;  %v4029_v51 = vmul.f32 %v8821_v36, %v3763_v20  ;;  %v9966_v52 = vld [vmem:[#allocation6_spill] sm:$0xff]  ;;  %v9969_v37 = vld [vmem:[#allocation105_spill] sm:$0xff] }
 0x510   : > { %v3489_v41 = vadd.f32 %v3488_v2, %v7804_v19  ;;  %v4323_v29 = vsel %vm4140_vm5, %v4121_v47, -inf  ;;  %v4311_v50 = vmax.f32 %v4310_v49, %v4120_v4  ;;  %v4001_v53 = vmul.f32 %v8463_v34, %v3735_v28  ;;  %v9970_v55 = vld [vmem:[#allocation57_spill] sm:$0xff]  ;;  %v9971_v4 = vld [vmem:[#allocation72_spill] sm:$0xff] }
 0x511   : > { %v3187_v40 = vadd.f32 %v9964_v57, %v7825_v60  ;;  %v9967_v24 = vmax.f32 %v9965_v22, %v9966_v52  ;;  %v4324_v35 = vmax.f32 %v4322_v59, %v4323_v29  ;;  %v4090_v58 = vmul.f32 %v8906_v16, %v3824_v11  ;;  %v9975_v22 = vld [vmem:[#allocation89_spill] sm:$0xff] }
 0x512   : > { %v3229_v61 = vadd.f32 %v9968_v25, %v7825_v60  ;;  %v3274_v9 = vadd.f32 %v3273_v38, %v7825_v60  ;;  %v3627_v14 = vadd.f32 %v3626_v43, %v7804_v19  ;;  %4563 = vmatmul.f32.gmra.mxu2 %v4311_v50  ;;  %v4063_v15 = vmul.f32 %v8416_v18, %v3797_v10 }
 0x513   : > { %v4328_v56 = vmax.f32 %v9967_v24, %v9078_v8  ;;  %v4339_v32 = vmax.f32 %v4337_v46, %v9106_v5  ;;  %v4340_v17 = vsel %vm4140_vm5, %v4091_v27, -inf  ;;  %v3827_v8 = vmax.f32 %v3582_v21, 0.0  ;;  %4991 = vmatmul.msk.f32.gmra.mxu3 %vm4140_vm5, %v4324_v35  ;;  %v3491_v5 = vpop.f32.mrf.mxu1 }
 0x514   : > { %v4355_v44 = vsel %vm4140_vm5, %v4029_v51, -inf  ;;  %v3765_v26 = vmax.f32 %v3489_v41, 0.0  ;;  %v3856_v42 = vmax.f32 %v3274_v9, 0.0  ;;  %v3857_v3 = vmax.f32 %v3627_v14, 0.0  ;;  %v9972_v51 = vld [vmem:[#allocation24_spill] sm:$0xff]  ;;  %v9973_v41 = vld [vmem:[#allocation15_spill] sm:$0xff] }
 0x515   : > { %v4391_v45 = vsel %vm4140_vm5, %v4001_v53, -inf  ;;  %v3798_v48 = vmax.f32 %v3187_v40, 0.0  ;;  %v3540_v20 = vadd.f32 %v9969_v37, %v7804_v19  ;;  %v3447_v63 = vadd.f32 %v9970_v55, %v7804_v19  ;;  %v9976_v14 = vld [vmem:[#allocation23_spill] sm:$0xff] }
 0x516   : > { %v3826_v31 = vmax.f32 %v3229_v61, 0.0  ;;  %v4122_v33 = vmul.f32 %v8926_v54, %v3856_v42  ;;  %v4123_v62 = vmul.f32 %v8930_v12, %v3857_v3  ;;  %v4329_v10 = vmax.f32 %v4328_v56, %v4090_v58  ;;  %v3276_v53 = vpop.f32.mrf.mxu3  ;;  %v3629_v57 = vpop.f32.mrf.mxu2 }
 0x517   : > { %v4341_v28 = vmax.f32 %v4339_v32, %v4340_v17  ;;  %v4356_v2 = vmax.f32 %v9145_v6, %v4355_v44  ;;  %v4093_v11 = vmul.f32 %v8885_v39, %v3827_v8  ;;  %v3585_v47 = vadd.f32 %v9971_v4, %v7804_v19  ;;  %v9977_v32 = vld [vmem:[#allocation28_spill] sm:$0xff] }
 0x518   : > { %v4031_v49 = vmul.f32 %v8821_v36, %v3765_v26  ;;  %v3492_v59 = vadd.f32 %v3491_v5, %v7804_v19  ;;  %v4342_v46 = vsel %vm4140_vm5, %v4123_v62, -inf  ;;  %v4330_v27 = vmax.f32 %v4329_v10, %v4122_v33 }
 0x519   : > { %v3799_v1 = vmax.f32 %v3540_v20, 0.0  ;;  %v3737_v21 = vmax.f32 %v3447_v63, 0.0  ;;  %v9974_v29 = vmax.f32 %v9972_v51, %v9973_v41  ;;  %v4343_v6 = vmax.f32 %v4341_v28, %v4342_v46  ;;  %v9980_v28 = vld [vmem:[#allocation107_spill] sm:$0xff]  ;;  %v9985_v51 = vld [vmem:[#allocation96_spill] sm:$0xff] }
 0x51a   : > { %v4092_v40 = vmul.f32 %v8906_v16, %v3826_v31  ;;  %v3232_v52 = vadd.f32 %v9975_v22, %v7825_v60  ;;  %v3277_v24 = vadd.f32 %v3276_v53, %v7825_v60  ;;  %v3630_v56 = vadd.f32 %v3629_v57, %v7804_v19  ;;  %4566 = vmatmul.f32.gmra.mxu2 %v4330_v27 }
 0x51b   : > { %v4347_v50 = vmax.f32 %v9974_v29, %v9166_v0  ;;  %v4376_v35 = vsel %vm4140_vm5, %v4063_v15, -inf  ;;  %v4358_v38 = vmax.f32 %v4356_v2, %v9201_v7  ;;  %v4359_v43 = vsel %vm4140_vm5, %v4093_v11, -inf  ;;  %4992 = vmatmul.msk.f32.gmra.mxu3 %vm4140_vm5, %v4343_v6  ;;  %v3494_v26 = vpop.f32.mrf.mxu1  ;;  %v9981_v11 = vld [vmem:[#allocation108_spill] sm:$0xff] }
 0x51c   : > { %v3829_v0 = vmax.f32 %v3585_v47, 0.0  ;;  %v4374_v58 = vsel %vm4140_vm5, %v4031_v49, -inf  ;;  %v3767_v25 = vmax.f32 %v3492_v59, 0.0  ;;  %v3858_v61 = vmax.f32 %v3277_v24, 0.0  ;;  %v9983_v47 = vld [vmem:[#allocation27_spill] sm:$0xff] }
 0x51d   : > { %v3859_v9 = vmax.f32 %v3630_v56, 0.0  ;;  %v9978_v17 = vmax.f32 %v9976_v14, %v9977_v32  ;;  %v4064_v44 = vmul.f32 %v8425_v30, %v3798_v48  ;;  %v4065_v15 = vmul.f32 %v8416_v18, %v3799_v1 }
 0x51e   : > { %v4003_v7 = vmul.f32 %v8463_v34, %v3737_v21  ;;  %v3828_v42 = vmax.f32 %v3232_v52, 0.0  ;;  %v4124_v3 = vmul.f32 %v8926_v54, %v3858_v61  ;;  %v4348_v20 = vmax.f32 %v4347_v50, %v4092_v40  ;;  %v3279_v27 = vpop.f32.mrf.mxu3  ;;  %v3632_v1 = vpop.f32.mrf.mxu2 }
 0x51f   : > { %v9273_v8 = vmax.f32 %v9978_v17, %v4391_v45  ;;  %v4125_v37 = vmul.f32 %v8930_v12, %v3859_v9  ;;  %v4360_v55 = vmax.f32 %v4358_v38, %v4359_v43  ;;  %v4375_v63 = vmax.f32 %v9210_v13, %v4374_v58  ;;  %v9979_v45 = vld [vmem:[#allocation85_spill] sm:$0xff]  ;;  %v9982_v13 = vld [vmem:[#allocation67_spill] sm:$0xff] }
 0x520   : > { %v4095_v5 = vmul.f32 %v8885_v39, %v3829_v0  ;;  %v3588_v31 = vadd.f32 %v9979_v45, %v7804_v19  ;;  %v4033_v48 = vmul.f32 %v8821_v36, %v3767_v25  ;;  %v3495_v33 = vadd.f32 %v3494_v26, %v7804_v19  ;;  %v9986_v0 = vld [vmem:[#allocation75_spill] sm:$0xff]  ;;  %v9989_v45 = vld [vmem:[#allocation82_spill] sm:$0xff] }
 0x521   : > { %v4361_v62 = vsel %vm4140_vm5, %v4125_v37, -inf  ;;  %v4349_v10 = vmax.f32 %v4348_v20, %v4124_v3  ;;  %v3190_v2 = vadd.f32 %v9980_v28, %v7825_v60  ;;  %v3543_v4 = vadd.f32 %v9981_v11, %v7804_v19  ;;  %v9987_v26 = vld [vmem:[#allocation11_spill] sm:$0xff] }
 0x522   : > { %v9984_v49 = vmax.f32 %v9982_v13, %v9983_v47  ;;  %v4362_v46 = vmax.f32 %v4360_v55, %v4361_v62  ;;  %v4094_v21 = vmul.f32 %v8906_v16, %v3828_v42  ;;  %v3235_v41 = vadd.f32 %v9985_v51, %v7825_v60  ;;  %v9991_v28 = vld [vmem:[#allocation103_spill] sm:$0xff]  ;;  %v9992_v13 = vld [vmem:[#allocation46_spill] sm:$0xff]  ;;  %v9993_v47 = vld [vmem:[#allocation65_spill] sm:$0xff] }
 0x523   : > { %v3280_v29 = vadd.f32 %v3279_v27, %v7825_v60  ;;  %v3633_v50 = vadd.f32 %v3632_v1, %v7804_v19  ;;  %4569 = vmatmul.f32.gmra.mxu2 %v4349_v10  ;;  %v4395_v6 = vsel %vm4140_vm5, %v4065_v15, -inf  ;;  %v4377_v53 = vmax.f32 %v4375_v63, %v4376_v35  ;;  %v3497_v25 = vpop.f32.mrf.mxu1 }
 0x524   : > { %v4366_v59 = vmax.f32 %v9984_v49, %v9213_v23  ;;  %v4378_v57 = vsel %vm4140_vm5, %v4095_v5, -inf  ;;  %v3831_v40 = vmax.f32 %v3588_v31, 0.0  ;;  %4993 = vmatmul.msk.f32.gmra.mxu3 %vm4140_vm5, %v4362_v46  ;;  %v4393_v23 = vsel %vm4140_vm5, %v4033_v48, -inf  ;;  %v9988_v5 = vld [vmem:[#allocation40_spill] sm:$0xff] }
 0x525   : > { %v3769_v22 = vmax.f32 %v3495_v33, 0.0  ;;  %v3860_v52 = vmax.f32 %v3280_v29, 0.0  ;;  %v3861_v24 = vmax.f32 %v3633_v50, 0.0  ;;  %v4410_v56 = vsel %vm4140_vm5, %v4003_v7, -inf }
 0x526   : > { %v3800_v38 = vmax.f32 %v3190_v2, 0.0  ;;  %v3801_v43 = vmax.f32 %v3543_v4, 0.0  ;;  %v3450_v58 = vadd.f32 %v9986_v0, %v7804_v19  ;;  %v3830_v61 = vmax.f32 %v3235_v41, 0.0  ;;  %v3282_v33 = vpop.f32.mrf.mxu3  ;;  %v3635_v62 = vpop.f32.mrf.mxu2 }
 0x527   : > { %v4126_v35 = vmul.f32 %v8926_v54, %v3860_v52  ;;  %v4127_v9 = vmul.f32 %v8930_v12, %v3861_v24  ;;  %v4367_v14 = vmax.f32 %v4366_v59, %v4094_v21  ;;  %v4379_v32 = vmax.f32 %v4377_v53, %v4378_v57  ;;  %v9995_v57 = vld [vmem:[#allocation19_spill] sm:$0xff]  ;;  %v9996_v24 = vld [vmem:[#allocation14_spill] sm:$0xff] }
 0x528   : > { %v4394_v17 = vmax.f32 %v9273_v8, %v4393_v23  ;;  %v4097_v15 = vmul.f32 %v8885_v39, %v3831_v40  ;;  %v3591_v7 = vadd.f32 %v9987_v26, %v7804_v19  ;;  %v4035_v42 = vmul.f32 %v8821_v36, %v3769_v22 }
 0x529   : > { %v3498_v3 = vadd.f32 %v3497_v25, %v7804_v19  ;;  %v4380_v37 = vsel %vm4140_vm5, %v4127_v9, -inf  ;;  %v4368_v20 = vmax.f32 %v4367_v14, %v4126_v35  ;;  %v4067_v55 = vmul.f32 %v8416_v18, %v3801_v43 }
 0x52a   : > { %v3739_v63 = vmax.f32 %v3450_v58, 0.0  ;;  %v9990_v31 = vmax.f32 %v9988_v5, %v9989_v45  ;;  %v4381_v8 = vmax.f32 %v4379_v32, %v4380_v37  ;;  %v4096_v10 = vmul.f32 %v8906_v16, %v3830_v61  ;;  %v9998_v32 = vld [vmem:[#allocation59_spill] sm:$0xff]  ;;  %v10002_v5 = vld [vmem:[#allocation69_spill] sm:$0xff]  ;;  %v10003_v45 = vld [vmem:[#allocation50_spill] sm:$0xff] }
 0x52b   : > { %v3238_v2 = vadd.f32 %v9991_v28, %v7825_v60  ;;  %v3283_v11 = vadd.f32 %v3282_v33, %v7825_v60  ;;  %v3636_v4 = vadd.f32 %v3635_v62, %v7804_v19  ;;  %4572 = vmatmul.f32.gmra.mxu2 %v4368_v20  ;;  %v9994_v49 = vmax.f32 %v9992_v13, %v9993_v47 }
 0x52c   : > { %v4385_v48 = vmax.f32 %v9990_v31, %v4064_v44  ;;  %v4396_v46 = vmax.f32 %v4394_v17, %v4395_v6  ;;  %v4397_v44 = vsel %vm4140_vm5, %v4097_v15, -inf  ;;  %v3833_v27 = vmax.f32 %v3591_v7, 0.0  ;;  %4994 = vmatmul.msk.f32.gmra.mxu3 %vm4140_vm5, %v4381_v8  ;;  %v9999_v17 = vld [vmem:[#allocation60_spill] sm:$0xff] }
 0x52d   : > { %v4411_v59 = vmax.f32 %v9994_v49, %v4410_v56  ;;  %v4412_v1 = vsel %vm4140_vm5, %v4035_v42, -inf  ;;  %v3771_v21 = vmax.f32 %v3498_v3, 0.0  ;;  %v3862_v51 = vmax.f32 %v3283_v11, 0.0 }
 0x52e   : > { %v3863_v41 = vmax.f32 %v3636_v4, 0.0  ;;  %v4066_v29 = vmul.f32 %v8425_v30, %v3800_v38  ;;  %v4414_v50 = vsel %vm4140_vm5, %v4067_v55, -inf  ;;  %v4005_v53 = vmul.f32 %v8463_v34, %v3739_v63  ;;  %v9997_v34 = vld [vmem:[#allocation51_spill] sm:$0xff]  ;;  %v3285_v42 = vpop.f32.mrf.mxu3  ;;  %v3638_v3 = vpop.f32.mrf.mxu2 }
 0x52f   : > { %v3546_v40 = vadd.f32 %v9995_v57, %v7804_v19  ;;  %v3832_v6 = vmax.f32 %v3238_v2, 0.0  ;;  %v4128_v23 = vmul.f32 %v8926_v54, %v3862_v51  ;;  %v4386_v52 = vmax.f32 %v4385_v48, %v4096_v10  ;;  %v10005_v57 = vld [vmem:[#allocation62_spill] sm:$0xff] }
 0x530   : > { %v4129_v22 = vmul.f32 %v8930_v12, %v3863_v41  ;;  %v3193_v56 = vadd.f32 %v9996_v24, %v7825_v60  ;;  %v4398_v43 = vmax.f32 %v4396_v46, %v4397_v44  ;;  %v4413_v0 = vmax.f32 %v4411_v59, %v4412_v1 }
 0x531   : > { %v4099_v38 = vmul.f32 %v8885_v39, %v3833_v27  ;;  %v4037_v58 = vmul.f32 %v8821_v36, %v3771_v21  ;;  %v3594_v25 = vadd.f32 %v9997_v34, %v7804_v19  ;;  %v4387_v35 = vmax.f32 %v4386_v52, %v4128_v23  ;;  %v10001_v36 = vld [vmem:[#allocation21_spill] sm:$0xff] }
 0x532   : > { %v4399_v61 = vsel %vm4140_vm5, %v4129_v22, -inf  ;;  %v4429_v9 = vsel %vm4140_vm5, %v4005_v53, -inf  ;;  %v3803_v14 = vmax.f32 %v3546_v40, 0.0  ;;  %v10000_v15 = vmax.f32 %v9998_v32, %v9999_v17  ;;  %v10004_v53 = vld [vmem:[#allocation80_spill] sm:$0xff] }
 0x533   : > { %v4400_v7 = vmax.f32 %v4398_v43, %v4399_v61  ;;  %v4098_v37 = vmul.f32 %v8906_v16, %v3832_v6  ;;  %v3241_v20 = vadd.f32 %v10001_v36, %v7825_v60  ;;  %v3286_v55 = vadd.f32 %v3285_v42, %v7825_v60  ;;  %4575 = vmatmul.f32.gmra.mxu2 %v4387_v35 }
 0x534   : > { %v4404_v26 = vmax.f32 %v10000_v15, %v4066_v29  ;;  %v3639_v63 = vadd.f32 %v3638_v3, %v7804_v19  ;;  %v4428_v31 = vmax.f32 %v10003_v45, %v10002_v5  ;;  %v3802_v48 = vmax.f32 %v3193_v56, 0.0 }
 0x535   : > { %v4415_v8 = vmax.f32 %v4413_v0, %v4414_v50  ;;  %v4416_v33 = vsel %vm4140_vm5, %v4099_v38, -inf  ;;  %4995 = vmatmul.msk.f32.gmra.mxu3 %vm4140_vm5, %v4400_v7  ;;  %v4431_v62 = vsel %vm4140_vm5, %v4037_v58, -inf  ;;  %v3835_v10 = vmax.f32 %v3594_v25, 0.0 }
 0x536   : > { %v3864_v28 = vmax.f32 %v3286_v55, 0.0  ;;  %v3865_v2 = vmax.f32 %v3639_v63, 0.0  ;;  %v4430_v11 = vmax.f32 %v4428_v31, %v4429_v9  ;;  %v4069_v4 = vmul.f32 %v8416_v18, %v3803_v14 }
 0x537   : > { %v3834_v13 = vmax.f32 %v3241_v20, 0.0  ;;  %v4405_v59 = vmax.f32 %v4404_v26, %v4098_v37  ;;  %v4417_v46 = vmax.f32 %v4415_v8, %v4416_v33  ;;  %v4068_v27 = vmul.f32 %v8425_v30, %v3802_v48  ;;  %v3288_v50 = vpop.f32.mrf.mxu3  ;;  %v3641_v18 = vpop.f32.mrf.mxu2 }
 0x538   : > { %v4130_v47 = vmul.f32 %v8926_v54, %v3864_v28  ;;  %v4131_v49 = vmul.f32 %v8930_v12, %v3865_v2  ;;  %v4432_v44 = vmax.f32 %v4430_v11, %v4431_v62  ;;  %v4101_v1 = vmul.f32 %v8885_v39, %v3835_v10 }
 0x539   : > { %v4433_v41 = vsel %vm4140_vm5, %v4069_v4, -inf  ;;  %v10006_v40 = vmax.f32 %v10004_v53, %v10005_v57  ;;  %v4100_v23 = vmul.f32 %v8906_v16, %v3834_v13  ;;  %v3289_v22 = vadd.f32 %v3288_v50, %v7825_v60 }
 0x53a   : > { %v4418_v21 = vsel %vm4140_vm5, %v4131_v49, -inf  ;;  %v4406_v51 = vmax.f32 %v4405_v59, %v4130_v47  ;;  %v3642_v30 = vadd.f32 %v3641_v18, %v7804_v19  ;;  %v4434_v39 = vmax.f32 %v4432_v44, %v4433_v41  ;;  %v9381_v19 = vld [vmem:[%s9458_s5] ss:$0 sm:$0xff] }
 0x53b   : > { %v4419_v29 = vmax.f32 %v4417_v46, %v4418_v21  ;;  %v4423_v6 = vmax.f32 %v10006_v40, %v4068_v27  ;;  %v4435_v52 = vsel %vm4140_vm5, %v4101_v1, -inf  ;;  %v3866_v24 = vmax.f32 %v3289_v22, 0.0 }
 0x53c   : > { %4578 = vmatmul.f32.gmra.mxu2 %v4406_v51  ;;  %v3867_v56 = vmax.f32 %v3642_v30, 0.0  ;;  %v4436_v58 = vmax.f32 %v4434_v39, %v4435_v52 }
 0x53d   : > { %4996 = vmatmul.msk.f32.gmra.mxu3 %vm4140_vm5, %v4419_v29  ;;  %v4132_v43 = vmul.f32 %v8926_v54, %v3866_v24  ;;  %v4424_v38 = vmax.f32 %v4423_v6, %v4100_v23 }
 0x53e   : > { %v4133_v0 = vmul.f32 %v8930_v12, %v3867_v56 }
 0x53f   : > { %v4425_v60 = vmax.f32 %v4424_v38, %v4132_v43 }
 0x540   : > { %v4437_v16 = vsel %vm4140_vm5, %v4133_v0, -inf }
 0x541   : > { %v4438_v34 = vmax.f32 %v4436_v58, %v4437_v16 }
 0x544   : > { %4581 = vmatmul.f32.gmra.mxu2 %v4425_v60 }
 0x545   : > { %4997 = vmatmul.msk.f32.gmra.mxu3 %vm4140_vm5, %v4438_v34 }
 0x54c   : > { %v4537_v25 = vpop.f32.mrf.mxu2 }
 0x54d   : > { %v4538_v54 = vadd.f32 %v9381_v19, %v4537_v25  ;;  %v4602_v61 = vpop.f32.mrf.mxu3 }
 0x54f   : > { %v4603_v12 = vadd.f32 %v4602_v61, %v4538_v54 }
 0x551   : > { %4650 = vst [vmem:[%s9385_s19] sm:$0xff] %v4603_v12 }
 0x554   : > { %v4540_v35 = vpop.f32.mrf.mxu2 }
 0x555   : > { %v4541_v9 = vadd.f32 %v9381_v19, %v4540_v35  ;;  %v4605_v14 = vpop.f32.mrf.mxu3 }
 0x557   : > { %v4606_v32 = vadd.f32 %v4605_v14, %v4541_v9 }
 0x559   : > { %4651 = vst [vmem:[%s9385_s19 + $0x8] sm:$0xff] %v4606_v32 }
 0x55c   : > { %v4543_v17 = vpop.f32.mrf.mxu2 }
 0x55d   : > { %v4544_v15 = vadd.f32 %v9381_v19, %v4543_v17  ;;  %v4608_v26 = vpop.f32.mrf.mxu3 }
 0x55f   : > { %v4609_v7 = vadd.f32 %v4608_v26, %v4544_v15 }
 0x561   : > { %4652 = vst [vmem:[%s9385_s19 + $0x10] sm:$0xff] %v4609_v7 }
 0x564   : > { %v4546_v42 = vpop.f32.mrf.mxu2 }
 0x565   : > { %v4547_v3 = vadd.f32 %v9381_v19, %v4546_v42  ;;  %v4611_v37 = vpop.f32.mrf.mxu3 }
 0x567   : > { %v4612_v36 = vadd.f32 %v4611_v37, %v4547_v3 }
 0x569   : > { %4653 = vst [vmem:[%s9385_s19 + $0x18] sm:$0xff] %v4612_v36 }
 0x56c   : > { %v4549_v20 = vpop.f32.mrf.mxu2 }
 0x56d   : > { %v4550_v55 = vadd.f32 %v9381_v19, %v4549_v20  ;;  %v4614_v63 = vpop.f32.mrf.mxu3 }
 0x56f   : > { %v4615_v5 = vadd.f32 %v4614_v63, %v4550_v55 }
 0x571   : > { %4654 = vst [vmem:[%s9385_s19 + $0x20] sm:$0xff] %v4615_v5 }
 0x574   : > { %v4552_v45 = vpop.f32.mrf.mxu2 }
 0x575   : > { %v4553_v31 = vadd.f32 %v9381_v19, %v4552_v45  ;;  %v4617_v48 = vpop.f32.mrf.mxu3 }
 0x577   : > { %v4618_v8 = vadd.f32 %v4617_v48, %v4553_v31 }
 0x579   : > { %4655 = vst [vmem:[%s9385_s19 + $0x28] sm:$0xff] %v4618_v8 }
 0x57c   : > { %v4555_v33 = vpop.f32.mrf.mxu2 }
 0x57d   : > { %v4556_v62 = vadd.f32 %v9381_v19, %v4555_v33  ;;  %v4620_v10 = vpop.f32.mrf.mxu3 }
 0x57f   : > { %v4621_v28 = vadd.f32 %v4620_v10, %v4556_v62 }
 0x581   : > { %4656 = vst [vmem:[%s9385_s19 + $0x30] sm:$0xff] %v4621_v28 }
 0x585   : > { %v4558_v2 = vpop.f32.mrf.mxu2 }
 0x586   : > { %v4559_v11 = vadd.f32 %v9381_v19, %v4558_v2  ;;  %v4623_v4 = vpop.f32.mrf.mxu3 }
 0x588   : > { %v4624_v13 = vadd.f32 %v4623_v4, %v4559_v11 }
 0x58a   : > { %4657 = vst [vmem:[%s9385_s19 + $0x38] sm:$0xff] %v4624_v13 }
 0x58d   : > { %v4561_v47 = vpop.f32.mrf.mxu2 }
 0x58e   : > { %v4562_v49 = vadd.f32 %v9381_v19, %v4561_v47  ;;  %v4626_v59 = vpop.f32.mrf.mxu3 }
 0x590   : > { %v4627_v46 = vadd.f32 %v4626_v59, %v4562_v49 }
 0x592   : > { %4658 = vst [vmem:[%s9385_s19 + $0x40] sm:$0xff] %v4627_v46 }
 0x595   : > { %v4564_v44 = vpop.f32.mrf.mxu2 }
 0x596   : > { %v4565_v27 = vadd.f32 %v9381_v19, %v4564_v44  ;;  %v4629_v1 = vpop.f32.mrf.mxu3 }
 0x598   : > { %v4630_v21 = vadd.f32 %v4629_v1, %v4565_v27 }
 0x59a   : > { %4659 = vst [vmem:[%s9385_s19 + $0x48] sm:$0xff] %v4630_v21 }
 0x59d   : > { %v4567_v51 = vpop.f32.mrf.mxu2 }
 0x59e   : > { %v4568_v41 = vadd.f32 %v9381_v19, %v4567_v51  ;;  %v4632_v29 = vpop.f32.mrf.mxu3 }
 0x5a0   : > { %v4633_v50 = vadd.f32 %v4632_v29, %v4568_v41 }
 0x5a2   : > { %4660 = vst [vmem:[%s9385_s19 + $0x50] sm:$0xff] %v4633_v50 }
 0x5a6   : > { %v4570_v18 = vpop.f32.mrf.mxu2 }
 0x5a7   : > { %v4571_v53 = vadd.f32 %v9381_v19, %v4570_v18  ;;  %v4635_v57 = vpop.f32.mrf.mxu3 }
 0x5a9   : > { %v4636_v40 = vadd.f32 %v4635_v57, %v4571_v53 }
 0x5ab   : > { %4661 = vst [vmem:[%s9385_s19 + $0x58] sm:$0xff] %v4636_v40 }
 0x5ae   : > { %v4573_v6 = vpop.f32.mrf.mxu2 }
 0x5af   : > { %v4574_v23 = vadd.f32 %v9381_v19, %v4573_v6  ;;  %v4638_v22 = vpop.f32.mrf.mxu3 }
 0x5b1   : > { %v4639_v30 = vadd.f32 %v4638_v22, %v4574_v23 }
 0x5b3   : > { %4662 = vst [vmem:[%s9385_s19 + $0x60] sm:$0xff] %v4639_v30 }
 0x5b6   : > { %v4576_v39 = vpop.f32.mrf.mxu2 }
 0x5b7   : > { %v4577_v52 = vadd.f32 %v9381_v19, %v4576_v39 }
 0x5b8   : > { %v4641_v24 = vpop.f32.mrf.mxu3 }
 0x5b9   : > { %v4642_v56 = vadd.f32 %v4641_v24, %v4577_v52 }
 0x5bb   : > { %4663 = vst [vmem:[%s9385_s19 + $0x68] sm:$0xff] %v4642_v56 }
 0x5bf   : > { %v4579_v43 = vpop.f32.mrf.mxu2 }
 0x5c0   : > { %v4580_v0 = vadd.f32 %v9381_v19, %v4579_v43  ;;  %v4644_v38 = vpop.f32.mrf.mxu3 }
 0x5c2   : > { %v4645_v58 = vadd.f32 %v4644_v38, %v4580_v0 }
 0x5c4   : > { %4664 = vst [vmem:[%s9385_s19 + $0x70] sm:$0xff] %v4645_v58 }
 0x5c7   : > { %v4582_v16 = vpop.f32.mrf.mxu2 }
 0x5c8   : > { %v4583_v60 = vadd.f32 %v9381_v19, %v4582_v16  ;;  %v4647_v34 = vpop.f32.mrf.mxu3 }
 0x5ca   : > { %v4648_v25 = vadd.f32 %v4647_v34, %v4583_v60 }
 0x5cc   : > { %4665 = vst [vmem:[%s9385_s19 + $0x78] sm:$0xff] %v4648_v25 }
 0x5cd   : > { %5208 = shalt.err (!%p5205_p5)
}
 0x5ce   : > { %s5248_s16 = smov 128   ;;  %s5249_s19 = smov 8  }
 0x5cf   : > { %5027 = dma.vmem_to_hbm [thread:$0]  (%p5323_p6), %s4680_s11, 2048, %s4682_s12, %s4667_s18, %s5248_s16, %s5248_s16, %s5249_s19  }
 0x5d0 PF: > { %s4696_s20 = sand.u32 1, %s5231_s21   ;;  %p5030_p7 = pnand %p4752_p9, %p5327_p8 }
 0x5d1   : > { %s4697_s26 = scalar_lea.sflag [#allocation4], %s4696_s20 }
 0x5d2   : > { %p5031_p10 = pneg %p5030_p7 }
 0x5d4   : > { %5226 = dma.done.wait (%p5031_p10), %s4697_s26, 2048  }
 0x5d5   : > { %5228 = vsyncadd (%p5031_p10), %s4697_s26, 4294965248  ;;  %p16_p11 = scmp.ge.s32.totalorder %s5308_s27, 4   ;;  %s10007_s21 = smov %s5235_s22 }
 0x5d6   : > { %s10008_s22 = smov %s5239_s23  ;;  %s10009_s23 = smov %s5321_s30 }
 0x5d7   : > { %s10010_s24 = smov %s5308_s27  ;;  %18 = sbr.rel (!%p16_p11) target bundleno = 3 (0x3), region = 122 }
 0x5dc   :  { %4703 = vsyncpa [#allocation4], 1 }
 0x5dd   :  { %4705 = vsyncpa [#allocation4 + $0x1], 1 }

</bundles_post_ra>
